<compile_context>
chip_gen: v7x
topology: tpu7x:2x2x1
jax: 0.10.0
libtpu: 0.0.40
codegen_flags: <defaults>
</compile_context>

<pallas_src>
import functools

import jax
import jax.numpy as jnp
import numpy as np
from jax.experimental import pallas as pl
from jax.experimental.pallas import tpu as pltpu


def _round_up(x, m):
    return (x + m - 1) // m * m


def _simconv_kernel(x_ref, w_ref, shift_ref, o_ref, lhs_ref, *,
                    toh, m_row, k, stride, wp, cin_pad):
    """One (image, output-row-tile) per grid step.

    x_ref    : (rows_blk, cin_pad)        f32  flattened padded input window (+halo)
    w_ref    : (k*k*cin_pad, cout_pad)    bf16 im2col weights, BN scale folded in
    shift_ref: (1, cout_pad)              f32  folded BN shift
    o_ref    : (toh*m_row, cout_pad)      bf16 stride-1-in-width conv rows
    lhs_ref  : (toh*m_row, k*k*cin_pad)   bf16 VMEM scratch: im2col LHS
    """
    # ---- im2col assembly: static row-shifted copies into the bf16 scratch ----
    # Every tap (kh, kw) of output row r is a contiguous run of the slab
    # starting at r*stride*wp + kh*wp + kw; the cast to bf16 fuses into the copy.
    for r in range(toh):                       # output row within the tile
        dst = r * m_row
        src0 = r * stride * wp
        for kh in range(k):
            for kw in range(k):
                t = kh * k + kw
                src = src0 + kh * wp + kw
                lhs_ref[dst:dst + m_row, t * cin_pad:(t + 1) * cin_pad] = (
                    x_ref[src:src + m_row, :].astype(jnp.bfloat16))

    # ---- one MXU matmul (f32 accumulation), fused BN shift + ReLU, bf16 store ----
    acc = jnp.dot(lhs_ref[...], w_ref[...], preferred_element_type=jnp.float32)
    y = acc + shift_ref[...]
    o_ref[...] = jnp.maximum(y, 0.0).astype(o_ref.dtype)


def _pick_row_tile(ho_n, stride, wp, m_row, cin_pad, cout_pad, k):
    """Largest output-row tile whose per-step footprint fits the VMEM budget.

    12 MiB per buffer set -> with double buffering well under the 48 MiB limit
    (which itself fits v7x's 64 MiB physical VMEM).  The input-slab term counts
    the internal 128-lane padding of the channel-thin slab (the '16x' trap).
    """
    kk = k * k
    budget = 12 * 1024 * 1024
    best = 1
    for toh in range(1, min(ho_n, 16) + 1):
        rows_blk = _round_up((toh - 1) * stride * wp + (k - 1) * (wp + 1) + m_row, 16)
        in_b = rows_blk * _round_up(cin_pad, 128) * 4           # f32 slab, lane-padded
        out_b = toh * m_row * cout_pad * 2                      # bf16 output tile
        lhs_b = toh * m_row * _round_up(kk * cin_pad, 128) * 2  # bf16 im2col scratch
        if in_b + out_b + lhs_b <= budget:
            best = toh
    return best


@functools.partial(jax.jit, static_argnames=("kernel_size", "stride", "row_tile"))
def simconv_forward(x_nchw, conv_w, gamma, beta, running_mean, running_var,
                    kernel_size, stride, row_tile=None, eps=1e-5):
    """SimConv.forward: ReLU(BN(Conv2d(x))).  x_nchw: (N, Cin, H, W) f32 (NCHW)."""
    n, cin, h, w = x_nchw.shape
    cout = conv_w.shape[0]
    k, s = kernel_size, stride
    pad = k // 2                               # matches nn.Conv2d(padding=k // 2)
    hp, wp = h + 2 * pad, w + 2 * pad
    ho_n = (h + 2 * pad - k) // s + 1
    wo_n = (w + 2 * pad - k) // s + 1
    w1 = wp - k + 1                            # stride-1 output width

    cin_pad = _round_up(cin, 8)
    cout_pad = _round_up(cout, 128)            # lane-dense, unmasked output stores
    m_row = _round_up(w1, 16)                  # stride-1 positions evaluated per out row

    if row_tile is None:
        toh = _pick_row_tile(ho_n, s, wp, m_row, cin_pad, cout_pad, k)
    else:
        toh = row_tile
    toh = max(1, min(toh, ho_n))
    n_tiles = -(-ho_n // toh)

    rows_blk = _round_up((toh - 1) * s * wp + (k - 1) * (wp + 1) + m_row, 16)
    step = toh * s * wp
    l_total = max((n_tiles - 1) * step + rows_blk, hp * wp)

    # ---- layout glue (layout only; the conv itself never leaves the kernel) ----
    # TODO(synk): keep the surrounding model NHWC end-to-end to drop this transpose.
    x_nhwc = jnp.transpose(x_nchw, (0, 2, 3, 1)).astype(jnp.float32)
    x_p = jnp.pad(x_nhwc, ((0, 0), (pad, pad), (pad, pad), (0, cin_pad - cin)))
    x_flat = x_p.reshape(n, hp * wp, cin_pad)
    x_flat = jnp.pad(x_flat, ((0, 0), (0, l_total - hp * wp), (0, 0)))
    # Per-tile windows including the conv halo -> non-overlapping blocks for the
    # BlockSpec pipeline (duplication is only ~(k-1) padded rows per tile).
    x_tiles = jnp.stack(
        [x_flat[:, r * step:r * step + rows_blk, :] for r in range(n_tiles)], axis=1)
    # TODO(synk): ship the slab as bf16 to additionally halve input DMA bytes.

    # Fold inference-mode BatchNorm into the conv weights + a shift.
    scale = gamma * jax.lax.rsqrt(running_var + eps)
    shift = beta - running_mean * scale
    # conv_w is OIHW (Cout, Cin, kh, kw) -> (kh, kw, Cin, Cout), scale folded in,
    # then flattened to the im2col K dim (tap-major, channel-minor).
    w_hwio = jnp.transpose(conv_w, (2, 3, 1, 0)) * scale[None, None, None, :]
    w_hwio = jnp.pad(w_hwio, ((0, 0), (0, 0),
                              (0, cin_pad - cin), (0, cout_pad - cout)))
    w_mat = w_hwio.reshape(k * k * cin_pad, cout_pad).astype(jnp.bfloat16)
    shift_p = jnp.pad(shift, (0, cout_pad - cout)).reshape(1, cout_pad)
    shift_p = shift_p.astype(jnp.float32)

    kernel = functools.partial(_simconv_kernel, toh=toh, m_row=m_row, k=k,
                               stride=s, wp=wp, cin_pad=cin_pad)

    out = pl.pallas_call(
        kernel,
        out_shape=jax.ShapeDtypeStruct((n, n_tiles * toh * m_row, cout_pad),
                                       jnp.bfloat16),
        grid_spec=pltpu.PrefetchScalarGridSpec(
            num_scalar_prefetch=0,
            grid=(n, n_tiles),                       # image x output-row tile
            in_specs=[
                pl.BlockSpec((None, None, rows_blk, cin_pad),
                             lambda b, r: (b, r, 0, 0)),
                pl.BlockSpec((k * k * cin_pad, cout_pad), lambda b, r: (0, 0)),
                pl.BlockSpec((1, cout_pad), lambda b, r: (0, 0)),
            ],
            out_specs=pl.BlockSpec((None, toh * m_row, cout_pad),
                                   lambda b, r: (b, r, 0)),
            scratch_shapes=[pltpu.VMEM((toh * m_row, k * k * cin_pad),
                                       jnp.bfloat16)],
        ),
        compiler_params=pltpu.CompilerParams(
            dimension_semantics=("parallel", "parallel"),   # both axes independent
            vmem_limit_bytes=48 * 1024 * 1024),             # fits v7x's 64 MiB VMEM
    )(x_tiles, w_mat, shift_p)

    # (N, rows, m_row, Cout_pad): rows = output rows (only the needed ones),
    # columns = stride-1 width positions -> subsample columns, crop pad channels.
    full = out.reshape(n, n_tiles * toh, m_row, cout_pad)
    y = full[:, :ho_n, ::s, :cout][:, :, :wo_n]              # (N, Ho, Wo, Cout)
    # TODO(synk): subsample columns inside the kernel for stride > 1 to drop the
    #             remaining ~s x width overcompute/writeback.
    return jnp.transpose(y, (0, 3, 1, 2)).astype(jnp.float32)  # back to NCHW f32


def _reference(x_nchw, conv_w, gamma, beta, running_mean, running_var,
               kernel_size, stride, eps=1e-5):
    pad = kernel_size // 2
    y = jax.lax.conv_general_dilated(
        x_nchw, conv_w, window_strides=(stride, stride),
        padding=[(pad, pad), (pad, pad)],
        dimension_numbers=("NCHW", "OIHW", "NCHW"))
    scale = gamma / jnp.sqrt(running_var + eps)
    shift = beta - running_mean * scale
    y = y * scale[None, :, None, None] + shift[None, :, None, None]
    return jnp.maximum(y, 0.0)


if __name__ == "__main__":
    # SimConv(in_channels=4, out_channels=32, kernel_size=3, stride={1,2})
    N, CIN, H, W = 2, 4, 16, 16
    COUT, K = 32, 3

    key = jax.random.PRNGKey(0)
    k_x, k_w, k_g, k_b = jax.random.split(key, 4)

    x = jax.random.normal(k_x, (N, CIN, H, W), dtype=jnp.float32)
    # Deterministic synthetic parameters (shapes from nn.Conv2d / nn.BatchNorm2d).
    conv_w = 0.1 * jax.random.normal(k_w, (COUT, CIN, K, K), dtype=jnp.float32)
    gamma = 1.0 + 0.1 * jax.random.normal(k_g, (COUT,), dtype=jnp.float32)
    beta = 0.1 * jax.random.normal(k_b, (COUT,), dtype=jnp.float32)
    running_mean = jnp.zeros((COUT,), jnp.float32)   # fresh BatchNorm2d stats
    running_var = jnp.ones((COUT,), jnp.float32)

    # bf16 MXU operands / bf16 store with f32 accumulation -> loosened tolerance.
    # row_tile=None exercises the auto tile chooser (single tile at this size);
    # row_tile=4 exercises multi-tile row pipelining + the halo logic.
    for stride in (1, 2):
        ref = _reference(x, conv_w, gamma, beta, running_mean, running_var,
                         kernel_size=K, stride=stride)
        for rt in (None, 4):
            out = simconv_forward(x, conv_w, gamma, beta, running_mean,
                                  running_var, kernel_size=K, stride=stride,
                                  row_tile=rt)
            out = jax.block_until_ready(out)
            np.testing.assert_allclose(np.asarray(out), np.asarray(ref),
                                       rtol=2e-2, atol=2e-2)

    print("KERNEL_OK")
</pallas_src>

<mosaic_0001>
module attributes {stable_mosaic.version = 11 : i64} {
  func.func @_simconv_kernel(%arg0: i32, %arg1: i32, %arg2: memref<1x1x336x8xf32, #tpu.memory_space<vmem>>, %arg3: memref<72x128xbf16, #tpu.memory_space<vmem>>, %arg4: memref<1x128xf32, #tpu.memory_space<vmem>>, %arg5: memref<1x256x128xbf16, #tpu.memory_space<vmem>>, %arg6: memref<256x72xbf16, #tpu.memory_space<vmem>>) attributes {dimension_semantics = [#tpu.dimension_semantics<parallel>, #tpu.dimension_semantics<parallel>], iteration_bounds = array<i64: 2, 1>, scalar_prefetch = 0 : i64, scratch_operands = 1 : i64, tpu.core_type = #tpu.core_type<tc>, window_params = [{transform_indices = @transform_0, window_bounds = array<i64: 1, 1, 336, 8>}, {pipeline_mode = #tpu.pipeline_mode<synchronous>, transform_indices = @transform_1, window_bounds = array<i64: 72, 128>}, {pipeline_mode = #tpu.pipeline_mode<synchronous>, transform_indices = @transform_2, window_bounds = array<i64: 1, 128>}, {transform_indices = @transform_3, window_bounds = array<i64: 1, 256, 128>}]} {
    %c0 = arith.constant 0 : index
    %c0_0 = arith.constant 0 : index
    %c0_1 = arith.constant 0 : index
    %c0_2 = arith.constant 0 : index
    %0 = vector.load %arg2[%c0, %c0_0, %c0_1, %c0_2] : memref<1x1x336x8xf32, #tpu.memory_space<vmem>>, vector<1x1x16x8xf32>
    %1 = vector.shape_cast %0 : vector<1x1x16x8xf32> to vector<16x8xf32>
    %2 = arith.truncf %1 : vector<16x8xf32> to vector<16x8xbf16>
    %c0_3 = arith.constant 0 : index
    %c0_4 = arith.constant 0 : index
    %3 = vector.load %arg6[%c0_3, %c0_4] : memref<256x72xbf16, #tpu.memory_space<vmem>>, vector<16x8xbf16>
    tpu.vector_store %arg6[%c0_3, %c0_4], %2 {strides = array<i32>} : memref<256x72xbf16, #tpu.memory_space<vmem>>, vector<16x8xbf16>,
    %c0_5 = arith.constant 0 : index
    %c0_6 = arith.constant 0 : index
    %c1 = arith.constant 1 : index
    %c0_7 = arith.constant 0 : index
    %4 = vector.load %arg2[%c0_5, %c0_6, %c1, %c0_7] : memref<1x1x336x8xf32, #tpu.memory_space<vmem>>, vector<1x1x16x8xf32>
    %5 = vector.shape_cast %4 : vector<1x1x16x8xf32> to vector<16x8xf32>
    %6 = arith.truncf %5 : vector<16x8xf32> to vector<16x8xbf16>
    %c0_8 = arith.constant 0 : index
    %c8 = arith.constant 8 : index
    %7 = vector.load %arg6[%c0_8, %c8] : memref<256x72xbf16, #tpu.memory_space<vmem>>, vector<16x8xbf16>
    tpu.vector_store %arg6[%c0_8, %c8], %6 {strides = array<i32>} : memref<256x72xbf16, #tpu.memory_space<vmem>>, vector<16x8xbf16>,
    %c0_9 = arith.constant 0 : index
    %c0_10 = arith.constant 0 : index
    %c2 = arith.constant 2 : index
    %c0_11 = arith.constant 0 : index
    %8 = vector.load %arg2[%c0_9, %c0_10, %c2, %c0_11] : memref<1x1x336x8xf32, #tpu.memory_space<vmem>>, vector<1x1x16x8xf32>
    %9 = vector.shape_cast %8 : vector<1x1x16x8xf32> to vector<16x8xf32>
    %10 = arith.truncf %9 : vector<16x8xf32> to vector<16x8xbf16>
    %c0_12 = arith.constant 0 : index
    %c16 = arith.constant 16 : index
    %11 = vector.load %arg6[%c0_12, %c16] : memref<256x72xbf16, #tpu.memory_space<vmem>>, vector<16x8xbf16>
    tpu.vector_store %arg6[%c0_12, %c16], %10 {strides = array<i32>} : memref<256x72xbf16, #tpu.memory_space<vmem>>, vector<16x8xbf16>,
    %c0_13 = arith.constant 0 : index
    %c0_14 = arith.constant 0 : index
    %c18 = arith.constant 18 : index
    %c0_15 = arith.constant 0 : index
    %12 = vector.load %arg2[%c0_13, %c0_14, %c18, %c0_15] : memref<1x1x336x8xf32, #tpu.memory_space<vmem>>, vector<1x1x16x8xf32>
    %13 = vector.shape_cast %12 : vector<1x1x16x8xf32> to vector<16x8xf32>
    %14 = arith.truncf %13 : vector<16x8xf32> to vector<16x8xbf16>
    %c0_16 = arith.constant 0 : index
    %c24 = arith.constant 24 : index
    %15 = vector.load %arg6[%c0_16, %c24] : memref<256x72xbf16, #tpu.memory_space<vmem>>, vector<16x8xbf16>
    tpu.vector_store %arg6[%c0_16, %c24], %14 {strides = array<i32>} : memref<256x72xbf16, #tpu.memory_space<vmem>>, vector<16x8xbf16>,
    %c0_17 = arith.constant 0 : index
    %c0_18 = arith.constant 0 : index
    %c19 = arith.constant 19 : index
    %c0_19 = arith.constant 0 : index
    %16 = vector.load %arg2[%c0_17, %c0_18, %c19, %c0_19] : memref<1x1x336x8xf32, #tpu.memory_space<vmem>>, vector<1x1x16x8xf32>
    %17 = vector.shape_cast %16 : vector<1x1x16x8xf32> to vector<16x8xf32>
    %18 = arith.truncf %17 : vector<16x8xf32> to vector<16x8xbf16>
    %c0_20 = arith.constant 0 : index
    %c32 = arith.constant 32 : index
    %19 = vector.load %arg6[%c0_20, %c32] : memref<256x72xbf16, #tpu.memory_space<vmem>>, vector<16x8xbf16>
    tpu.vector_store %arg6[%c0_20, %c32], %18 {strides = array<i32>} : memref<256x72xbf16, #tpu.memory_space<vmem>>, vector<16x8xbf16>,
    %c0_21 = arith.constant 0 : index
    %c0_22 = arith.constant 0 : index
    %c20 = arith.constant 20 : index
    %c0_23 = arith.constant 0 : index
    %20 = vector.load %arg2[%c0_21, %c0_22, %c20, %c0_23] : memref<1x1x336x8xf32, #tpu.memory_space<vmem>>, vector<1x1x16x8xf32>
    %21 = vector.shape_cast %20 : vector<1x1x16x8xf32> to vector<16x8xf32>
    %22 = arith.truncf %21 : vector<16x8xf32> to vector<16x8xbf16>
    %c0_24 = arith.constant 0 : index
    %c40 = arith.constant 40 : index
    %23 = vector.load %arg6[%c0_24, %c40] : memref<256x72xbf16, #tpu.memory_space<vmem>>, vector<16x8xbf16>
    tpu.vector_store %arg6[%c0_24, %c40], %22 {strides = array<i32>} : memref<256x72xbf16, #tpu.memory_space<vmem>>, vector<16x8xbf16>,
    %c0_25 = arith.constant 0 : index
    %c0_26 = arith.constant 0 : index
    %c36 = arith.constant 36 : index
    %c0_27 = arith.constant 0 : index
    %24 = vector.load %arg2[%c0_25, %c0_26, %c36, %c0_27] : memref<1x1x336x8xf32, #tpu.memory_space<vmem>>, vector<1x1x16x8xf32>
    %25 = vector.shape_cast %24 : vector<1x1x16x8xf32> to vector<16x8xf32>
    %26 = arith.truncf %25 : vector<16x8xf32> to vector<16x8xbf16>
    %c0_28 = arith.constant 0 : index
    %c48 = arith.constant 48 : index
    %27 = vector.load %arg6[%c0_28, %c48] : memref<256x72xbf16, #tpu.memory_space<vmem>>, vector<16x8xbf16>
    tpu.vector_store %arg6[%c0_28, %c48], %26 {strides = array<i32>} : memref<256x72xbf16, #tpu.memory_space<vmem>>, vector<16x8xbf16>,
    %c0_29 = arith.constant 0 : index
    %c0_30 = arith.constant 0 : index
    %c37 = arith.constant 37 : index
    %c0_31 = arith.constant 0 : index
    %28 = vector.load %arg2[%c0_29, %c0_30, %c37, %c0_31] : memref<1x1x336x8xf32, #tpu.memory_space<vmem>>, vector<1x1x16x8xf32>
    %29 = vector.shape_cast %28 : vector<1x1x16x8xf32> to vector<16x8xf32>
    %30 = arith.truncf %29 : vector<16x8xf32> to vector<16x8xbf16>
    %c0_32 = arith.constant 0 : index
    %c56 = arith.constant 56 : index
    %31 = vector.load %arg6[%c0_32, %c56] : memref<256x72xbf16, #tpu.memory_space<vmem>>, vector<16x8xbf16>
    tpu.vector_store %arg6[%c0_32, %c56], %30 {strides = array<i32>} : memref<256x72xbf16, #tpu.memory_space<vmem>>, vector<16x8xbf16>,
    %c0_33 = arith.constant 0 : index
    %c0_34 = arith.constant 0 : index
    %c38 = arith.constant 38 : index
    %c0_35 = arith.constant 0 : index
    %32 = vector.load %arg2[%c0_33, %c0_34, %c38, %c0_35] : memref<1x1x336x8xf32, #tpu.memory_space<vmem>>, vector<1x1x16x8xf32>
    %33 = vector.shape_cast %32 : vector<1x1x16x8xf32> to vector<16x8xf32>
    %34 = arith.truncf %33 : vector<16x8xf32> to vector<16x8xbf16>
    %c0_36 = arith.constant 0 : index
    %c64 = arith.constant 64 : index
    %35 = vector.load %arg6[%c0_36, %c64] : memref<256x72xbf16, #tpu.memory_space<vmem>>, vector<16x8xbf16>
    tpu.vector_store %arg6[%c0_36, %c64], %34 {strides = array<i32>} : memref<256x72xbf16, #tpu.memory_space<vmem>>, vector<16x8xbf16>,
    %c0_37 = arith.constant 0 : index
    %c0_38 = arith.constant 0 : index
    %c18_39 = arith.constant 18 : index
    %c0_40 = arith.constant 0 : index
    %36 = vector.load %arg2[%c0_37, %c0_38, %c18_39, %c0_40] : memref<1x1x336x8xf32, #tpu.memory_space<vmem>>, vector<1x1x16x8xf32>
    %37 = vector.shape_cast %36 : vector<1x1x16x8xf32> to vector<16x8xf32>
    %38 = arith.truncf %37 : vector<16x8xf32> to vector<16x8xbf16>
    %c16_41 = arith.constant 16 : index
    %c0_42 = arith.constant 0 : index
    %39 = vector.load %arg6[%c16_41, %c0_42] : memref<256x72xbf16, #tpu.memory_space<vmem>>, vector<16x8xbf16>
    tpu.vector_store %arg6[%c16_41, %c0_42], %38 {strides = array<i32>} : memref<256x72xbf16, #tpu.memory_space<vmem>>, vector<16x8xbf16>,
    %c0_43 = arith.constant 0 : index
    %c0_44 = arith.constant 0 : index
    %c19_45 = arith.constant 19 : index
    %c0_46 = arith.constant 0 : index
    %40 = vector.load %arg2[%c0_43, %c0_44, %c19_45, %c0_46] : memref<1x1x336x8xf32, #tpu.memory_space<vmem>>, vector<1x1x16x8xf32>
    %41 = vector.shape_cast %40 : vector<1x1x16x8xf32> to vector<16x8xf32>
    %42 = arith.truncf %41 : vector<16x8xf32> to vector<16x8xbf16>
    %c16_47 = arith.constant 16 : index
    %c8_48 = arith.constant 8 : index
    %43 = vector.load %arg6[%c16_47, %c8_48] : memref<256x72xbf16, #tpu.memory_space<vmem>>, vector<16x8xbf16>
    tpu.vector_store %arg6[%c16_47, %c8_48], %42 {strides = array<i32>} : memref<256x72xbf16, #tpu.memory_space<vmem>>, vector<16x8xbf16>,
    %c0_49 = arith.constant 0 : index
    %c0_50 = arith.constant 0 : index
    %c20_51 = arith.constant 20 : index
    %c0_52 = arith.constant 0 : index
    %44 = vector.load %arg2[%c0_49, %c0_50, %c20_51, %c0_52] : memref<1x1x336x8xf32, #tpu.memory_space<vmem>>, vector<1x1x16x8xf32>
    %45 = vector.shape_cast %44 : vector<1x1x16x8xf32> to vector<16x8xf32>
    %46 = arith.truncf %45 : vector<16x8xf32> to vector<16x8xbf16>
    %c16_53 = arith.constant 16 : index
    %c16_54 = arith.constant 16 : index
    %47 = vector.load %arg6[%c16_53, %c16_54] : memref<256x72xbf16, #tpu.memory_space<vmem>>, vector<16x8xbf16>
    tpu.vector_store %arg6[%c16_53, %c16_54], %46 {strides = array<i32>} : memref<256x72xbf16, #tpu.memory_space<vmem>>, vector<16x8xbf16>,
    %c0_55 = arith.constant 0 : index
    %c0_56 = arith.constant 0 : index
    %c36_57 = arith.constant 36 : index
    %c0_58 = arith.constant 0 : index
    %48 = vector.load %arg2[%c0_55, %c0_56, %c36_57, %c0_58] : memref<1x1x336x8xf32, #tpu.memory_space<vmem>>, vector<1x1x16x8xf32>
    %49 = vector.shape_cast %48 : vector<1x1x16x8xf32> to vector<16x8xf32>
    %50 = arith.truncf %49 : vector<16x8xf32> to vector<16x8xbf16>
    %c16_59 = arith.constant 16 : index
    %c24_60 = arith.constant 24 : index
    %51 = vector.load %arg6[%c16_59, %c24_60] : memref<256x72xbf16, #tpu.memory_space<vmem>>, vector<16x8xbf16>
    tpu.vector_store %arg6[%c16_59, %c24_60], %50 {strides = array<i32>} : memref<256x72xbf16, #tpu.memory_space<vmem>>, vector<16x8xbf16>,
    %c0_61 = arith.constant 0 : index
    %c0_62 = arith.constant 0 : index
    %c37_63 = arith.constant 37 : index
    %c0_64 = arith.constant 0 : index
    %52 = vector.load %arg2[%c0_61, %c0_62, %c37_63, %c0_64] : memref<1x1x336x8xf32, #tpu.memory_space<vmem>>, vector<1x1x16x8xf32>
    %53 = vector.shape_cast %52 : vector<1x1x16x8xf32> to vector<16x8xf32>
    %54 = arith.truncf %53 : vector<16x8xf32> to vector<16x8xbf16>
    %c16_65 = arith.constant 16 : index
    %c32_66 = arith.constant 32 : index
    %55 = vector.load %arg6[%c16_65, %c32_66] : memref<256x72xbf16, #tpu.memory_space<vmem>>, vector<16x8xbf16>
    tpu.vector_store %arg6[%c16_65, %c32_66], %54 {strides = array<i32>} : memref<256x72xbf16, #tpu.memory_space<vmem>>, vector<16x8xbf16>,
    %c0_67 = arith.constant 0 : index
    %c0_68 = arith.constant 0 : index
    %c38_69 = arith.constant 38 : index
    %c0_70 = arith.constant 0 : index
    %56 = vector.load %arg2[%c0_67, %c0_68, %c38_69, %c0_70] : memref<1x1x336x8xf32, #tpu.memory_space<vmem>>, vector<1x1x16x8xf32>
    %57 = vector.shape_cast %56 : vector<1x1x16x8xf32> to vector<16x8xf32>
    %58 = arith.truncf %57 : vector<16x8xf32> to vector<16x8xbf16>
    %c16_71 = arith.constant 16 : index
    %c40_72 = arith.constant 40 : index
    %59 = vector.load %arg6[%c16_71, %c40_72] : memref<256x72xbf16, #tpu.memory_space<vmem>>, vector<16x8xbf16>
    tpu.vector_store %arg6[%c16_71, %c40_72], %58 {strides = array<i32>} : memref<256x72xbf16, #tpu.memory_space<vmem>>, vector<16x8xbf16>,
    %c0_73 = arith.constant 0 : index
    %c0_74 = arith.constant 0 : index
    %c54 = arith.constant 54 : index
    %c0_75 = arith.constant 0 : index
    %60 = vector.load %arg2[%c0_73, %c0_74, %c54, %c0_75] : memref<1x1x336x8xf32, #tpu.memory_space<vmem>>, vector<1x1x16x8xf32>
    %61 = vector.shape_cast %60 : vector<1x1x16x8xf32> to vector<16x8xf32>
    %62 = arith.truncf %61 : vector<16x8xf32> to vector<16x8xbf16>
    %c16_76 = arith.constant 16 : index
    %c48_77 = arith.constant 48 : index
    %63 = vector.load %arg6[%c16_76, %c48_77] : memref<256x72xbf16, #tpu.memory_space<vmem>>, vector<16x8xbf16>
    tpu.vector_store %arg6[%c16_76, %c48_77], %62 {strides = array<i32>} : memref<256x72xbf16, #tpu.memory_space<vmem>>, vector<16x8xbf16>,
    %c0_78 = arith.constant 0 : index
    %c0_79 = arith.constant 0 : index
    %c55 = arith.constant 55 : index
    %c0_80 = arith.constant 0 : index
    %64 = vector.load %arg2[%c0_78, %c0_79, %c55, %c0_80] : memref<1x1x336x8xf32, #tpu.memory_space<vmem>>, vector<1x1x16x8xf32>
    %65 = vector.shape_cast %64 : vector<1x1x16x8xf32> to vector<16x8xf32>
    %66 = arith.truncf %65 : vector<16x8xf32> to vector<16x8xbf16>
    %c16_81 = arith.constant 16 : index
    %c56_82 = arith.constant 56 : index
    %67 = vector.load %arg6[%c16_81, %c56_82] : memref<256x72xbf16, #tpu.memory_space<vmem>>, vector<16x8xbf16>
    tpu.vector_store %arg6[%c16_81, %c56_82], %66 {strides = array<i32>} : memref<256x72xbf16, #tpu.memory_space<vmem>>, vector<16x8xbf16>,
    %c0_83 = arith.constant 0 : index
    %c0_84 = arith.constant 0 : index
    %c56_85 = arith.constant 56 : index
    %c0_86 = arith.constant 0 : index
    %68 = vector.load %arg2[%c0_83, %c0_84, %c56_85, %c0_86] : memref<1x1x336x8xf32, #tpu.memory_space<vmem>>, vector<1x1x16x8xf32>
    %69 = vector.shape_cast %68 : vector<1x1x16x8xf32> to vector<16x8xf32>
    %70 = arith.truncf %69 : vector<16x8xf32> to vector<16x8xbf16>
    %c16_87 = arith.constant 16 : index
    %c64_88 = arith.constant 64 : index
    %71 = vector.load %arg6[%c16_87, %c64_88] : memref<256x72xbf16, #tpu.memory_space<vmem>>, vector<16x8xbf16>
    tpu.vector_store %arg6[%c16_87, %c64_88], %70 {strides = array<i32>} : memref<256x72xbf16, #tpu.memory_space<vmem>>, vector<16x8xbf16>,
    %c0_89 = arith.constant 0 : index
    %c0_90 = arith.constant 0 : index
    %c36_91 = arith.constant 36 : index
    %c0_92 = arith.constant 0 : index
    %72 = vector.load %arg2[%c0_89, %c0_90, %c36_91, %c0_92] : memref<1x1x336x8xf32, #tpu.memory_space<vmem>>, vector<1x1x16x8xf32>
    %73 = vector.shape_cast %72 : vector<1x1x16x8xf32> to vector<16x8xf32>
    %74 = arith.truncf %73 : vector<16x8xf32> to vector<16x8xbf16>
    %c32_93 = arith.constant 32 : index
    %c0_94 = arith.constant 0 : index
    %75 = vector.load %arg6[%c32_93, %c0_94] : memref<256x72xbf16, #tpu.memory_space<vmem>>, vector<16x8xbf16>
    tpu.vector_store %arg6[%c32_93, %c0_94], %74 {strides = array<i32>} : memref<256x72xbf16, #tpu.memory_space<vmem>>, vector<16x8xbf16>,
    %c0_95 = arith.constant 0 : index
    %c0_96 = arith.constant 0 : index
    %c37_97 = arith.constant 37 : index
    %c0_98 = arith.constant 0 : index
    %76 = vector.load %arg2[%c0_95, %c0_96, %c37_97, %c0_98] : memref<1x1x336x8xf32, #tpu.memory_space<vmem>>, vector<1x1x16x8xf32>
    %77 = vector.shape_cast %76 : vector<1x1x16x8xf32> to vector<16x8xf32>
    %78 = arith.truncf %77 : vector<16x8xf32> to vector<16x8xbf16>
    %c32_99 = arith.constant 32 : index
    %c8_100 = arith.constant 8 : index
    %79 = vector.load %arg6[%c32_99, %c8_100] : memref<256x72xbf16, #tpu.memory_space<vmem>>, vector<16x8xbf16>
    tpu.vector_store %arg6[%c32_99, %c8_100], %78 {strides = array<i32>} : memref<256x72xbf16, #tpu.memory_space<vmem>>, vector<16x8xbf16>,
    %c0_101 = arith.constant 0 : index
    %c0_102 = arith.constant 0 : index
    %c38_103 = arith.constant 38 : index
    %c0_104 = arith.constant 0 : index
    %80 = vector.load %arg2[%c0_101, %c0_102, %c38_103, %c0_104] : memref<1x1x336x8xf32, #tpu.memory_space<vmem>>, vector<1x1x16x8xf32>
    %81 = vector.shape_cast %80 : vector<1x1x16x8xf32> to vector<16x8xf32>
    %82 = arith.truncf %81 : vector<16x8xf32> to vector<16x8xbf16>
    %c32_105 = arith.constant 32 : index
    %c16_106 = arith.constant 16 : index
    %83 = vector.load %arg6[%c32_105, %c16_106] : memref<256x72xbf16, #tpu.memory_space<vmem>>, vector<16x8xbf16>
    tpu.vector_store %arg6[%c32_105, %c16_106], %82 {strides = array<i32>} : memref<256x72xbf16, #tpu.memory_space<vmem>>, vector<16x8xbf16>,
    %c0_107 = arith.constant 0 : index
    %c0_108 = arith.constant 0 : index
    %c54_109 = arith.constant 54 : index
    %c0_110 = arith.constant 0 : index
    %84 = vector.load %arg2[%c0_107, %c0_108, %c54_109, %c0_110] : memref<1x1x336x8xf32, #tpu.memory_space<vmem>>, vector<1x1x16x8xf32>
    %85 = vector.shape_cast %84 : vector<1x1x16x8xf32> to vector<16x8xf32>
    %86 = arith.truncf %85 : vector<16x8xf32> to vector<16x8xbf16>
    %c32_111 = arith.constant 32 : index
    %c24_112 = arith.constant 24 : index
    %87 = vector.load %arg6[%c32_111, %c24_112] : memref<256x72xbf16, #tpu.memory_space<vmem>>, vector<16x8xbf16>
    tpu.vector_store %arg6[%c32_111, %c24_112], %86 {strides = array<i32>} : memref<256x72xbf16, #tpu.memory_space<vmem>>, vector<16x8xbf16>,
    %c0_113 = arith.constant 0 : index
    %c0_114 = arith.constant 0 : index
    %c55_115 = arith.constant 55 : index
    %c0_116 = arith.constant 0 : index
    %88 = vector.load %arg2[%c0_113, %c0_114, %c55_115, %c0_116] : memref<1x1x336x8xf32, #tpu.memory_space<vmem>>, vector<1x1x16x8xf32>
    %89 = vector.shape_cast %88 : vector<1x1x16x8xf32> to vector<16x8xf32>
    %90 = arith.truncf %89 : vector<16x8xf32> to vector<16x8xbf16>
    %c32_117 = arith.constant 32 : index
    %c32_118 = arith.constant 32 : index
    %91 = vector.load %arg6[%c32_117, %c32_118] : memref<256x72xbf16, #tpu.memory_space<vmem>>, vector<16x8xbf16>
    tpu.vector_store %arg6[%c32_117, %c32_118], %90 {strides = array<i32>} : memref<256x72xbf16, #tpu.memory_space<vmem>>, vector<16x8xbf16>,
    %c0_119 = arith.constant 0 : index
    %c0_120 = arith.constant 0 : index
    %c56_121 = arith.constant 56 : index
    %c0_122 = arith.constant 0 : index
    %92 = vector.load %arg2[%c0_119, %c0_120, %c56_121, %c0_122] : memref<1x1x336x8xf32, #tpu.memory_space<vmem>>, vector<1x1x16x8xf32>
    %93 = vector.shape_cast %92 : vector<1x1x16x8xf32> to vector<16x8xf32>
    %94 = arith.truncf %93 : vector<16x8xf32> to vector<16x8xbf16>
    %c32_123 = arith.constant 32 : index
    %c40_124 = arith.constant 40 : index
    %95 = vector.load %arg6[%c32_123, %c40_124] : memref<256x72xbf16, #tpu.memory_space<vmem>>, vector<16x8xbf16>
    tpu.vector_store %arg6[%c32_123, %c40_124], %94 {strides = array<i32>} : memref<256x72xbf16, #tpu.memory_space<vmem>>, vector<16x8xbf16>,
    %c0_125 = arith.constant 0 : index
    %c0_126 = arith.constant 0 : index
    %c72 = arith.constant 72 : index
    %c0_127 = arith.constant 0 : index
    %96 = vector.load %arg2[%c0_125, %c0_126, %c72, %c0_127] : memref<1x1x336x8xf32, #tpu.memory_space<vmem>>, vector<1x1x16x8xf32>
    %97 = vector.shape_cast %96 : vector<1x1x16x8xf32> to vector<16x8xf32>
    %98 = arith.truncf %97 : vector<16x8xf32> to vector<16x8xbf16>
    %c32_128 = arith.constant 32 : index
    %c48_129 = arith.constant 48 : index
    %99 = vector.load %arg6[%c32_128, %c48_129] : memref<256x72xbf16, #tpu.memory_space<vmem>>, vector<16x8xbf16>
    tpu.vector_store %arg6[%c32_128, %c48_129], %98 {strides = array<i32>} : memref<256x72xbf16, #tpu.memory_space<vmem>>, vector<16x8xbf16>,
    %c0_130 = arith.constant 0 : index
    %c0_131 = arith.constant 0 : index
    %c73 = arith.constant 73 : index
    %c0_132 = arith.constant 0 : index
    %100 = vector.load %arg2[%c0_130, %c0_131, %c73, %c0_132] : memref<1x1x336x8xf32, #tpu.memory_space<vmem>>, vector<1x1x16x8xf32>
    %101 = vector.shape_cast %100 : vector<1x1x16x8xf32> to vector<16x8xf32>
    %102 = arith.truncf %101 : vector<16x8xf32> to vector<16x8xbf16>
    %c32_133 = arith.constant 32 : index
    %c56_134 = arith.constant 56 : index
    %103 = vector.load %arg6[%c32_133, %c56_134] : memref<256x72xbf16, #tpu.memory_space<vmem>>, vector<16x8xbf16>
    tpu.vector_store %arg6[%c32_133, %c56_134], %102 {strides = array<i32>} : memref<256x72xbf16, #tpu.memory_space<vmem>>, vector<16x8xbf16>,
    %c0_135 = arith.constant 0 : index
    %c0_136 = arith.constant 0 : index
    %c74 = arith.constant 74 : index
    %c0_137 = arith.constant 0 : index
    %104 = vector.load %arg2[%c0_135, %c0_136, %c74, %c0_137] : memref<1x1x336x8xf32, #tpu.memory_space<vmem>>, vector<1x1x16x8xf32>
    %105 = vector.shape_cast %104 : vector<1x1x16x8xf32> to vector<16x8xf32>
    %106 = arith.truncf %105 : vector<16x8xf32> to vector<16x8xbf16>
    %c32_138 = arith.constant 32 : index
    %c64_139 = arith.constant 64 : index
    %107 = vector.load %arg6[%c32_138, %c64_139] : memref<256x72xbf16, #tpu.memory_space<vmem>>, vector<16x8xbf16>
    tpu.vector_store %arg6[%c32_138, %c64_139], %106 {strides = array<i32>} : memref<256x72xbf16, #tpu.memory_space<vmem>>, vector<16x8xbf16>,
    %c0_140 = arith.constant 0 : index
    %c0_141 = arith.constant 0 : index
    %c54_142 = arith.constant 54 : index
    %c0_143 = arith.constant 0 : index
    %108 = vector.load %arg2[%c0_140, %c0_141, %c54_142, %c0_143] : memref<1x1x336x8xf32, #tpu.memory_space<vmem>>, vector<1x1x16x8xf32>
    %109 = vector.shape_cast %108 : vector<1x1x16x8xf32> to vector<16x8xf32>
    %110 = arith.truncf %109 : vector<16x8xf32> to vector<16x8xbf16>
    %c48_144 = arith.constant 48 : index
    %c0_145 = arith.constant 0 : index
    %111 = vector.load %arg6[%c48_144, %c0_145] : memref<256x72xbf16, #tpu.memory_space<vmem>>, vector<16x8xbf16>
    tpu.vector_store %arg6[%c48_144, %c0_145], %110 {strides = array<i32>} : memref<256x72xbf16, #tpu.memory_space<vmem>>, vector<16x8xbf16>,
    %c0_146 = arith.constant 0 : index
    %c0_147 = arith.constant 0 : index
    %c55_148 = arith.constant 55 : index
    %c0_149 = arith.constant 0 : index
    %112 = vector.load %arg2[%c0_146, %c0_147, %c55_148, %c0_149] : memref<1x1x336x8xf32, #tpu.memory_space<vmem>>, vector<1x1x16x8xf32>
    %113 = vector.shape_cast %112 : vector<1x1x16x8xf32> to vector<16x8xf32>
    %114 = arith.truncf %113 : vector<16x8xf32> to vector<16x8xbf16>
    %c48_150 = arith.constant 48 : index
    %c8_151 = arith.constant 8 : index
    %115 = vector.load %arg6[%c48_150, %c8_151] : memref<256x72xbf16, #tpu.memory_space<vmem>>, vector<16x8xbf16>
    tpu.vector_store %arg6[%c48_150, %c8_151], %114 {strides = array<i32>} : memref<256x72xbf16, #tpu.memory_space<vmem>>, vector<16x8xbf16>,
    %c0_152 = arith.constant 0 : index
    %c0_153 = arith.constant 0 : index
    %c56_154 = arith.constant 56 : index
    %c0_155 = arith.constant 0 : index
    %116 = vector.load %arg2[%c0_152, %c0_153, %c56_154, %c0_155] : memref<1x1x336x8xf32, #tpu.memory_space<vmem>>, vector<1x1x16x8xf32>
    %117 = vector.shape_cast %116 : vector<1x1x16x8xf32> to vector<16x8xf32>
    %118 = arith.truncf %117 : vector<16x8xf32> to vector<16x8xbf16>
    %c48_156 = arith.constant 48 : index
    %c16_157 = arith.constant 16 : index
    %119 = vector.load %arg6[%c48_156, %c16_157] : memref<256x72xbf16, #tpu.memory_space<vmem>>, vector<16x8xbf16>
    tpu.vector_store %arg6[%c48_156, %c16_157], %118 {strides = array<i32>} : memref<256x72xbf16, #tpu.memory_space<vmem>>, vector<16x8xbf16>,
    %c0_158 = arith.constant 0 : index
    %c0_159 = arith.constant 0 : index
    %c72_160 = arith.constant 72 : index
    %c0_161 = arith.constant 0 : index
    %120 = vector.load %arg2[%c0_158, %c0_159, %c72_160, %c0_161] : memref<1x1x336x8xf32, #tpu.memory_space<vmem>>, vector<1x1x16x8xf32>
    %121 = vector.shape_cast %120 : vector<1x1x16x8xf32> to vector<16x8xf32>
    %122 = arith.truncf %121 : vector<16x8xf32> to vector<16x8xbf16>
    %c48_162 = arith.constant 48 : index
    %c24_163 = arith.constant 24 : index
    %123 = vector.load %arg6[%c48_162, %c24_163] : memref<256x72xbf16, #tpu.memory_space<vmem>>, vector<16x8xbf16>
    tpu.vector_store %arg6[%c48_162, %c24_163], %122 {strides = array<i32>} : memref<256x72xbf16, #tpu.memory_space<vmem>>, vector<16x8xbf16>,
    %c0_164 = arith.constant 0 : index
    %c0_165 = arith.constant 0 : index
    %c73_166 = arith.constant 73 : index
    %c0_167 = arith.constant 0 : index
    %124 = vector.load %arg2[%c0_164, %c0_165, %c73_166, %c0_167] : memref<1x1x336x8xf32, #tpu.memory_space<vmem>>, vector<1x1x16x8xf32>
    %125 = vector.shape_cast %124 : vector<1x1x16x8xf32> to vector<16x8xf32>
    %126 = arith.truncf %125 : vector<16x8xf32> to vector<16x8xbf16>
    %c48_168 = arith.constant 48 : index
    %c32_169 = arith.constant 32 : index
    %127 = vector.load %arg6[%c48_168, %c32_169] : memref<256x72xbf16, #tpu.memory_space<vmem>>, vector<16x8xbf16>
    tpu.vector_store %arg6[%c48_168, %c32_169], %126 {strides = array<i32>} : memref<256x72xbf16, #tpu.memory_space<vmem>>, vector<16x8xbf16>,
    %c0_170 = arith.constant 0 : index
    %c0_171 = arith.constant 0 : index
    %c74_172 = arith.constant 74 : index
    %c0_173 = arith.constant 0 : index
    %128 = vector.load %arg2[%c0_170, %c0_171, %c74_172, %c0_173] : memref<1x1x336x8xf32, #tpu.memory_space<vmem>>, vector<1x1x16x8xf32>
    %129 = vector.shape_cast %128 : vector<1x1x16x8xf32> to vector<16x8xf32>
    %130 = arith.truncf %129 : vector<16x8xf32> to vector<16x8xbf16>
    %c48_174 = arith.constant 48 : index
    %c40_175 = arith.constant 40 : index
    %131 = vector.load %arg6[%c48_174, %c40_175] : memref<256x72xbf16, #tpu.memory_space<vmem>>, vector<16x8xbf16>
    tpu.vector_store %arg6[%c48_174, %c40_175], %130 {strides = array<i32>} : memref<256x72xbf16, #tpu.memory_space<vmem>>, vector<16x8xbf16>,
    %c0_176 = arith.constant 0 : index
    %c0_177 = arith.constant 0 : index
    %c90 = arith.constant 90 : index
    %c0_178 = arith.constant 0 : index
    %132 = vector.load %arg2[%c0_176, %c0_177, %c90, %c0_178] : memref<1x1x336x8xf32, #tpu.memory_space<vmem>>, vector<1x1x16x8xf32>
    %133 = vector.shape_cast %132 : vector<1x1x16x8xf32> to vector<16x8xf32>
    %134 = arith.truncf %133 : vector<16x8xf32> to vector<16x8xbf16>
    %c48_179 = arith.constant 48 : index
    %c48_180 = arith.constant 48 : index
    %135 = vector.load %arg6[%c48_179, %c48_180] : memref<256x72xbf16, #tpu.memory_space<vmem>>, vector<16x8xbf16>
    tpu.vector_store %arg6[%c48_179, %c48_180], %134 {strides = array<i32>} : memref<256x72xbf16, #tpu.memory_space<vmem>>, vector<16x8xbf16>,
    %c0_181 = arith.constant 0 : index
    %c0_182 = arith.constant 0 : index
    %c91 = arith.constant 91 : index
    %c0_183 = arith.constant 0 : index
    %136 = vector.load %arg2[%c0_181, %c0_182, %c91, %c0_183] : memref<1x1x336x8xf32, #tpu.memory_space<vmem>>, vector<1x1x16x8xf32>
    %137 = vector.shape_cast %136 : vector<1x1x16x8xf32> to vector<16x8xf32>
    %138 = arith.truncf %137 : vector<16x8xf32> to vector<16x8xbf16>
    %c48_184 = arith.constant 48 : index
    %c56_185 = arith.constant 56 : index
    %139 = vector.load %arg6[%c48_184, %c56_185] : memref<256x72xbf16, #tpu.memory_space<vmem>>, vector<16x8xbf16>
    tpu.vector_store %arg6[%c48_184, %c56_185], %138 {strides = array<i32>} : memref<256x72xbf16, #tpu.memory_space<vmem>>, vector<16x8xbf16>,
    %c0_186 = arith.constant 0 : index
    %c0_187 = arith.constant 0 : index
    %c92 = arith.constant 92 : index
    %c0_188 = arith.constant 0 : index
    %140 = vector.load %arg2[%c0_186, %c0_187, %c92, %c0_188] : memref<1x1x336x8xf32, #tpu.memory_space<vmem>>, vector<1x1x16x8xf32>
    %141 = vector.shape_cast %140 : vector<1x1x16x8xf32> to vector<16x8xf32>
    %142 = arith.truncf %141 : vector<16x8xf32> to vector<16x8xbf16>
    %c48_189 = arith.constant 48 : index
    %c64_190 = arith.constant 64 : index
    %143 = vector.load %arg6[%c48_189, %c64_190] : memref<256x72xbf16, #tpu.memory_space<vmem>>, vector<16x8xbf16>
    tpu.vector_store %arg6[%c48_189, %c64_190], %142 {strides = array<i32>} : memref<256x72xbf16, #tpu.memory_space<vmem>>, vector<16x8xbf16>,
    %c0_191 = arith.constant 0 : index
    %c0_192 = arith.constant 0 : index
    %c72_193 = arith.constant 72 : index
    %c0_194 = arith.constant 0 : index
    %144 = vector.load %arg2[%c0_191, %c0_192, %c72_193, %c0_194] : memref<1x1x336x8xf32, #tpu.memory_space<vmem>>, vector<1x1x16x8xf32>
    %145 = vector.shape_cast %144 : vector<1x1x16x8xf32> to vector<16x8xf32>
    %146 = arith.truncf %145 : vector<16x8xf32> to vector<16x8xbf16>
    %c64_195 = arith.constant 64 : index
    %c0_196 = arith.constant 0 : index
    %147 = vector.load %arg6[%c64_195, %c0_196] : memref<256x72xbf16, #tpu.memory_space<vmem>>, vector<16x8xbf16>
    tpu.vector_store %arg6[%c64_195, %c0_196], %146 {strides = array<i32>} : memref<256x72xbf16, #tpu.memory_space<vmem>>, vector<16x8xbf16>,
    %c0_197 = arith.constant 0 : index
    %c0_198 = arith.constant 0 : index
    %c73_199 = arith.constant 73 : index
    %c0_200 = arith.constant 0 : index
    %148 = vector.load %arg2[%c0_197, %c0_198, %c73_199, %c0_200] : memref<1x1x336x8xf32, #tpu.memory_space<vmem>>, vector<1x1x16x8xf32>
    %149 = vector.shape_cast %148 : vector<1x1x16x8xf32> to vector<16x8xf32>
    %150 = arith.truncf %149 : vector<16x8xf32> to vector<16x8xbf16>
    %c64_201 = arith.constant 64 : index
    %c8_202 = arith.constant 8 : index
    %151 = vector.load %arg6[%c64_201, %c8_202] : memref<256x72xbf16, #tpu.memory_space<vmem>>, vector<16x8xbf16>
    tpu.vector_store %arg6[%c64_201, %c8_202], %150 {strides = array<i32>} : memref<256x72xbf16, #tpu.memory_space<vmem>>, vector<16x8xbf16>,
    %c0_203 = arith.constant 0 : index
    %c0_204 = arith.constant 0 : index
    %c74_205 = arith.constant 74 : index
    %c0_206 = arith.constant 0 : index
    %152 = vector.load %arg2[%c0_203, %c0_204, %c74_205, %c0_206] : memref<1x1x336x8xf32, #tpu.memory_space<vmem>>, vector<1x1x16x8xf32>
    %153 = vector.shape_cast %152 : vector<1x1x16x8xf32> to vector<16x8xf32>
    %154 = arith.truncf %153 : vector<16x8xf32> to vector<16x8xbf16>
    %c64_207 = arith.constant 64 : index
    %c16_208 = arith.constant 16 : index
    %155 = vector.load %arg6[%c64_207, %c16_208] : memref<256x72xbf16, #tpu.memory_space<vmem>>, vector<16x8xbf16>
    tpu.vector_store %arg6[%c64_207, %c16_208], %154 {strides = array<i32>} : memref<256x72xbf16, #tpu.memory_space<vmem>>, vector<16x8xbf16>,
    %c0_209 = arith.constant 0 : index
    %c0_210 = arith.constant 0 : index
    %c90_211 = arith.constant 90 : index
    %c0_212 = arith.constant 0 : index
    %156 = vector.load %arg2[%c0_209, %c0_210, %c90_211, %c0_212] : memref<1x1x336x8xf32, #tpu.memory_space<vmem>>, vector<1x1x16x8xf32>
    %157 = vector.shape_cast %156 : vector<1x1x16x8xf32> to vector<16x8xf32>
    %158 = arith.truncf %157 : vector<16x8xf32> to vector<16x8xbf16>
    %c64_213 = arith.constant 64 : index
    %c24_214 = arith.constant 24 : index
    %159 = vector.load %arg6[%c64_213, %c24_214] : memref<256x72xbf16, #tpu.memory_space<vmem>>, vector<16x8xbf16>
    tpu.vector_store %arg6[%c64_213, %c24_214], %158 {strides = array<i32>} : memref<256x72xbf16, #tpu.memory_space<vmem>>, vector<16x8xbf16>,
    %c0_215 = arith.constant 0 : index
    %c0_216 = arith.constant 0 : index
    %c91_217 = arith.constant 91 : index
    %c0_218 = arith.constant 0 : index
    %160 = vector.load %arg2[%c0_215, %c0_216, %c91_217, %c0_218] : memref<1x1x336x8xf32, #tpu.memory_space<vmem>>, vector<1x1x16x8xf32>
    %161 = vector.shape_cast %160 : vector<1x1x16x8xf32> to vector<16x8xf32>
    %162 = arith.truncf %161 : vector<16x8xf32> to vector<16x8xbf16>
    %c64_219 = arith.constant 64 : index
    %c32_220 = arith.constant 32 : index
    %163 = vector.load %arg6[%c64_219, %c32_220] : memref<256x72xbf16, #tpu.memory_space<vmem>>, vector<16x8xbf16>
    tpu.vector_store %arg6[%c64_219, %c32_220], %162 {strides = array<i32>} : memref<256x72xbf16, #tpu.memory_space<vmem>>, vector<16x8xbf16>,
    %c0_221 = arith.constant 0 : index
    %c0_222 = arith.constant 0 : index
    %c92_223 = arith.constant 92 : index
    %c0_224 = arith.constant 0 : index
    %164 = vector.load %arg2[%c0_221, %c0_222, %c92_223, %c0_224] : memref<1x1x336x8xf32, #tpu.memory_space<vmem>>, vector<1x1x16x8xf32>
    %165 = vector.shape_cast %164 : vector<1x1x16x8xf32> to vector<16x8xf32>
    %166 = arith.truncf %165 : vector<16x8xf32> to vector<16x8xbf16>
    %c64_225 = arith.constant 64 : index
    %c40_226 = arith.constant 40 : index
    %167 = vector.load %arg6[%c64_225, %c40_226] : memref<256x72xbf16, #tpu.memory_space<vmem>>, vector<16x8xbf16>
    tpu.vector_store %arg6[%c64_225, %c40_226], %166 {strides = array<i32>} : memref<256x72xbf16, #tpu.memory_space<vmem>>, vector<16x8xbf16>,
    %c0_227 = arith.constant 0 : index
    %c0_228 = arith.constant 0 : index
    %c108 = arith.constant 108 : index
    %c0_229 = arith.constant 0 : index
    %168 = vector.load %arg2[%c0_227, %c0_228, %c108, %c0_229] : memref<1x1x336x8xf32, #tpu.memory_space<vmem>>, vector<1x1x16x8xf32>
    %169 = vector.shape_cast %168 : vector<1x1x16x8xf32> to vector<16x8xf32>
    %170 = arith.truncf %169 : vector<16x8xf32> to vector<16x8xbf16>
    %c64_230 = arith.constant 64 : index
    %c48_231 = arith.constant 48 : index
    %171 = vector.load %arg6[%c64_230, %c48_231] : memref<256x72xbf16, #tpu.memory_space<vmem>>, vector<16x8xbf16>
    tpu.vector_store %arg6[%c64_230, %c48_231], %170 {strides = array<i32>} : memref<256x72xbf16, #tpu.memory_space<vmem>>, vector<16x8xbf16>,
    %c0_232 = arith.constant 0 : index
    %c0_233 = arith.constant 0 : index
    %c109 = arith.constant 109 : index
    %c0_234 = arith.constant 0 : index
    %172 = vector.load %arg2[%c0_232, %c0_233, %c109, %c0_234] : memref<1x1x336x8xf32, #tpu.memory_space<vmem>>, vector<1x1x16x8xf32>
    %173 = vector.shape_cast %172 : vector<1x1x16x8xf32> to vector<16x8xf32>
    %174 = arith.truncf %173 : vector<16x8xf32> to vector<16x8xbf16>
    %c64_235 = arith.constant 64 : index
    %c56_236 = arith.constant 56 : index
    %175 = vector.load %arg6[%c64_235, %c56_236] : memref<256x72xbf16, #tpu.memory_space<vmem>>, vector<16x8xbf16>
    tpu.vector_store %arg6[%c64_235, %c56_236], %174 {strides = array<i32>} : memref<256x72xbf16, #tpu.memory_space<vmem>>, vector<16x8xbf16>,
    %c0_237 = arith.constant 0 : index
    %c0_238 = arith.constant 0 : index
    %c110 = arith.constant 110 : index
    %c0_239 = arith.constant 0 : index
    %176 = vector.load %arg2[%c0_237, %c0_238, %c110, %c0_239] : memref<1x1x336x8xf32, #tpu.memory_space<vmem>>, vector<1x1x16x8xf32>
    %177 = vector.shape_cast %176 : vector<1x1x16x8xf32> to vector<16x8xf32>
    %178 = arith.truncf %177 : vector<16x8xf32> to vector<16x8xbf16>
    %c64_240 = arith.constant 64 : index
    %c64_241 = arith.constant 64 : index
    %179 = vector.load %arg6[%c64_240, %c64_241] : memref<256x72xbf16, #tpu.memory_space<vmem>>, vector<16x8xbf16>
    tpu.vector_store %arg6[%c64_240, %c64_241], %178 {strides = array<i32>} : memref<256x72xbf16, #tpu.memory_space<vmem>>, vector<16x8xbf16>,
    %c0_242 = arith.constant 0 : index
    %c0_243 = arith.constant 0 : index
    %c90_244 = arith.constant 90 : index
    %c0_245 = arith.constant 0 : index
    %180 = vector.load %arg2[%c0_242, %c0_243, %c90_244, %c0_245] : memref<1x1x336x8xf32, #tpu.memory_space<vmem>>, vector<1x1x16x8xf32>
    %181 = vector.shape_cast %180 : vector<1x1x16x8xf32> to vector<16x8xf32>
    %182 = arith.truncf %181 : vector<16x8xf32> to vector<16x8xbf16>
    %c80 = arith.constant 80 : index
    %c0_246 = arith.constant 0 : index
    %183 = vector.load %arg6[%c80, %c0_246] : memref<256x72xbf16, #tpu.memory_space<vmem>>, vector<16x8xbf16>
    tpu.vector_store %arg6[%c80, %c0_246], %182 {strides = array<i32>} : memref<256x72xbf16, #tpu.memory_space<vmem>>, vector<16x8xbf16>,
    %c0_247 = arith.constant 0 : index
    %c0_248 = arith.constant 0 : index
    %c91_249 = arith.constant 91 : index
    %c0_250 = arith.constant 0 : index
    %184 = vector.load %arg2[%c0_247, %c0_248, %c91_249, %c0_250] : memref<1x1x336x8xf32, #tpu.memory_space<vmem>>, vector<1x1x16x8xf32>
    %185 = vector.shape_cast %184 : vector<1x1x16x8xf32> to vector<16x8xf32>
    %186 = arith.truncf %185 : vector<16x8xf32> to vector<16x8xbf16>
    %c80_251 = arith.constant 80 : index
    %c8_252 = arith.constant 8 : index
    %187 = vector.load %arg6[%c80_251, %c8_252] : memref<256x72xbf16, #tpu.memory_space<vmem>>, vector<16x8xbf16>
    tpu.vector_store %arg6[%c80_251, %c8_252], %186 {strides = array<i32>} : memref<256x72xbf16, #tpu.memory_space<vmem>>, vector<16x8xbf16>,
    %c0_253 = arith.constant 0 : index
    %c0_254 = arith.constant 0 : index
    %c92_255 = arith.constant 92 : index
    %c0_256 = arith.constant 0 : index
    %188 = vector.load %arg2[%c0_253, %c0_254, %c92_255, %c0_256] : memref<1x1x336x8xf32, #tpu.memory_space<vmem>>, vector<1x1x16x8xf32>
    %189 = vector.shape_cast %188 : vector<1x1x16x8xf32> to vector<16x8xf32>
    %190 = arith.truncf %189 : vector<16x8xf32> to vector<16x8xbf16>
    %c80_257 = arith.constant 80 : index
    %c16_258 = arith.constant 16 : index
    %191 = vector.load %arg6[%c80_257, %c16_258] : memref<256x72xbf16, #tpu.memory_space<vmem>>, vector<16x8xbf16>
    tpu.vector_store %arg6[%c80_257, %c16_258], %190 {strides = array<i32>} : memref<256x72xbf16, #tpu.memory_space<vmem>>, vector<16x8xbf16>,
    %c0_259 = arith.constant 0 : index
    %c0_260 = arith.constant 0 : index
    %c108_261 = arith.constant 108 : index
    %c0_262 = arith.constant 0 : index
    %192 = vector.load %arg2[%c0_259, %c0_260, %c108_261, %c0_262] : memref<1x1x336x8xf32, #tpu.memory_space<vmem>>, vector<1x1x16x8xf32>
    %193 = vector.shape_cast %192 : vector<1x1x16x8xf32> to vector<16x8xf32>
    %194 = arith.truncf %193 : vector<16x8xf32> to vector<16x8xbf16>
    %c80_263 = arith.constant 80 : index
    %c24_264 = arith.constant 24 : index
    %195 = vector.load %arg6[%c80_263, %c24_264] : memref<256x72xbf16, #tpu.memory_space<vmem>>, vector<16x8xbf16>
    tpu.vector_store %arg6[%c80_263, %c24_264], %194 {strides = array<i32>} : memref<256x72xbf16, #tpu.memory_space<vmem>>, vector<16x8xbf16>,
    %c0_265 = arith.constant 0 : index
    %c0_266 = arith.constant 0 : index
    %c109_267 = arith.constant 109 : index
    %c0_268 = arith.constant 0 : index
    %196 = vector.load %arg2[%c0_265, %c0_266, %c109_267, %c0_268] : memref<1x1x336x8xf32, #tpu.memory_space<vmem>>, vector<1x1x16x8xf32>
    %197 = vector.shape_cast %196 : vector<1x1x16x8xf32> to vector<16x8xf32>
    %198 = arith.truncf %197 : vector<16x8xf32> to vector<16x8xbf16>
    %c80_269 = arith.constant 80 : index
    %c32_270 = arith.constant 32 : index
    %199 = vector.load %arg6[%c80_269, %c32_270] : memref<256x72xbf16, #tpu.memory_space<vmem>>, vector<16x8xbf16>
    tpu.vector_store %arg6[%c80_269, %c32_270], %198 {strides = array<i32>} : memref<256x72xbf16, #tpu.memory_space<vmem>>, vector<16x8xbf16>,
    %c0_271 = arith.constant 0 : index
    %c0_272 = arith.constant 0 : index
    %c110_273 = arith.constant 110 : index
    %c0_274 = arith.constant 0 : index
    %200 = vector.load %arg2[%c0_271, %c0_272, %c110_273, %c0_274] : memref<1x1x336x8xf32, #tpu.memory_space<vmem>>, vector<1x1x16x8xf32>
    %201 = vector.shape_cast %200 : vector<1x1x16x8xf32> to vector<16x8xf32>
    %202 = arith.truncf %201 : vector<16x8xf32> to vector<16x8xbf16>
    %c80_275 = arith.constant 80 : index
    %c40_276 = arith.constant 40 : index
    %203 = vector.load %arg6[%c80_275, %c40_276] : memref<256x72xbf16, #tpu.memory_space<vmem>>, vector<16x8xbf16>
    tpu.vector_store %arg6[%c80_275, %c40_276], %202 {strides = array<i32>} : memref<256x72xbf16, #tpu.memory_space<vmem>>, vector<16x8xbf16>,
    %c0_277 = arith.constant 0 : index
    %c0_278 = arith.constant 0 : index
    %c126 = arith.constant 126 : index
    %c0_279 = arith.constant 0 : index
    %204 = vector.load %arg2[%c0_277, %c0_278, %c126, %c0_279] : memref<1x1x336x8xf32, #tpu.memory_space<vmem>>, vector<1x1x16x8xf32>
    %205 = vector.shape_cast %204 : vector<1x1x16x8xf32> to vector<16x8xf32>
    %206 = arith.truncf %205 : vector<16x8xf32> to vector<16x8xbf16>
    %c80_280 = arith.constant 80 : index
    %c48_281 = arith.constant 48 : index
    %207 = vector.load %arg6[%c80_280, %c48_281] : memref<256x72xbf16, #tpu.memory_space<vmem>>, vector<16x8xbf16>
    tpu.vector_store %arg6[%c80_280, %c48_281], %206 {strides = array<i32>} : memref<256x72xbf16, #tpu.memory_space<vmem>>, vector<16x8xbf16>,
    %c0_282 = arith.constant 0 : index
    %c0_283 = arith.constant 0 : index
    %c127 = arith.constant 127 : index
    %c0_284 = arith.constant 0 : index
    %208 = vector.load %arg2[%c0_282, %c0_283, %c127, %c0_284] : memref<1x1x336x8xf32, #tpu.memory_space<vmem>>, vector<1x1x16x8xf32>
    %209 = vector.shape_cast %208 : vector<1x1x16x8xf32> to vector<16x8xf32>
    %210 = arith.truncf %209 : vector<16x8xf32> to vector<16x8xbf16>
    %c80_285 = arith.constant 80 : index
    %c56_286 = arith.constant 56 : index
    %211 = vector.load %arg6[%c80_285, %c56_286] : memref<256x72xbf16, #tpu.memory_space<vmem>>, vector<16x8xbf16>
    tpu.vector_store %arg6[%c80_285, %c56_286], %210 {strides = array<i32>} : memref<256x72xbf16, #tpu.memory_space<vmem>>, vector<16x8xbf16>,
    %c0_287 = arith.constant 0 : index
    %c0_288 = arith.constant 0 : index
    %c128 = arith.constant 128 : index
    %c0_289 = arith.constant 0 : index
    %212 = vector.load %arg2[%c0_287, %c0_288, %c128, %c0_289] : memref<1x1x336x8xf32, #tpu.memory_space<vmem>>, vector<1x1x16x8xf32>
    %213 = vector.shape_cast %212 : vector<1x1x16x8xf32> to vector<16x8xf32>
    %214 = arith.truncf %213 : vector<16x8xf32> to vector<16x8xbf16>
    %c80_290 = arith.constant 80 : index
    %c64_291 = arith.constant 64 : index
    %215 = vector.load %arg6[%c80_290, %c64_291] : memref<256x72xbf16, #tpu.memory_space<vmem>>, vector<16x8xbf16>
    tpu.vector_store %arg6[%c80_290, %c64_291], %214 {strides = array<i32>} : memref<256x72xbf16, #tpu.memory_space<vmem>>, vector<16x8xbf16>,
    %c0_292 = arith.constant 0 : index
    %c0_293 = arith.constant 0 : index
    %c108_294 = arith.constant 108 : index
    %c0_295 = arith.constant 0 : index
    %216 = vector.load %arg2[%c0_292, %c0_293, %c108_294, %c0_295] : memref<1x1x336x8xf32, #tpu.memory_space<vmem>>, vector<1x1x16x8xf32>
    %217 = vector.shape_cast %216 : vector<1x1x16x8xf32> to vector<16x8xf32>
    %218 = arith.truncf %217 : vector<16x8xf32> to vector<16x8xbf16>
    %c96 = arith.constant 96 : index
    %c0_296 = arith.constant 0 : index
    %219 = vector.load %arg6[%c96, %c0_296] : memref<256x72xbf16, #tpu.memory_space<vmem>>, vector<16x8xbf16>
    tpu.vector_store %arg6[%c96, %c0_296], %218 {strides = array<i32>} : memref<256x72xbf16, #tpu.memory_space<vmem>>, vector<16x8xbf16>,
    %c0_297 = arith.constant 0 : index
    %c0_298 = arith.constant 0 : index
    %c109_299 = arith.constant 109 : index
    %c0_300 = arith.constant 0 : index
    %220 = vector.load %arg2[%c0_297, %c0_298, %c109_299, %c0_300] : memref<1x1x336x8xf32, #tpu.memory_space<vmem>>, vector<1x1x16x8xf32>
    %221 = vector.shape_cast %220 : vector<1x1x16x8xf32> to vector<16x8xf32>
    %222 = arith.truncf %221 : vector<16x8xf32> to vector<16x8xbf16>
    %c96_301 = arith.constant 96 : index
    %c8_302 = arith.constant 8 : index
    %223 = vector.load %arg6[%c96_301, %c8_302] : memref<256x72xbf16, #tpu.memory_space<vmem>>, vector<16x8xbf16>
    tpu.vector_store %arg6[%c96_301, %c8_302], %222 {strides = array<i32>} : memref<256x72xbf16, #tpu.memory_space<vmem>>, vector<16x8xbf16>,
    %c0_303 = arith.constant 0 : index
    %c0_304 = arith.constant 0 : index
    %c110_305 = arith.constant 110 : index
    %c0_306 = arith.constant 0 : index
    %224 = vector.load %arg2[%c0_303, %c0_304, %c110_305, %c0_306] : memref<1x1x336x8xf32, #tpu.memory_space<vmem>>, vector<1x1x16x8xf32>
    %225 = vector.shape_cast %224 : vector<1x1x16x8xf32> to vector<16x8xf32>
    %226 = arith.truncf %225 : vector<16x8xf32> to vector<16x8xbf16>
    %c96_307 = arith.constant 96 : index
    %c16_308 = arith.constant 16 : index
    %227 = vector.load %arg6[%c96_307, %c16_308] : memref<256x72xbf16, #tpu.memory_space<vmem>>, vector<16x8xbf16>
    tpu.vector_store %arg6[%c96_307, %c16_308], %226 {strides = array<i32>} : memref<256x72xbf16, #tpu.memory_space<vmem>>, vector<16x8xbf16>,
    %c0_309 = arith.constant 0 : index
    %c0_310 = arith.constant 0 : index
    %c126_311 = arith.constant 126 : index
    %c0_312 = arith.constant 0 : index
    %228 = vector.load %arg2[%c0_309, %c0_310, %c126_311, %c0_312] : memref<1x1x336x8xf32, #tpu.memory_space<vmem>>, vector<1x1x16x8xf32>
    %229 = vector.shape_cast %228 : vector<1x1x16x8xf32> to vector<16x8xf32>
    %230 = arith.truncf %229 : vector<16x8xf32> to vector<16x8xbf16>
    %c96_313 = arith.constant 96 : index
    %c24_314 = arith.constant 24 : index
    %231 = vector.load %arg6[%c96_313, %c24_314] : memref<256x72xbf16, #tpu.memory_space<vmem>>, vector<16x8xbf16>
    tpu.vector_store %arg6[%c96_313, %c24_314], %230 {strides = array<i32>} : memref<256x72xbf16, #tpu.memory_space<vmem>>, vector<16x8xbf16>,
    %c0_315 = arith.constant 0 : index
    %c0_316 = arith.constant 0 : index
    %c127_317 = arith.constant 127 : index
    %c0_318 = arith.constant 0 : index
    %232 = vector.load %arg2[%c0_315, %c0_316, %c127_317, %c0_318] : memref<1x1x336x8xf32, #tpu.memory_space<vmem>>, vector<1x1x16x8xf32>
    %233 = vector.shape_cast %232 : vector<1x1x16x8xf32> to vector<16x8xf32>
    %234 = arith.truncf %233 : vector<16x8xf32> to vector<16x8xbf16>
    %c96_319 = arith.constant 96 : index
    %c32_320 = arith.constant 32 : index
    %235 = vector.load %arg6[%c96_319, %c32_320] : memref<256x72xbf16, #tpu.memory_space<vmem>>, vector<16x8xbf16>
    tpu.vector_store %arg6[%c96_319, %c32_320], %234 {strides = array<i32>} : memref<256x72xbf16, #tpu.memory_space<vmem>>, vector<16x8xbf16>,
    %c0_321 = arith.constant 0 : index
    %c0_322 = arith.constant 0 : index
    %c128_323 = arith.constant 128 : index
    %c0_324 = arith.constant 0 : index
    %236 = vector.load %arg2[%c0_321, %c0_322, %c128_323, %c0_324] : memref<1x1x336x8xf32, #tpu.memory_space<vmem>>, vector<1x1x16x8xf32>
    %237 = vector.shape_cast %236 : vector<1x1x16x8xf32> to vector<16x8xf32>
    %238 = arith.truncf %237 : vector<16x8xf32> to vector<16x8xbf16>
    %c96_325 = arith.constant 96 : index
    %c40_326 = arith.constant 40 : index
    %239 = vector.load %arg6[%c96_325, %c40_326] : memref<256x72xbf16, #tpu.memory_space<vmem>>, vector<16x8xbf16>
    tpu.vector_store %arg6[%c96_325, %c40_326], %238 {strides = array<i32>} : memref<256x72xbf16, #tpu.memory_space<vmem>>, vector<16x8xbf16>,
    %c0_327 = arith.constant 0 : index
    %c0_328 = arith.constant 0 : index
    %c144 = arith.constant 144 : index
    %c0_329 = arith.constant 0 : index
    %240 = vector.load %arg2[%c0_327, %c0_328, %c144, %c0_329] : memref<1x1x336x8xf32, #tpu.memory_space<vmem>>, vector<1x1x16x8xf32>
    %241 = vector.shape_cast %240 : vector<1x1x16x8xf32> to vector<16x8xf32>
    %242 = arith.truncf %241 : vector<16x8xf32> to vector<16x8xbf16>
    %c96_330 = arith.constant 96 : index
    %c48_331 = arith.constant 48 : index
    %243 = vector.load %arg6[%c96_330, %c48_331] : memref<256x72xbf16, #tpu.memory_space<vmem>>, vector<16x8xbf16>
    tpu.vector_store %arg6[%c96_330, %c48_331], %242 {strides = array<i32>} : memref<256x72xbf16, #tpu.memory_space<vmem>>, vector<16x8xbf16>,
    %c0_332 = arith.constant 0 : index
    %c0_333 = arith.constant 0 : index
    %c145 = arith.constant 145 : index
    %c0_334 = arith.constant 0 : index
    %244 = vector.load %arg2[%c0_332, %c0_333, %c145, %c0_334] : memref<1x1x336x8xf32, #tpu.memory_space<vmem>>, vector<1x1x16x8xf32>
    %245 = vector.shape_cast %244 : vector<1x1x16x8xf32> to vector<16x8xf32>
    %246 = arith.truncf %245 : vector<16x8xf32> to vector<16x8xbf16>
    %c96_335 = arith.constant 96 : index
    %c56_336 = arith.constant 56 : index
    %247 = vector.load %arg6[%c96_335, %c56_336] : memref<256x72xbf16, #tpu.memory_space<vmem>>, vector<16x8xbf16>
    tpu.vector_store %arg6[%c96_335, %c56_336], %246 {strides = array<i32>} : memref<256x72xbf16, #tpu.memory_space<vmem>>, vector<16x8xbf16>,
    %c0_337 = arith.constant 0 : index
    %c0_338 = arith.constant 0 : index
    %c146 = arith.constant 146 : index
    %c0_339 = arith.constant 0 : index
    %248 = vector.load %arg2[%c0_337, %c0_338, %c146, %c0_339] : memref<1x1x336x8xf32, #tpu.memory_space<vmem>>, vector<1x1x16x8xf32>
    %249 = vector.shape_cast %248 : vector<1x1x16x8xf32> to vector<16x8xf32>
    %250 = arith.truncf %249 : vector<16x8xf32> to vector<16x8xbf16>
    %c96_340 = arith.constant 96 : index
    %c64_341 = arith.constant 64 : index
    %251 = vector.load %arg6[%c96_340, %c64_341] : memref<256x72xbf16, #tpu.memory_space<vmem>>, vector<16x8xbf16>
    tpu.vector_store %arg6[%c96_340, %c64_341], %250 {strides = array<i32>} : memref<256x72xbf16, #tpu.memory_space<vmem>>, vector<16x8xbf16>,
    %c0_342 = arith.constant 0 : index
    %c0_343 = arith.constant 0 : index
    %c126_344 = arith.constant 126 : index
    %c0_345 = arith.constant 0 : index
    %252 = vector.load %arg2[%c0_342, %c0_343, %c126_344, %c0_345] : memref<1x1x336x8xf32, #tpu.memory_space<vmem>>, vector<1x1x16x8xf32>
    %253 = vector.shape_cast %252 : vector<1x1x16x8xf32> to vector<16x8xf32>
    %254 = arith.truncf %253 : vector<16x8xf32> to vector<16x8xbf16>
    %c112 = arith.constant 112 : index
    %c0_346 = arith.constant 0 : index
    %255 = vector.load %arg6[%c112, %c0_346] : memref<256x72xbf16, #tpu.memory_space<vmem>>, vector<16x8xbf16>
    tpu.vector_store %arg6[%c112, %c0_346], %254 {strides = array<i32>} : memref<256x72xbf16, #tpu.memory_space<vmem>>, vector<16x8xbf16>,
    %c0_347 = arith.constant 0 : index
    %c0_348 = arith.constant 0 : index
    %c127_349 = arith.constant 127 : index
    %c0_350 = arith.constant 0 : index
    %256 = vector.load %arg2[%c0_347, %c0_348, %c127_349, %c0_350] : memref<1x1x336x8xf32, #tpu.memory_space<vmem>>, vector<1x1x16x8xf32>
    %257 = vector.shape_cast %256 : vector<1x1x16x8xf32> to vector<16x8xf32>
    %258 = arith.truncf %257 : vector<16x8xf32> to vector<16x8xbf16>
    %c112_351 = arith.constant 112 : index
    %c8_352 = arith.constant 8 : index
    %259 = vector.load %arg6[%c112_351, %c8_352] : memref<256x72xbf16, #tpu.memory_space<vmem>>, vector<16x8xbf16>
    tpu.vector_store %arg6[%c112_351, %c8_352], %258 {strides = array<i32>} : memref<256x72xbf16, #tpu.memory_space<vmem>>, vector<16x8xbf16>,
    %c0_353 = arith.constant 0 : index
    %c0_354 = arith.constant 0 : index
    %c128_355 = arith.constant 128 : index
    %c0_356 = arith.constant 0 : index
    %260 = vector.load %arg2[%c0_353, %c0_354, %c128_355, %c0_356] : memref<1x1x336x8xf32, #tpu.memory_space<vmem>>, vector<1x1x16x8xf32>
    %261 = vector.shape_cast %260 : vector<1x1x16x8xf32> to vector<16x8xf32>
    %262 = arith.truncf %261 : vector<16x8xf32> to vector<16x8xbf16>
    %c112_357 = arith.constant 112 : index
    %c16_358 = arith.constant 16 : index
    %263 = vector.load %arg6[%c112_357, %c16_358] : memref<256x72xbf16, #tpu.memory_space<vmem>>, vector<16x8xbf16>
    tpu.vector_store %arg6[%c112_357, %c16_358], %262 {strides = array<i32>} : memref<256x72xbf16, #tpu.memory_space<vmem>>, vector<16x8xbf16>,
    %c0_359 = arith.constant 0 : index
    %c0_360 = arith.constant 0 : index
    %c144_361 = arith.constant 144 : index
    %c0_362 = arith.constant 0 : index
    %264 = vector.load %arg2[%c0_359, %c0_360, %c144_361, %c0_362] : memref<1x1x336x8xf32, #tpu.memory_space<vmem>>, vector<1x1x16x8xf32>
    %265 = vector.shape_cast %264 : vector<1x1x16x8xf32> to vector<16x8xf32>
    %266 = arith.truncf %265 : vector<16x8xf32> to vector<16x8xbf16>
    %c112_363 = arith.constant 112 : index
    %c24_364 = arith.constant 24 : index
    %267 = vector.load %arg6[%c112_363, %c24_364] : memref<256x72xbf16, #tpu.memory_space<vmem>>, vector<16x8xbf16>
    tpu.vector_store %arg6[%c112_363, %c24_364], %266 {strides = array<i32>} : memref<256x72xbf16, #tpu.memory_space<vmem>>, vector<16x8xbf16>,
    %c0_365 = arith.constant 0 : index
    %c0_366 = arith.constant 0 : index
    %c145_367 = arith.constant 145 : index
    %c0_368 = arith.constant 0 : index
    %268 = vector.load %arg2[%c0_365, %c0_366, %c145_367, %c0_368] : memref<1x1x336x8xf32, #tpu.memory_space<vmem>>, vector<1x1x16x8xf32>
    %269 = vector.shape_cast %268 : vector<1x1x16x8xf32> to vector<16x8xf32>
    %270 = arith.truncf %269 : vector<16x8xf32> to vector<16x8xbf16>
    %c112_369 = arith.constant 112 : index
    %c32_370 = arith.constant 32 : index
    %271 = vector.load %arg6[%c112_369, %c32_370] : memref<256x72xbf16, #tpu.memory_space<vmem>>, vector<16x8xbf16>
    tpu.vector_store %arg6[%c112_369, %c32_370], %270 {strides = array<i32>} : memref<256x72xbf16, #tpu.memory_space<vmem>>, vector<16x8xbf16>,
    %c0_371 = arith.constant 0 : index
    %c0_372 = arith.constant 0 : index
    %c146_373 = arith.constant 146 : index
    %c0_374 = arith.constant 0 : index
    %272 = vector.load %arg2[%c0_371, %c0_372, %c146_373, %c0_374] : memref<1x1x336x8xf32, #tpu.memory_space<vmem>>, vector<1x1x16x8xf32>
    %273 = vector.shape_cast %272 : vector<1x1x16x8xf32> to vector<16x8xf32>
    %274 = arith.truncf %273 : vector<16x8xf32> to vector<16x8xbf16>
    %c112_375 = arith.constant 112 : index
    %c40_376 = arith.constant 40 : index
    %275 = vector.load %arg6[%c112_375, %c40_376] : memref<256x72xbf16, #tpu.memory_space<vmem>>, vector<16x8xbf16>
    tpu.vector_store %arg6[%c112_375, %c40_376], %274 {strides = array<i32>} : memref<256x72xbf16, #tpu.memory_space<vmem>>, vector<16x8xbf16>,
    %c0_377 = arith.constant 0 : index
    %c0_378 = arith.constant 0 : index
    %c162 = arith.constant 162 : index
    %c0_379 = arith.constant 0 : index
    %276 = vector.load %arg2[%c0_377, %c0_378, %c162, %c0_379] : memref<1x1x336x8xf32, #tpu.memory_space<vmem>>, vector<1x1x16x8xf32>
    %277 = vector.shape_cast %276 : vector<1x1x16x8xf32> to vector<16x8xf32>
    %278 = arith.truncf %277 : vector<16x8xf32> to vector<16x8xbf16>
    %c112_380 = arith.constant 112 : index
    %c48_381 = arith.constant 48 : index
    %279 = vector.load %arg6[%c112_380, %c48_381] : memref<256x72xbf16, #tpu.memory_space<vmem>>, vector<16x8xbf16>
    tpu.vector_store %arg6[%c112_380, %c48_381], %278 {strides = array<i32>} : memref<256x72xbf16, #tpu.memory_space<vmem>>, vector<16x8xbf16>,
    %c0_382 = arith.constant 0 : index
    %c0_383 = arith.constant 0 : index
    %c163 = arith.constant 163 : index
    %c0_384 = arith.constant 0 : index
    %280 = vector.load %arg2[%c0_382, %c0_383, %c163, %c0_384] : memref<1x1x336x8xf32, #tpu.memory_space<vmem>>, vector<1x1x16x8xf32>
    %281 = vector.shape_cast %280 : vector<1x1x16x8xf32> to vector<16x8xf32>
    %282 = arith.truncf %281 : vector<16x8xf32> to vector<16x8xbf16>
    %c112_385 = arith.constant 112 : index
    %c56_386 = arith.constant 56 : index
    %283 = vector.load %arg6[%c112_385, %c56_386] : memref<256x72xbf16, #tpu.memory_space<vmem>>, vector<16x8xbf16>
    tpu.vector_store %arg6[%c112_385, %c56_386], %282 {strides = array<i32>} : memref<256x72xbf16, #tpu.memory_space<vmem>>, vector<16x8xbf16>,
    %c0_387 = arith.constant 0 : index
    %c0_388 = arith.constant 0 : index
    %c164 = arith.constant 164 : index
    %c0_389 = arith.constant 0 : index
    %284 = vector.load %arg2[%c0_387, %c0_388, %c164, %c0_389] : memref<1x1x336x8xf32, #tpu.memory_space<vmem>>, vector<1x1x16x8xf32>
    %285 = vector.shape_cast %284 : vector<1x1x16x8xf32> to vector<16x8xf32>
    %286 = arith.truncf %285 : vector<16x8xf32> to vector<16x8xbf16>
    %c112_390 = arith.constant 112 : index
    %c64_391 = arith.constant 64 : index
    %287 = vector.load %arg6[%c112_390, %c64_391] : memref<256x72xbf16, #tpu.memory_space<vmem>>, vector<16x8xbf16>
    tpu.vector_store %arg6[%c112_390, %c64_391], %286 {strides = array<i32>} : memref<256x72xbf16, #tpu.memory_space<vmem>>, vector<16x8xbf16>,
    %c0_392 = arith.constant 0 : index
    %c0_393 = arith.constant 0 : index
    %c144_394 = arith.constant 144 : index
    %c0_395 = arith.constant 0 : index
    %288 = vector.load %arg2[%c0_392, %c0_393, %c144_394, %c0_395] : memref<1x1x336x8xf32, #tpu.memory_space<vmem>>, vector<1x1x16x8xf32>
    %289 = vector.shape_cast %288 : vector<1x1x16x8xf32> to vector<16x8xf32>
    %290 = arith.truncf %289 : vector<16x8xf32> to vector<16x8xbf16>
    %c128_396 = arith.constant 128 : index
    %c0_397 = arith.constant 0 : index
    %291 = vector.load %arg6[%c128_396, %c0_397] : memref<256x72xbf16, #tpu.memory_space<vmem>>, vector<16x8xbf16>
    tpu.vector_store %arg6[%c128_396, %c0_397], %290 {strides = array<i32>} : memref<256x72xbf16, #tpu.memory_space<vmem>>, vector<16x8xbf16>,
    %c0_398 = arith.constant 0 : index
    %c0_399 = arith.constant 0 : index
    %c145_400 = arith.constant 145 : index
    %c0_401 = arith.constant 0 : index
    %292 = vector.load %arg2[%c0_398, %c0_399, %c145_400, %c0_401] : memref<1x1x336x8xf32, #tpu.memory_space<vmem>>, vector<1x1x16x8xf32>
    %293 = vector.shape_cast %292 : vector<1x1x16x8xf32> to vector<16x8xf32>
    %294 = arith.truncf %293 : vector<16x8xf32> to vector<16x8xbf16>
    %c128_402 = arith.constant 128 : index
    %c8_403 = arith.constant 8 : index
    %295 = vector.load %arg6[%c128_402, %c8_403] : memref<256x72xbf16, #tpu.memory_space<vmem>>, vector<16x8xbf16>
    tpu.vector_store %arg6[%c128_402, %c8_403], %294 {strides = array<i32>} : memref<256x72xbf16, #tpu.memory_space<vmem>>, vector<16x8xbf16>,
    %c0_404 = arith.constant 0 : index
    %c0_405 = arith.constant 0 : index
    %c146_406 = arith.constant 146 : index
    %c0_407 = arith.constant 0 : index
    %296 = vector.load %arg2[%c0_404, %c0_405, %c146_406, %c0_407] : memref<1x1x336x8xf32, #tpu.memory_space<vmem>>, vector<1x1x16x8xf32>
    %297 = vector.shape_cast %296 : vector<1x1x16x8xf32> to vector<16x8xf32>
    %298 = arith.truncf %297 : vector<16x8xf32> to vector<16x8xbf16>
    %c128_408 = arith.constant 128 : index
    %c16_409 = arith.constant 16 : index
    %299 = vector.load %arg6[%c128_408, %c16_409] : memref<256x72xbf16, #tpu.memory_space<vmem>>, vector<16x8xbf16>
    tpu.vector_store %arg6[%c128_408, %c16_409], %298 {strides = array<i32>} : memref<256x72xbf16, #tpu.memory_space<vmem>>, vector<16x8xbf16>,
    %c0_410 = arith.constant 0 : index
    %c0_411 = arith.constant 0 : index
    %c162_412 = arith.constant 162 : index
    %c0_413 = arith.constant 0 : index
    %300 = vector.load %arg2[%c0_410, %c0_411, %c162_412, %c0_413] : memref<1x1x336x8xf32, #tpu.memory_space<vmem>>, vector<1x1x16x8xf32>
    %301 = vector.shape_cast %300 : vector<1x1x16x8xf32> to vector<16x8xf32>
    %302 = arith.truncf %301 : vector<16x8xf32> to vector<16x8xbf16>
    %c128_414 = arith.constant 128 : index
    %c24_415 = arith.constant 24 : index
    %303 = vector.load %arg6[%c128_414, %c24_415] : memref<256x72xbf16, #tpu.memory_space<vmem>>, vector<16x8xbf16>
    tpu.vector_store %arg6[%c128_414, %c24_415], %302 {strides = array<i32>} : memref<256x72xbf16, #tpu.memory_space<vmem>>, vector<16x8xbf16>,
    %c0_416 = arith.constant 0 : index
    %c0_417 = arith.constant 0 : index
    %c163_418 = arith.constant 163 : index
    %c0_419 = arith.constant 0 : index
    %304 = vector.load %arg2[%c0_416, %c0_417, %c163_418, %c0_419] : memref<1x1x336x8xf32, #tpu.memory_space<vmem>>, vector<1x1x16x8xf32>
    %305 = vector.shape_cast %304 : vector<1x1x16x8xf32> to vector<16x8xf32>
    %306 = arith.truncf %305 : vector<16x8xf32> to vector<16x8xbf16>
    %c128_420 = arith.constant 128 : index
    %c32_421 = arith.constant 32 : index
    %307 = vector.load %arg6[%c128_420, %c32_421] : memref<256x72xbf16, #tpu.memory_space<vmem>>, vector<16x8xbf16>
    tpu.vector_store %arg6[%c128_420, %c32_421], %306 {strides = array<i32>} : memref<256x72xbf16, #tpu.memory_space<vmem>>, vector<16x8xbf16>,
    %c0_422 = arith.constant 0 : index
    %c0_423 = arith.constant 0 : index
    %c164_424 = arith.constant 164 : index
    %c0_425 = arith.constant 0 : index
    %308 = vector.load %arg2[%c0_422, %c0_423, %c164_424, %c0_425] : memref<1x1x336x8xf32, #tpu.memory_space<vmem>>, vector<1x1x16x8xf32>
    %309 = vector.shape_cast %308 : vector<1x1x16x8xf32> to vector<16x8xf32>
    %310 = arith.truncf %309 : vector<16x8xf32> to vector<16x8xbf16>
    %c128_426 = arith.constant 128 : index
    %c40_427 = arith.constant 40 : index
    %311 = vector.load %arg6[%c128_426, %c40_427] : memref<256x72xbf16, #tpu.memory_space<vmem>>, vector<16x8xbf16>
    tpu.vector_store %arg6[%c128_426, %c40_427], %310 {strides = array<i32>} : memref<256x72xbf16, #tpu.memory_space<vmem>>, vector<16x8xbf16>,
    %c0_428 = arith.constant 0 : index
    %c0_429 = arith.constant 0 : index
    %c180 = arith.constant 180 : index
    %c0_430 = arith.constant 0 : index
    %312 = vector.load %arg2[%c0_428, %c0_429, %c180, %c0_430] : memref<1x1x336x8xf32, #tpu.memory_space<vmem>>, vector<1x1x16x8xf32>
    %313 = vector.shape_cast %312 : vector<1x1x16x8xf32> to vector<16x8xf32>
    %314 = arith.truncf %313 : vector<16x8xf32> to vector<16x8xbf16>
    %c128_431 = arith.constant 128 : index
    %c48_432 = arith.constant 48 : index
    %315 = vector.load %arg6[%c128_431, %c48_432] : memref<256x72xbf16, #tpu.memory_space<vmem>>, vector<16x8xbf16>
    tpu.vector_store %arg6[%c128_431, %c48_432], %314 {strides = array<i32>} : memref<256x72xbf16, #tpu.memory_space<vmem>>, vector<16x8xbf16>,
    %c0_433 = arith.constant 0 : index
    %c0_434 = arith.constant 0 : index
    %c181 = arith.constant 181 : index
    %c0_435 = arith.constant 0 : index
    %316 = vector.load %arg2[%c0_433, %c0_434, %c181, %c0_435] : memref<1x1x336x8xf32, #tpu.memory_space<vmem>>, vector<1x1x16x8xf32>
    %317 = vector.shape_cast %316 : vector<1x1x16x8xf32> to vector<16x8xf32>
    %318 = arith.truncf %317 : vector<16x8xf32> to vector<16x8xbf16>
    %c128_436 = arith.constant 128 : index
    %c56_437 = arith.constant 56 : index
    %319 = vector.load %arg6[%c128_436, %c56_437] : memref<256x72xbf16, #tpu.memory_space<vmem>>, vector<16x8xbf16>
    tpu.vector_store %arg6[%c128_436, %c56_437], %318 {strides = array<i32>} : memref<256x72xbf16, #tpu.memory_space<vmem>>, vector<16x8xbf16>,
    %c0_438 = arith.constant 0 : index
    %c0_439 = arith.constant 0 : index
    %c182 = arith.constant 182 : index
    %c0_440 = arith.constant 0 : index
    %320 = vector.load %arg2[%c0_438, %c0_439, %c182, %c0_440] : memref<1x1x336x8xf32, #tpu.memory_space<vmem>>, vector<1x1x16x8xf32>
    %321 = vector.shape_cast %320 : vector<1x1x16x8xf32> to vector<16x8xf32>
    %322 = arith.truncf %321 : vector<16x8xf32> to vector<16x8xbf16>
    %c128_441 = arith.constant 128 : index
    %c64_442 = arith.constant 64 : index
    %323 = vector.load %arg6[%c128_441, %c64_442] : memref<256x72xbf16, #tpu.memory_space<vmem>>, vector<16x8xbf16>
    tpu.vector_store %arg6[%c128_441, %c64_442], %322 {strides = array<i32>} : memref<256x72xbf16, #tpu.memory_space<vmem>>, vector<16x8xbf16>,
    %c0_443 = arith.constant 0 : index
    %c0_444 = arith.constant 0 : index
    %c162_445 = arith.constant 162 : index
    %c0_446 = arith.constant 0 : index
    %324 = vector.load %arg2[%c0_443, %c0_444, %c162_445, %c0_446] : memref<1x1x336x8xf32, #tpu.memory_space<vmem>>, vector<1x1x16x8xf32>
    %325 = vector.shape_cast %324 : vector<1x1x16x8xf32> to vector<16x8xf32>
    %326 = arith.truncf %325 : vector<16x8xf32> to vector<16x8xbf16>
    %c144_447 = arith.constant 144 : index
    %c0_448 = arith.constant 0 : index
    %327 = vector.load %arg6[%c144_447, %c0_448] : memref<256x72xbf16, #tpu.memory_space<vmem>>, vector<16x8xbf16>
    tpu.vector_store %arg6[%c144_447, %c0_448], %326 {strides = array<i32>} : memref<256x72xbf16, #tpu.memory_space<vmem>>, vector<16x8xbf16>,
    %c0_449 = arith.constant 0 : index
    %c0_450 = arith.constant 0 : index
    %c163_451 = arith.constant 163 : index
    %c0_452 = arith.constant 0 : index
    %328 = vector.load %arg2[%c0_449, %c0_450, %c163_451, %c0_452] : memref<1x1x336x8xf32, #tpu.memory_space<vmem>>, vector<1x1x16x8xf32>
    %329 = vector.shape_cast %328 : vector<1x1x16x8xf32> to vector<16x8xf32>
    %330 = arith.truncf %329 : vector<16x8xf32> to vector<16x8xbf16>
    %c144_453 = arith.constant 144 : index
    %c8_454 = arith.constant 8 : index
    %331 = vector.load %arg6[%c144_453, %c8_454] : memref<256x72xbf16, #tpu.memory_space<vmem>>, vector<16x8xbf16>
    tpu.vector_store %arg6[%c144_453, %c8_454], %330 {strides = array<i32>} : memref<256x72xbf16, #tpu.memory_space<vmem>>, vector<16x8xbf16>,
    %c0_455 = arith.constant 0 : index
    %c0_456 = arith.constant 0 : index
    %c164_457 = arith.constant 164 : index
    %c0_458 = arith.constant 0 : index
    %332 = vector.load %arg2[%c0_455, %c0_456, %c164_457, %c0_458] : memref<1x1x336x8xf32, #tpu.memory_space<vmem>>, vector<1x1x16x8xf32>
    %333 = vector.shape_cast %332 : vector<1x1x16x8xf32> to vector<16x8xf32>
    %334 = arith.truncf %333 : vector<16x8xf32> to vector<16x8xbf16>
    %c144_459 = arith.constant 144 : index
    %c16_460 = arith.constant 16 : index
    %335 = vector.load %arg6[%c144_459, %c16_460] : memref<256x72xbf16, #tpu.memory_space<vmem>>, vector<16x8xbf16>
    tpu.vector_store %arg6[%c144_459, %c16_460], %334 {strides = array<i32>} : memref<256x72xbf16, #tpu.memory_space<vmem>>, vector<16x8xbf16>,
    %c0_461 = arith.constant 0 : index
    %c0_462 = arith.constant 0 : index
    %c180_463 = arith.constant 180 : index
    %c0_464 = arith.constant 0 : index
    %336 = vector.load %arg2[%c0_461, %c0_462, %c180_463, %c0_464] : memref<1x1x336x8xf32, #tpu.memory_space<vmem>>, vector<1x1x16x8xf32>
    %337 = vector.shape_cast %336 : vector<1x1x16x8xf32> to vector<16x8xf32>
    %338 = arith.truncf %337 : vector<16x8xf32> to vector<16x8xbf16>
    %c144_465 = arith.constant 144 : index
    %c24_466 = arith.constant 24 : index
    %339 = vector.load %arg6[%c144_465, %c24_466] : memref<256x72xbf16, #tpu.memory_space<vmem>>, vector<16x8xbf16>
    tpu.vector_store %arg6[%c144_465, %c24_466], %338 {strides = array<i32>} : memref<256x72xbf16, #tpu.memory_space<vmem>>, vector<16x8xbf16>,
    %c0_467 = arith.constant 0 : index
    %c0_468 = arith.constant 0 : index
    %c181_469 = arith.constant 181 : index
    %c0_470 = arith.constant 0 : index
    %340 = vector.load %arg2[%c0_467, %c0_468, %c181_469, %c0_470] : memref<1x1x336x8xf32, #tpu.memory_space<vmem>>, vector<1x1x16x8xf32>
    %341 = vector.shape_cast %340 : vector<1x1x16x8xf32> to vector<16x8xf32>
    %342 = arith.truncf %341 : vector<16x8xf32> to vector<16x8xbf16>
    %c144_471 = arith.constant 144 : index
    %c32_472 = arith.constant 32 : index
    %343 = vector.load %arg6[%c144_471, %c32_472] : memref<256x72xbf16, #tpu.memory_space<vmem>>, vector<16x8xbf16>
    tpu.vector_store %arg6[%c144_471, %c32_472], %342 {strides = array<i32>} : memref<256x72xbf16, #tpu.memory_space<vmem>>, vector<16x8xbf16>,
    %c0_473 = arith.constant 0 : index
    %c0_474 = arith.constant 0 : index
    %c182_475 = arith.constant 182 : index
    %c0_476 = arith.constant 0 : index
    %344 = vector.load %arg2[%c0_473, %c0_474, %c182_475, %c0_476] : memref<1x1x336x8xf32, #tpu.memory_space<vmem>>, vector<1x1x16x8xf32>
    %345 = vector.shape_cast %344 : vector<1x1x16x8xf32> to vector<16x8xf32>
    %346 = arith.truncf %345 : vector<16x8xf32> to vector<16x8xbf16>
    %c144_477 = arith.constant 144 : index
    %c40_478 = arith.constant 40 : index
    %347 = vector.load %arg6[%c144_477, %c40_478] : memref<256x72xbf16, #tpu.memory_space<vmem>>, vector<16x8xbf16>
    tpu.vector_store %arg6[%c144_477, %c40_478], %346 {strides = array<i32>} : memref<256x72xbf16, #tpu.memory_space<vmem>>, vector<16x8xbf16>,
    %c0_479 = arith.constant 0 : index
    %c0_480 = arith.constant 0 : index
    %c198 = arith.constant 198 : index
    %c0_481 = arith.constant 0 : index
    %348 = vector.load %arg2[%c0_479, %c0_480, %c198, %c0_481] : memref<1x1x336x8xf32, #tpu.memory_space<vmem>>, vector<1x1x16x8xf32>
    %349 = vector.shape_cast %348 : vector<1x1x16x8xf32> to vector<16x8xf32>
    %350 = arith.truncf %349 : vector<16x8xf32> to vector<16x8xbf16>
    %c144_482 = arith.constant 144 : index
    %c48_483 = arith.constant 48 : index
    %351 = vector.load %arg6[%c144_482, %c48_483] : memref<256x72xbf16, #tpu.memory_space<vmem>>, vector<16x8xbf16>
    tpu.vector_store %arg6[%c144_482, %c48_483], %350 {strides = array<i32>} : memref<256x72xbf16, #tpu.memory_space<vmem>>, vector<16x8xbf16>,
    %c0_484 = arith.constant 0 : index
    %c0_485 = arith.constant 0 : index
    %c199 = arith.constant 199 : index
    %c0_486 = arith.constant 0 : index
    %352 = vector.load %arg2[%c0_484, %c0_485, %c199, %c0_486] : memref<1x1x336x8xf32, #tpu.memory_space<vmem>>, vector<1x1x16x8xf32>
    %353 = vector.shape_cast %352 : vector<1x1x16x8xf32> to vector<16x8xf32>
    %354 = arith.truncf %353 : vector<16x8xf32> to vector<16x8xbf16>
    %c144_487 = arith.constant 144 : index
    %c56_488 = arith.constant 56 : index
    %355 = vector.load %arg6[%c144_487, %c56_488] : memref<256x72xbf16, #tpu.memory_space<vmem>>, vector<16x8xbf16>
    tpu.vector_store %arg6[%c144_487, %c56_488], %354 {strides = array<i32>} : memref<256x72xbf16, #tpu.memory_space<vmem>>, vector<16x8xbf16>,
    %c0_489 = arith.constant 0 : index
    %c0_490 = arith.constant 0 : index
    %c200 = arith.constant 200 : index
    %c0_491 = arith.constant 0 : index
    %356 = vector.load %arg2[%c0_489, %c0_490, %c200, %c0_491] : memref<1x1x336x8xf32, #tpu.memory_space<vmem>>, vector<1x1x16x8xf32>
    %357 = vector.shape_cast %356 : vector<1x1x16x8xf32> to vector<16x8xf32>
    %358 = arith.truncf %357 : vector<16x8xf32> to vector<16x8xbf16>
    %c144_492 = arith.constant 144 : index
    %c64_493 = arith.constant 64 : index
    %359 = vector.load %arg6[%c144_492, %c64_493] : memref<256x72xbf16, #tpu.memory_space<vmem>>, vector<16x8xbf16>
    tpu.vector_store %arg6[%c144_492, %c64_493], %358 {strides = array<i32>} : memref<256x72xbf16, #tpu.memory_space<vmem>>, vector<16x8xbf16>,
    %c0_494 = arith.constant 0 : index
    %c0_495 = arith.constant 0 : index
    %c180_496 = arith.constant 180 : index
    %c0_497 = arith.constant 0 : index
    %360 = vector.load %arg2[%c0_494, %c0_495, %c180_496, %c0_497] : memref<1x1x336x8xf32, #tpu.memory_space<vmem>>, vector<1x1x16x8xf32>
    %361 = vector.shape_cast %360 : vector<1x1x16x8xf32> to vector<16x8xf32>
    %362 = arith.truncf %361 : vector<16x8xf32> to vector<16x8xbf16>
    %c160 = arith.constant 160 : index
    %c0_498 = arith.constant 0 : index
    %363 = vector.load %arg6[%c160, %c0_498] : memref<256x72xbf16, #tpu.memory_space<vmem>>, vector<16x8xbf16>
    tpu.vector_store %arg6[%c160, %c0_498], %362 {strides = array<i32>} : memref<256x72xbf16, #tpu.memory_space<vmem>>, vector<16x8xbf16>,
    %c0_499 = arith.constant 0 : index
    %c0_500 = arith.constant 0 : index
    %c181_501 = arith.constant 181 : index
    %c0_502 = arith.constant 0 : index
    %364 = vector.load %arg2[%c0_499, %c0_500, %c181_501, %c0_502] : memref<1x1x336x8xf32, #tpu.memory_space<vmem>>, vector<1x1x16x8xf32>
    %365 = vector.shape_cast %364 : vector<1x1x16x8xf32> to vector<16x8xf32>
    %366 = arith.truncf %365 : vector<16x8xf32> to vector<16x8xbf16>
    %c160_503 = arith.constant 160 : index
    %c8_504 = arith.constant 8 : index
    %367 = vector.load %arg6[%c160_503, %c8_504] : memref<256x72xbf16, #tpu.memory_space<vmem>>, vector<16x8xbf16>
    tpu.vector_store %arg6[%c160_503, %c8_504], %366 {strides = array<i32>} : memref<256x72xbf16, #tpu.memory_space<vmem>>, vector<16x8xbf16>,
    %c0_505 = arith.constant 0 : index
    %c0_506 = arith.constant 0 : index
    %c182_507 = arith.constant 182 : index
    %c0_508 = arith.constant 0 : index
    %368 = vector.load %arg2[%c0_505, %c0_506, %c182_507, %c0_508] : memref<1x1x336x8xf32, #tpu.memory_space<vmem>>, vector<1x1x16x8xf32>
    %369 = vector.shape_cast %368 : vector<1x1x16x8xf32> to vector<16x8xf32>
    %370 = arith.truncf %369 : vector<16x8xf32> to vector<16x8xbf16>
    %c160_509 = arith.constant 160 : index
    %c16_510 = arith.constant 16 : index
    %371 = vector.load %arg6[%c160_509, %c16_510] : memref<256x72xbf16, #tpu.memory_space<vmem>>, vector<16x8xbf16>
    tpu.vector_store %arg6[%c160_509, %c16_510], %370 {strides = array<i32>} : memref<256x72xbf16, #tpu.memory_space<vmem>>, vector<16x8xbf16>,
    %c0_511 = arith.constant 0 : index
    %c0_512 = arith.constant 0 : index
    %c198_513 = arith.constant 198 : index
    %c0_514 = arith.constant 0 : index
    %372 = vector.load %arg2[%c0_511, %c0_512, %c198_513, %c0_514] : memref<1x1x336x8xf32, #tpu.memory_space<vmem>>, vector<1x1x16x8xf32>
    %373 = vector.shape_cast %372 : vector<1x1x16x8xf32> to vector<16x8xf32>
    %374 = arith.truncf %373 : vector<16x8xf32> to vector<16x8xbf16>
    %c160_515 = arith.constant 160 : index
    %c24_516 = arith.constant 24 : index
    %375 = vector.load %arg6[%c160_515, %c24_516] : memref<256x72xbf16, #tpu.memory_space<vmem>>, vector<16x8xbf16>
    tpu.vector_store %arg6[%c160_515, %c24_516], %374 {strides = array<i32>} : memref<256x72xbf16, #tpu.memory_space<vmem>>, vector<16x8xbf16>,
    %c0_517 = arith.constant 0 : index
    %c0_518 = arith.constant 0 : index
    %c199_519 = arith.constant 199 : index
    %c0_520 = arith.constant 0 : index
    %376 = vector.load %arg2[%c0_517, %c0_518, %c199_519, %c0_520] : memref<1x1x336x8xf32, #tpu.memory_space<vmem>>, vector<1x1x16x8xf32>
    %377 = vector.shape_cast %376 : vector<1x1x16x8xf32> to vector<16x8xf32>
    %378 = arith.truncf %377 : vector<16x8xf32> to vector<16x8xbf16>
    %c160_521 = arith.constant 160 : index
    %c32_522 = arith.constant 32 : index
    %379 = vector.load %arg6[%c160_521, %c32_522] : memref<256x72xbf16, #tpu.memory_space<vmem>>, vector<16x8xbf16>
    tpu.vector_store %arg6[%c160_521, %c32_522], %378 {strides = array<i32>} : memref<256x72xbf16, #tpu.memory_space<vmem>>, vector<16x8xbf16>,
    %c0_523 = arith.constant 0 : index
    %c0_524 = arith.constant 0 : index
    %c200_525 = arith.constant 200 : index
    %c0_526 = arith.constant 0 : index
    %380 = vector.load %arg2[%c0_523, %c0_524, %c200_525, %c0_526] : memref<1x1x336x8xf32, #tpu.memory_space<vmem>>, vector<1x1x16x8xf32>
    %381 = vector.shape_cast %380 : vector<1x1x16x8xf32> to vector<16x8xf32>
    %382 = arith.truncf %381 : vector<16x8xf32> to vector<16x8xbf16>
    %c160_527 = arith.constant 160 : index
    %c40_528 = arith.constant 40 : index
    %383 = vector.load %arg6[%c160_527, %c40_528] : memref<256x72xbf16, #tpu.memory_space<vmem>>, vector<16x8xbf16>
    tpu.vector_store %arg6[%c160_527, %c40_528], %382 {strides = array<i32>} : memref<256x72xbf16, #tpu.memory_space<vmem>>, vector<16x8xbf16>,
    %c0_529 = arith.constant 0 : index
    %c0_530 = arith.constant 0 : index
    %c216 = arith.constant 216 : index
    %c0_531 = arith.constant 0 : index
    %384 = vector.load %arg2[%c0_529, %c0_530, %c216, %c0_531] : memref<1x1x336x8xf32, #tpu.memory_space<vmem>>, vector<1x1x16x8xf32>
    %385 = vector.shape_cast %384 : vector<1x1x16x8xf32> to vector<16x8xf32>
    %386 = arith.truncf %385 : vector<16x8xf32> to vector<16x8xbf16>
    %c160_532 = arith.constant 160 : index
    %c48_533 = arith.constant 48 : index
    %387 = vector.load %arg6[%c160_532, %c48_533] : memref<256x72xbf16, #tpu.memory_space<vmem>>, vector<16x8xbf16>
    tpu.vector_store %arg6[%c160_532, %c48_533], %386 {strides = array<i32>} : memref<256x72xbf16, #tpu.memory_space<vmem>>, vector<16x8xbf16>,
    %c0_534 = arith.constant 0 : index
    %c0_535 = arith.constant 0 : index
    %c217 = arith.constant 217 : index
    %c0_536 = arith.constant 0 : index
    %388 = vector.load %arg2[%c0_534, %c0_535, %c217, %c0_536] : memref<1x1x336x8xf32, #tpu.memory_space<vmem>>, vector<1x1x16x8xf32>
    %389 = vector.shape_cast %388 : vector<1x1x16x8xf32> to vector<16x8xf32>
    %390 = arith.truncf %389 : vector<16x8xf32> to vector<16x8xbf16>
    %c160_537 = arith.constant 160 : index
    %c56_538 = arith.constant 56 : index
    %391 = vector.load %arg6[%c160_537, %c56_538] : memref<256x72xbf16, #tpu.memory_space<vmem>>, vector<16x8xbf16>
    tpu.vector_store %arg6[%c160_537, %c56_538], %390 {strides = array<i32>} : memref<256x72xbf16, #tpu.memory_space<vmem>>, vector<16x8xbf16>,
    %c0_539 = arith.constant 0 : index
    %c0_540 = arith.constant 0 : index
    %c218 = arith.constant 218 : index
    %c0_541 = arith.constant 0 : index
    %392 = vector.load %arg2[%c0_539, %c0_540, %c218, %c0_541] : memref<1x1x336x8xf32, #tpu.memory_space<vmem>>, vector<1x1x16x8xf32>
    %393 = vector.shape_cast %392 : vector<1x1x16x8xf32> to vector<16x8xf32>
    %394 = arith.truncf %393 : vector<16x8xf32> to vector<16x8xbf16>
    %c160_542 = arith.constant 160 : index
    %c64_543 = arith.constant 64 : index
    %395 = vector.load %arg6[%c160_542, %c64_543] : memref<256x72xbf16, #tpu.memory_space<vmem>>, vector<16x8xbf16>
    tpu.vector_store %arg6[%c160_542, %c64_543], %394 {strides = array<i32>} : memref<256x72xbf16, #tpu.memory_space<vmem>>, vector<16x8xbf16>,
    %c0_544 = arith.constant 0 : index
    %c0_545 = arith.constant 0 : index
    %c198_546 = arith.constant 198 : index
    %c0_547 = arith.constant 0 : index
    %396 = vector.load %arg2[%c0_544, %c0_545, %c198_546, %c0_547] : memref<1x1x336x8xf32, #tpu.memory_space<vmem>>, vector<1x1x16x8xf32>
    %397 = vector.shape_cast %396 : vector<1x1x16x8xf32> to vector<16x8xf32>
    %398 = arith.truncf %397 : vector<16x8xf32> to vector<16x8xbf16>
    %c176 = arith.constant 176 : index
    %c0_548 = arith.constant 0 : index
    %399 = vector.load %arg6[%c176, %c0_548] : memref<256x72xbf16, #tpu.memory_space<vmem>>, vector<16x8xbf16>
    tpu.vector_store %arg6[%c176, %c0_548], %398 {strides = array<i32>} : memref<256x72xbf16, #tpu.memory_space<vmem>>, vector<16x8xbf16>,
    %c0_549 = arith.constant 0 : index
    %c0_550 = arith.constant 0 : index
    %c199_551 = arith.constant 199 : index
    %c0_552 = arith.constant 0 : index
    %400 = vector.load %arg2[%c0_549, %c0_550, %c199_551, %c0_552] : memref<1x1x336x8xf32, #tpu.memory_space<vmem>>, vector<1x1x16x8xf32>
    %401 = vector.shape_cast %400 : vector<1x1x16x8xf32> to vector<16x8xf32>
    %402 = arith.truncf %401 : vector<16x8xf32> to vector<16x8xbf16>
    %c176_553 = arith.constant 176 : index
    %c8_554 = arith.constant 8 : index
    %403 = vector.load %arg6[%c176_553, %c8_554] : memref<256x72xbf16, #tpu.memory_space<vmem>>, vector<16x8xbf16>
    tpu.vector_store %arg6[%c176_553, %c8_554], %402 {strides = array<i32>} : memref<256x72xbf16, #tpu.memory_space<vmem>>, vector<16x8xbf16>,
    %c0_555 = arith.constant 0 : index
    %c0_556 = arith.constant 0 : index
    %c200_557 = arith.constant 200 : index
    %c0_558 = arith.constant 0 : index
    %404 = vector.load %arg2[%c0_555, %c0_556, %c200_557, %c0_558] : memref<1x1x336x8xf32, #tpu.memory_space<vmem>>, vector<1x1x16x8xf32>
    %405 = vector.shape_cast %404 : vector<1x1x16x8xf32> to vector<16x8xf32>
    %406 = arith.truncf %405 : vector<16x8xf32> to vector<16x8xbf16>
    %c176_559 = arith.constant 176 : index
    %c16_560 = arith.constant 16 : index
    %407 = vector.load %arg6[%c176_559, %c16_560] : memref<256x72xbf16, #tpu.memory_space<vmem>>, vector<16x8xbf16>
    tpu.vector_store %arg6[%c176_559, %c16_560], %406 {strides = array<i32>} : memref<256x72xbf16, #tpu.memory_space<vmem>>, vector<16x8xbf16>,
    %c0_561 = arith.constant 0 : index
    %c0_562 = arith.constant 0 : index
    %c216_563 = arith.constant 216 : index
    %c0_564 = arith.constant 0 : index
    %408 = vector.load %arg2[%c0_561, %c0_562, %c216_563, %c0_564] : memref<1x1x336x8xf32, #tpu.memory_space<vmem>>, vector<1x1x16x8xf32>
    %409 = vector.shape_cast %408 : vector<1x1x16x8xf32> to vector<16x8xf32>
    %410 = arith.truncf %409 : vector<16x8xf32> to vector<16x8xbf16>
    %c176_565 = arith.constant 176 : index
    %c24_566 = arith.constant 24 : index
    %411 = vector.load %arg6[%c176_565, %c24_566] : memref<256x72xbf16, #tpu.memory_space<vmem>>, vector<16x8xbf16>
    tpu.vector_store %arg6[%c176_565, %c24_566], %410 {strides = array<i32>} : memref<256x72xbf16, #tpu.memory_space<vmem>>, vector<16x8xbf16>,
    %c0_567 = arith.constant 0 : index
    %c0_568 = arith.constant 0 : index
    %c217_569 = arith.constant 217 : index
    %c0_570 = arith.constant 0 : index
    %412 = vector.load %arg2[%c0_567, %c0_568, %c217_569, %c0_570] : memref<1x1x336x8xf32, #tpu.memory_space<vmem>>, vector<1x1x16x8xf32>
    %413 = vector.shape_cast %412 : vector<1x1x16x8xf32> to vector<16x8xf32>
    %414 = arith.truncf %413 : vector<16x8xf32> to vector<16x8xbf16>
    %c176_571 = arith.constant 176 : index
    %c32_572 = arith.constant 32 : index
    %415 = vector.load %arg6[%c176_571, %c32_572] : memref<256x72xbf16, #tpu.memory_space<vmem>>, vector<16x8xbf16>
    tpu.vector_store %arg6[%c176_571, %c32_572], %414 {strides = array<i32>} : memref<256x72xbf16, #tpu.memory_space<vmem>>, vector<16x8xbf16>,
    %c0_573 = arith.constant 0 : index
    %c0_574 = arith.constant 0 : index
    %c218_575 = arith.constant 218 : index
    %c0_576 = arith.constant 0 : index
    %416 = vector.load %arg2[%c0_573, %c0_574, %c218_575, %c0_576] : memref<1x1x336x8xf32, #tpu.memory_space<vmem>>, vector<1x1x16x8xf32>
    %417 = vector.shape_cast %416 : vector<1x1x16x8xf32> to vector<16x8xf32>
    %418 = arith.truncf %417 : vector<16x8xf32> to vector<16x8xbf16>
    %c176_577 = arith.constant 176 : index
    %c40_578 = arith.constant 40 : index
    %419 = vector.load %arg6[%c176_577, %c40_578] : memref<256x72xbf16, #tpu.memory_space<vmem>>, vector<16x8xbf16>
    tpu.vector_store %arg6[%c176_577, %c40_578], %418 {strides = array<i32>} : memref<256x72xbf16, #tpu.memory_space<vmem>>, vector<16x8xbf16>,
    %c0_579 = arith.constant 0 : index
    %c0_580 = arith.constant 0 : index
    %c234 = arith.constant 234 : index
    %c0_581 = arith.constant 0 : index
    %420 = vector.load %arg2[%c0_579, %c0_580, %c234, %c0_581] : memref<1x1x336x8xf32, #tpu.memory_space<vmem>>, vector<1x1x16x8xf32>
    %421 = vector.shape_cast %420 : vector<1x1x16x8xf32> to vector<16x8xf32>
    %422 = arith.truncf %421 : vector<16x8xf32> to vector<16x8xbf16>
    %c176_582 = arith.constant 176 : index
    %c48_583 = arith.constant 48 : index
    %423 = vector.load %arg6[%c176_582, %c48_583] : memref<256x72xbf16, #tpu.memory_space<vmem>>, vector<16x8xbf16>
    tpu.vector_store %arg6[%c176_582, %c48_583], %422 {strides = array<i32>} : memref<256x72xbf16, #tpu.memory_space<vmem>>, vector<16x8xbf16>,
    %c0_584 = arith.constant 0 : index
    %c0_585 = arith.constant 0 : index
    %c235 = arith.constant 235 : index
    %c0_586 = arith.constant 0 : index
    %424 = vector.load %arg2[%c0_584, %c0_585, %c235, %c0_586] : memref<1x1x336x8xf32, #tpu.memory_space<vmem>>, vector<1x1x16x8xf32>
    %425 = vector.shape_cast %424 : vector<1x1x16x8xf32> to vector<16x8xf32>
    %426 = arith.truncf %425 : vector<16x8xf32> to vector<16x8xbf16>
    %c176_587 = arith.constant 176 : index
    %c56_588 = arith.constant 56 : index
    %427 = vector.load %arg6[%c176_587, %c56_588] : memref<256x72xbf16, #tpu.memory_space<vmem>>, vector<16x8xbf16>
    tpu.vector_store %arg6[%c176_587, %c56_588], %426 {strides = array<i32>} : memref<256x72xbf16, #tpu.memory_space<vmem>>, vector<16x8xbf16>,
    %c0_589 = arith.constant 0 : index
    %c0_590 = arith.constant 0 : index
    %c236 = arith.constant 236 : index
    %c0_591 = arith.constant 0 : index
    %428 = vector.load %arg2[%c0_589, %c0_590, %c236, %c0_591] : memref<1x1x336x8xf32, #tpu.memory_space<vmem>>, vector<1x1x16x8xf32>
    %429 = vector.shape_cast %428 : vector<1x1x16x8xf32> to vector<16x8xf32>
    %430 = arith.truncf %429 : vector<16x8xf32> to vector<16x8xbf16>
    %c176_592 = arith.constant 176 : index
    %c64_593 = arith.constant 64 : index
    %431 = vector.load %arg6[%c176_592, %c64_593] : memref<256x72xbf16, #tpu.memory_space<vmem>>, vector<16x8xbf16>
    tpu.vector_store %arg6[%c176_592, %c64_593], %430 {strides = array<i32>} : memref<256x72xbf16, #tpu.memory_space<vmem>>, vector<16x8xbf16>,
    %c0_594 = arith.constant 0 : index
    %c0_595 = arith.constant 0 : index
    %c216_596 = arith.constant 216 : index
    %c0_597 = arith.constant 0 : index
    %432 = vector.load %arg2[%c0_594, %c0_595, %c216_596, %c0_597] : memref<1x1x336x8xf32, #tpu.memory_space<vmem>>, vector<1x1x16x8xf32>
    %433 = vector.shape_cast %432 : vector<1x1x16x8xf32> to vector<16x8xf32>
    %434 = arith.truncf %433 : vector<16x8xf32> to vector<16x8xbf16>
    %c192 = arith.constant 192 : index
    %c0_598 = arith.constant 0 : index
    %435 = vector.load %arg6[%c192, %c0_598] : memref<256x72xbf16, #tpu.memory_space<vmem>>, vector<16x8xbf16>
    tpu.vector_store %arg6[%c192, %c0_598], %434 {strides = array<i32>} : memref<256x72xbf16, #tpu.memory_space<vmem>>, vector<16x8xbf16>,
    %c0_599 = arith.constant 0 : index
    %c0_600 = arith.constant 0 : index
    %c217_601 = arith.constant 217 : index
    %c0_602 = arith.constant 0 : index
    %436 = vector.load %arg2[%c0_599, %c0_600, %c217_601, %c0_602] : memref<1x1x336x8xf32, #tpu.memory_space<vmem>>, vector<1x1x16x8xf32>
    %437 = vector.shape_cast %436 : vector<1x1x16x8xf32> to vector<16x8xf32>
    %438 = arith.truncf %437 : vector<16x8xf32> to vector<16x8xbf16>
    %c192_603 = arith.constant 192 : index
    %c8_604 = arith.constant 8 : index
    %439 = vector.load %arg6[%c192_603, %c8_604] : memref<256x72xbf16, #tpu.memory_space<vmem>>, vector<16x8xbf16>
    tpu.vector_store %arg6[%c192_603, %c8_604], %438 {strides = array<i32>} : memref<256x72xbf16, #tpu.memory_space<vmem>>, vector<16x8xbf16>,
    %c0_605 = arith.constant 0 : index
    %c0_606 = arith.constant 0 : index
    %c218_607 = arith.constant 218 : index
    %c0_608 = arith.constant 0 : index
    %440 = vector.load %arg2[%c0_605, %c0_606, %c218_607, %c0_608] : memref<1x1x336x8xf32, #tpu.memory_space<vmem>>, vector<1x1x16x8xf32>
    %441 = vector.shape_cast %440 : vector<1x1x16x8xf32> to vector<16x8xf32>
    %442 = arith.truncf %441 : vector<16x8xf32> to vector<16x8xbf16>
    %c192_609 = arith.constant 192 : index
    %c16_610 = arith.constant 16 : index
    %443 = vector.load %arg6[%c192_609, %c16_610] : memref<256x72xbf16, #tpu.memory_space<vmem>>, vector<16x8xbf16>
    tpu.vector_store %arg6[%c192_609, %c16_610], %442 {strides = array<i32>} : memref<256x72xbf16, #tpu.memory_space<vmem>>, vector<16x8xbf16>,
    %c0_611 = arith.constant 0 : index
    %c0_612 = arith.constant 0 : index
    %c234_613 = arith.constant 234 : index
    %c0_614 = arith.constant 0 : index
    %444 = vector.load %arg2[%c0_611, %c0_612, %c234_613, %c0_614] : memref<1x1x336x8xf32, #tpu.memory_space<vmem>>, vector<1x1x16x8xf32>
    %445 = vector.shape_cast %444 : vector<1x1x16x8xf32> to vector<16x8xf32>
    %446 = arith.truncf %445 : vector<16x8xf32> to vector<16x8xbf16>
    %c192_615 = arith.constant 192 : index
    %c24_616 = arith.constant 24 : index
    %447 = vector.load %arg6[%c192_615, %c24_616] : memref<256x72xbf16, #tpu.memory_space<vmem>>, vector<16x8xbf16>
    tpu.vector_store %arg6[%c192_615, %c24_616], %446 {strides = array<i32>} : memref<256x72xbf16, #tpu.memory_space<vmem>>, vector<16x8xbf16>,
    %c0_617 = arith.constant 0 : index
    %c0_618 = arith.constant 0 : index
    %c235_619 = arith.constant 235 : index
    %c0_620 = arith.constant 0 : index
    %448 = vector.load %arg2[%c0_617, %c0_618, %c235_619, %c0_620] : memref<1x1x336x8xf32, #tpu.memory_space<vmem>>, vector<1x1x16x8xf32>
    %449 = vector.shape_cast %448 : vector<1x1x16x8xf32> to vector<16x8xf32>
    %450 = arith.truncf %449 : vector<16x8xf32> to vector<16x8xbf16>
    %c192_621 = arith.constant 192 : index
    %c32_622 = arith.constant 32 : index
    %451 = vector.load %arg6[%c192_621, %c32_622] : memref<256x72xbf16, #tpu.memory_space<vmem>>, vector<16x8xbf16>
    tpu.vector_store %arg6[%c192_621, %c32_622], %450 {strides = array<i32>} : memref<256x72xbf16, #tpu.memory_space<vmem>>, vector<16x8xbf16>,
    %c0_623 = arith.constant 0 : index
    %c0_624 = arith.constant 0 : index
    %c236_625 = arith.constant 236 : index
    %c0_626 = arith.constant 0 : index
    %452 = vector.load %arg2[%c0_623, %c0_624, %c236_625, %c0_626] : memref<1x1x336x8xf32, #tpu.memory_space<vmem>>, vector<1x1x16x8xf32>
    %453 = vector.shape_cast %452 : vector<1x1x16x8xf32> to vector<16x8xf32>
    %454 = arith.truncf %453 : vector<16x8xf32> to vector<16x8xbf16>
    %c192_627 = arith.constant 192 : index
    %c40_628 = arith.constant 40 : index
    %455 = vector.load %arg6[%c192_627, %c40_628] : memref<256x72xbf16, #tpu.memory_space<vmem>>, vector<16x8xbf16>
    tpu.vector_store %arg6[%c192_627, %c40_628], %454 {strides = array<i32>} : memref<256x72xbf16, #tpu.memory_space<vmem>>, vector<16x8xbf16>,
    %c0_629 = arith.constant 0 : index
    %c0_630 = arith.constant 0 : index
    %c252 = arith.constant 252 : index
    %c0_631 = arith.constant 0 : index
    %456 = vector.load %arg2[%c0_629, %c0_630, %c252, %c0_631] : memref<1x1x336x8xf32, #tpu.memory_space<vmem>>, vector<1x1x16x8xf32>
    %457 = vector.shape_cast %456 : vector<1x1x16x8xf32> to vector<16x8xf32>
    %458 = arith.truncf %457 : vector<16x8xf32> to vector<16x8xbf16>
    %c192_632 = arith.constant 192 : index
    %c48_633 = arith.constant 48 : index
    %459 = vector.load %arg6[%c192_632, %c48_633] : memref<256x72xbf16, #tpu.memory_space<vmem>>, vector<16x8xbf16>
    tpu.vector_store %arg6[%c192_632, %c48_633], %458 {strides = array<i32>} : memref<256x72xbf16, #tpu.memory_space<vmem>>, vector<16x8xbf16>,
    %c0_634 = arith.constant 0 : index
    %c0_635 = arith.constant 0 : index
    %c253 = arith.constant 253 : index
    %c0_636 = arith.constant 0 : index
    %460 = vector.load %arg2[%c0_634, %c0_635, %c253, %c0_636] : memref<1x1x336x8xf32, #tpu.memory_space<vmem>>, vector<1x1x16x8xf32>
    %461 = vector.shape_cast %460 : vector<1x1x16x8xf32> to vector<16x8xf32>
    %462 = arith.truncf %461 : vector<16x8xf32> to vector<16x8xbf16>
    %c192_637 = arith.constant 192 : index
    %c56_638 = arith.constant 56 : index
    %463 = vector.load %arg6[%c192_637, %c56_638] : memref<256x72xbf16, #tpu.memory_space<vmem>>, vector<16x8xbf16>
    tpu.vector_store %arg6[%c192_637, %c56_638], %462 {strides = array<i32>} : memref<256x72xbf16, #tpu.memory_space<vmem>>, vector<16x8xbf16>,
    %c0_639 = arith.constant 0 : index
    %c0_640 = arith.constant 0 : index
    %c254 = arith.constant 254 : index
    %c0_641 = arith.constant 0 : index
    %464 = vector.load %arg2[%c0_639, %c0_640, %c254, %c0_641] : memref<1x1x336x8xf32, #tpu.memory_space<vmem>>, vector<1x1x16x8xf32>
    %465 = vector.shape_cast %464 : vector<1x1x16x8xf32> to vector<16x8xf32>
    %466 = arith.truncf %465 : vector<16x8xf32> to vector<16x8xbf16>
    %c192_642 = arith.constant 192 : index
    %c64_643 = arith.constant 64 : index
    %467 = vector.load %arg6[%c192_642, %c64_643] : memref<256x72xbf16, #tpu.memory_space<vmem>>, vector<16x8xbf16>
    tpu.vector_store %arg6[%c192_642, %c64_643], %466 {strides = array<i32>} : memref<256x72xbf16, #tpu.memory_space<vmem>>, vector<16x8xbf16>,
    %c0_644 = arith.constant 0 : index
    %c0_645 = arith.constant 0 : index
    %c234_646 = arith.constant 234 : index
    %c0_647 = arith.constant 0 : index
    %468 = vector.load %arg2[%c0_644, %c0_645, %c234_646, %c0_647] : memref<1x1x336x8xf32, #tpu.memory_space<vmem>>, vector<1x1x16x8xf32>
    %469 = vector.shape_cast %468 : vector<1x1x16x8xf32> to vector<16x8xf32>
    %470 = arith.truncf %469 : vector<16x8xf32> to vector<16x8xbf16>
    %c208 = arith.constant 208 : index
    %c0_648 = arith.constant 0 : index
    %471 = vector.load %arg6[%c208, %c0_648] : memref<256x72xbf16, #tpu.memory_space<vmem>>, vector<16x8xbf16>
    tpu.vector_store %arg6[%c208, %c0_648], %470 {strides = array<i32>} : memref<256x72xbf16, #tpu.memory_space<vmem>>, vector<16x8xbf16>,
    %c0_649 = arith.constant 0 : index
    %c0_650 = arith.constant 0 : index
    %c235_651 = arith.constant 235 : index
    %c0_652 = arith.constant 0 : index
    %472 = vector.load %arg2[%c0_649, %c0_650, %c235_651, %c0_652] : memref<1x1x336x8xf32, #tpu.memory_space<vmem>>, vector<1x1x16x8xf32>
    %473 = vector.shape_cast %472 : vector<1x1x16x8xf32> to vector<16x8xf32>
    %474 = arith.truncf %473 : vector<16x8xf32> to vector<16x8xbf16>
    %c208_653 = arith.constant 208 : index
    %c8_654 = arith.constant 8 : index
    %475 = vector.load %arg6[%c208_653, %c8_654] : memref<256x72xbf16, #tpu.memory_space<vmem>>, vector<16x8xbf16>
    tpu.vector_store %arg6[%c208_653, %c8_654], %474 {strides = array<i32>} : memref<256x72xbf16, #tpu.memory_space<vmem>>, vector<16x8xbf16>,
    %c0_655 = arith.constant 0 : index
    %c0_656 = arith.constant 0 : index
    %c236_657 = arith.constant 236 : index
    %c0_658 = arith.constant 0 : index
    %476 = vector.load %arg2[%c0_655, %c0_656, %c236_657, %c0_658] : memref<1x1x336x8xf32, #tpu.memory_space<vmem>>, vector<1x1x16x8xf32>
    %477 = vector.shape_cast %476 : vector<1x1x16x8xf32> to vector<16x8xf32>
    %478 = arith.truncf %477 : vector<16x8xf32> to vector<16x8xbf16>
    %c208_659 = arith.constant 208 : index
    %c16_660 = arith.constant 16 : index
    %479 = vector.load %arg6[%c208_659, %c16_660] : memref<256x72xbf16, #tpu.memory_space<vmem>>, vector<16x8xbf16>
    tpu.vector_store %arg6[%c208_659, %c16_660], %478 {strides = array<i32>} : memref<256x72xbf16, #tpu.memory_space<vmem>>, vector<16x8xbf16>,
    %c0_661 = arith.constant 0 : index
    %c0_662 = arith.constant 0 : index
    %c252_663 = arith.constant 252 : index
    %c0_664 = arith.constant 0 : index
    %480 = vector.load %arg2[%c0_661, %c0_662, %c252_663, %c0_664] : memref<1x1x336x8xf32, #tpu.memory_space<vmem>>, vector<1x1x16x8xf32>
    %481 = vector.shape_cast %480 : vector<1x1x16x8xf32> to vector<16x8xf32>
    %482 = arith.truncf %481 : vector<16x8xf32> to vector<16x8xbf16>
    %c208_665 = arith.constant 208 : index
    %c24_666 = arith.constant 24 : index
    %483 = vector.load %arg6[%c208_665, %c24_666] : memref<256x72xbf16, #tpu.memory_space<vmem>>, vector<16x8xbf16>
    tpu.vector_store %arg6[%c208_665, %c24_666], %482 {strides = array<i32>} : memref<256x72xbf16, #tpu.memory_space<vmem>>, vector<16x8xbf16>,
    %c0_667 = arith.constant 0 : index
    %c0_668 = arith.constant 0 : index
    %c253_669 = arith.constant 253 : index
    %c0_670 = arith.constant 0 : index
    %484 = vector.load %arg2[%c0_667, %c0_668, %c253_669, %c0_670] : memref<1x1x336x8xf32, #tpu.memory_space<vmem>>, vector<1x1x16x8xf32>
    %485 = vector.shape_cast %484 : vector<1x1x16x8xf32> to vector<16x8xf32>
    %486 = arith.truncf %485 : vector<16x8xf32> to vector<16x8xbf16>
    %c208_671 = arith.constant 208 : index
    %c32_672 = arith.constant 32 : index
    %487 = vector.load %arg6[%c208_671, %c32_672] : memref<256x72xbf16, #tpu.memory_space<vmem>>, vector<16x8xbf16>
    tpu.vector_store %arg6[%c208_671, %c32_672], %486 {strides = array<i32>} : memref<256x72xbf16, #tpu.memory_space<vmem>>, vector<16x8xbf16>,
    %c0_673 = arith.constant 0 : index
    %c0_674 = arith.constant 0 : index
    %c254_675 = arith.constant 254 : index
    %c0_676 = arith.constant 0 : index
    %488 = vector.load %arg2[%c0_673, %c0_674, %c254_675, %c0_676] : memref<1x1x336x8xf32, #tpu.memory_space<vmem>>, vector<1x1x16x8xf32>
    %489 = vector.shape_cast %488 : vector<1x1x16x8xf32> to vector<16x8xf32>
    %490 = arith.truncf %489 : vector<16x8xf32> to vector<16x8xbf16>
    %c208_677 = arith.constant 208 : index
    %c40_678 = arith.constant 40 : index
    %491 = vector.load %arg6[%c208_677, %c40_678] : memref<256x72xbf16, #tpu.memory_space<vmem>>, vector<16x8xbf16>
    tpu.vector_store %arg6[%c208_677, %c40_678], %490 {strides = array<i32>} : memref<256x72xbf16, #tpu.memory_space<vmem>>, vector<16x8xbf16>,
    %c0_679 = arith.constant 0 : index
    %c0_680 = arith.constant 0 : index
    %c270 = arith.constant 270 : index
    %c0_681 = arith.constant 0 : index
    %492 = vector.load %arg2[%c0_679, %c0_680, %c270, %c0_681] : memref<1x1x336x8xf32, #tpu.memory_space<vmem>>, vector<1x1x16x8xf32>
    %493 = vector.shape_cast %492 : vector<1x1x16x8xf32> to vector<16x8xf32>
    %494 = arith.truncf %493 : vector<16x8xf32> to vector<16x8xbf16>
    %c208_682 = arith.constant 208 : index
    %c48_683 = arith.constant 48 : index
    %495 = vector.load %arg6[%c208_682, %c48_683] : memref<256x72xbf16, #tpu.memory_space<vmem>>, vector<16x8xbf16>
    tpu.vector_store %arg6[%c208_682, %c48_683], %494 {strides = array<i32>} : memref<256x72xbf16, #tpu.memory_space<vmem>>, vector<16x8xbf16>,
    %c0_684 = arith.constant 0 : index
    %c0_685 = arith.constant 0 : index
    %c271 = arith.constant 271 : index
    %c0_686 = arith.constant 0 : index
    %496 = vector.load %arg2[%c0_684, %c0_685, %c271, %c0_686] : memref<1x1x336x8xf32, #tpu.memory_space<vmem>>, vector<1x1x16x8xf32>
    %497 = vector.shape_cast %496 : vector<1x1x16x8xf32> to vector<16x8xf32>
    %498 = arith.truncf %497 : vector<16x8xf32> to vector<16x8xbf16>
    %c208_687 = arith.constant 208 : index
    %c56_688 = arith.constant 56 : index
    %499 = vector.load %arg6[%c208_687, %c56_688] : memref<256x72xbf16, #tpu.memory_space<vmem>>, vector<16x8xbf16>
    tpu.vector_store %arg6[%c208_687, %c56_688], %498 {strides = array<i32>} : memref<256x72xbf16, #tpu.memory_space<vmem>>, vector<16x8xbf16>,
    %c0_689 = arith.constant 0 : index
    %c0_690 = arith.constant 0 : index
    %c272 = arith.constant 272 : index
    %c0_691 = arith.constant 0 : index
    %500 = vector.load %arg2[%c0_689, %c0_690, %c272, %c0_691] : memref<1x1x336x8xf32, #tpu.memory_space<vmem>>, vector<1x1x16x8xf32>
    %501 = vector.shape_cast %500 : vector<1x1x16x8xf32> to vector<16x8xf32>
    %502 = arith.truncf %501 : vector<16x8xf32> to vector<16x8xbf16>
    %c208_692 = arith.constant 208 : index
    %c64_693 = arith.constant 64 : index
    %503 = vector.load %arg6[%c208_692, %c64_693] : memref<256x72xbf16, #tpu.memory_space<vmem>>, vector<16x8xbf16>
    tpu.vector_store %arg6[%c208_692, %c64_693], %502 {strides = array<i32>} : memref<256x72xbf16, #tpu.memory_space<vmem>>, vector<16x8xbf16>,
    %c0_694 = arith.constant 0 : index
    %c0_695 = arith.constant 0 : index
    %c252_696 = arith.constant 252 : index
    %c0_697 = arith.constant 0 : index
    %504 = vector.load %arg2[%c0_694, %c0_695, %c252_696, %c0_697] : memref<1x1x336x8xf32, #tpu.memory_space<vmem>>, vector<1x1x16x8xf32>
    %505 = vector.shape_cast %504 : vector<1x1x16x8xf32> to vector<16x8xf32>
    %506 = arith.truncf %505 : vector<16x8xf32> to vector<16x8xbf16>
    %c224 = arith.constant 224 : index
    %c0_698 = arith.constant 0 : index
    %507 = vector.load %arg6[%c224, %c0_698] : memref<256x72xbf16, #tpu.memory_space<vmem>>, vector<16x8xbf16>
    tpu.vector_store %arg6[%c224, %c0_698], %506 {strides = array<i32>} : memref<256x72xbf16, #tpu.memory_space<vmem>>, vector<16x8xbf16>,
    %c0_699 = arith.constant 0 : index
    %c0_700 = arith.constant 0 : index
    %c253_701 = arith.constant 253 : index
    %c0_702 = arith.constant 0 : index
    %508 = vector.load %arg2[%c0_699, %c0_700, %c253_701, %c0_702] : memref<1x1x336x8xf32, #tpu.memory_space<vmem>>, vector<1x1x16x8xf32>
    %509 = vector.shape_cast %508 : vector<1x1x16x8xf32> to vector<16x8xf32>
    %510 = arith.truncf %509 : vector<16x8xf32> to vector<16x8xbf16>
    %c224_703 = arith.constant 224 : index
    %c8_704 = arith.constant 8 : index
    %511 = vector.load %arg6[%c224_703, %c8_704] : memref<256x72xbf16, #tpu.memory_space<vmem>>, vector<16x8xbf16>
    tpu.vector_store %arg6[%c224_703, %c8_704], %510 {strides = array<i32>} : memref<256x72xbf16, #tpu.memory_space<vmem>>, vector<16x8xbf16>,
    %c0_705 = arith.constant 0 : index
    %c0_706 = arith.constant 0 : index
    %c254_707 = arith.constant 254 : index
    %c0_708 = arith.constant 0 : index
    %512 = vector.load %arg2[%c0_705, %c0_706, %c254_707, %c0_708] : memref<1x1x336x8xf32, #tpu.memory_space<vmem>>, vector<1x1x16x8xf32>
    %513 = vector.shape_cast %512 : vector<1x1x16x8xf32> to vector<16x8xf32>
    %514 = arith.truncf %513 : vector<16x8xf32> to vector<16x8xbf16>
    %c224_709 = arith.constant 224 : index
    %c16_710 = arith.constant 16 : index
    %515 = vector.load %arg6[%c224_709, %c16_710] : memref<256x72xbf16, #tpu.memory_space<vmem>>, vector<16x8xbf16>
    tpu.vector_store %arg6[%c224_709, %c16_710], %514 {strides = array<i32>} : memref<256x72xbf16, #tpu.memory_space<vmem>>, vector<16x8xbf16>,
    %c0_711 = arith.constant 0 : index
    %c0_712 = arith.constant 0 : index
    %c270_713 = arith.constant 270 : index
    %c0_714 = arith.constant 0 : index
    %516 = vector.load %arg2[%c0_711, %c0_712, %c270_713, %c0_714] : memref<1x1x336x8xf32, #tpu.memory_space<vmem>>, vector<1x1x16x8xf32>
    %517 = vector.shape_cast %516 : vector<1x1x16x8xf32> to vector<16x8xf32>
    %518 = arith.truncf %517 : vector<16x8xf32> to vector<16x8xbf16>
    %c224_715 = arith.constant 224 : index
    %c24_716 = arith.constant 24 : index
    %519 = vector.load %arg6[%c224_715, %c24_716] : memref<256x72xbf16, #tpu.memory_space<vmem>>, vector<16x8xbf16>
    tpu.vector_store %arg6[%c224_715, %c24_716], %518 {strides = array<i32>} : memref<256x72xbf16, #tpu.memory_space<vmem>>, vector<16x8xbf16>,
    %c0_717 = arith.constant 0 : index
    %c0_718 = arith.constant 0 : index
    %c271_719 = arith.constant 271 : index
    %c0_720 = arith.constant 0 : index
    %520 = vector.load %arg2[%c0_717, %c0_718, %c271_719, %c0_720] : memref<1x1x336x8xf32, #tpu.memory_space<vmem>>, vector<1x1x16x8xf32>
    %521 = vector.shape_cast %520 : vector<1x1x16x8xf32> to vector<16x8xf32>
    %522 = arith.truncf %521 : vector<16x8xf32> to vector<16x8xbf16>
    %c224_721 = arith.constant 224 : index
    %c32_722 = arith.constant 32 : index
    %523 = vector.load %arg6[%c224_721, %c32_722] : memref<256x72xbf16, #tpu.memory_space<vmem>>, vector<16x8xbf16>
    tpu.vector_store %arg6[%c224_721, %c32_722], %522 {strides = array<i32>} : memref<256x72xbf16, #tpu.memory_space<vmem>>, vector<16x8xbf16>,
    %c0_723 = arith.constant 0 : index
    %c0_724 = arith.constant 0 : index
    %c272_725 = arith.constant 272 : index
    %c0_726 = arith.constant 0 : index
    %524 = vector.load %arg2[%c0_723, %c0_724, %c272_725, %c0_726] : memref<1x1x336x8xf32, #tpu.memory_space<vmem>>, vector<1x1x16x8xf32>
    %525 = vector.shape_cast %524 : vector<1x1x16x8xf32> to vector<16x8xf32>
    %526 = arith.truncf %525 : vector<16x8xf32> to vector<16x8xbf16>
    %c224_727 = arith.constant 224 : index
    %c40_728 = arith.constant 40 : index
    %527 = vector.load %arg6[%c224_727, %c40_728] : memref<256x72xbf16, #tpu.memory_space<vmem>>, vector<16x8xbf16>
    tpu.vector_store %arg6[%c224_727, %c40_728], %526 {strides = array<i32>} : memref<256x72xbf16, #tpu.memory_space<vmem>>, vector<16x8xbf16>,
    %c0_729 = arith.constant 0 : index
    %c0_730 = arith.constant 0 : index
    %c288 = arith.constant 288 : index
    %c0_731 = arith.constant 0 : index
    %528 = vector.load %arg2[%c0_729, %c0_730, %c288, %c0_731] : memref<1x1x336x8xf32, #tpu.memory_space<vmem>>, vector<1x1x16x8xf32>
    %529 = vector.shape_cast %528 : vector<1x1x16x8xf32> to vector<16x8xf32>
    %530 = arith.truncf %529 : vector<16x8xf32> to vector<16x8xbf16>
    %c224_732 = arith.constant 224 : index
    %c48_733 = arith.constant 48 : index
    %531 = vector.load %arg6[%c224_732, %c48_733] : memref<256x72xbf16, #tpu.memory_space<vmem>>, vector<16x8xbf16>
    tpu.vector_store %arg6[%c224_732, %c48_733], %530 {strides = array<i32>} : memref<256x72xbf16, #tpu.memory_space<vmem>>, vector<16x8xbf16>,
    %c0_734 = arith.constant 0 : index
    %c0_735 = arith.constant 0 : index
    %c289 = arith.constant 289 : index
    %c0_736 = arith.constant 0 : index
    %532 = vector.load %arg2[%c0_734, %c0_735, %c289, %c0_736] : memref<1x1x336x8xf32, #tpu.memory_space<vmem>>, vector<1x1x16x8xf32>
    %533 = vector.shape_cast %532 : vector<1x1x16x8xf32> to vector<16x8xf32>
    %534 = arith.truncf %533 : vector<16x8xf32> to vector<16x8xbf16>
    %c224_737 = arith.constant 224 : index
    %c56_738 = arith.constant 56 : index
    %535 = vector.load %arg6[%c224_737, %c56_738] : memref<256x72xbf16, #tpu.memory_space<vmem>>, vector<16x8xbf16>
    tpu.vector_store %arg6[%c224_737, %c56_738], %534 {strides = array<i32>} : memref<256x72xbf16, #tpu.memory_space<vmem>>, vector<16x8xbf16>,
    %c0_739 = arith.constant 0 : index
    %c0_740 = arith.constant 0 : index
    %c290 = arith.constant 290 : index
    %c0_741 = arith.constant 0 : index
    %536 = vector.load %arg2[%c0_739, %c0_740, %c290, %c0_741] : memref<1x1x336x8xf32, #tpu.memory_space<vmem>>, vector<1x1x16x8xf32>
    %537 = vector.shape_cast %536 : vector<1x1x16x8xf32> to vector<16x8xf32>
    %538 = arith.truncf %537 : vector<16x8xf32> to vector<16x8xbf16>
    %c224_742 = arith.constant 224 : index
    %c64_743 = arith.constant 64 : index
    %539 = vector.load %arg6[%c224_742, %c64_743] : memref<256x72xbf16, #tpu.memory_space<vmem>>, vector<16x8xbf16>
    tpu.vector_store %arg6[%c224_742, %c64_743], %538 {strides = array<i32>} : memref<256x72xbf16, #tpu.memory_space<vmem>>, vector<16x8xbf16>,
    %c0_744 = arith.constant 0 : index
    %c0_745 = arith.constant 0 : index
    %c270_746 = arith.constant 270 : index
    %c0_747 = arith.constant 0 : index
    %540 = vector.load %arg2[%c0_744, %c0_745, %c270_746, %c0_747] : memref<1x1x336x8xf32, #tpu.memory_space<vmem>>, vector<1x1x16x8xf32>
    %541 = vector.shape_cast %540 : vector<1x1x16x8xf32> to vector<16x8xf32>
    %542 = arith.truncf %541 : vector<16x8xf32> to vector<16x8xbf16>
    %c240 = arith.constant 240 : index
    %c0_748 = arith.constant 0 : index
    %543 = vector.load %arg6[%c240, %c0_748] : memref<256x72xbf16, #tpu.memory_space<vmem>>, vector<16x8xbf16>
    tpu.vector_store %arg6[%c240, %c0_748], %542 {strides = array<i32>} : memref<256x72xbf16, #tpu.memory_space<vmem>>, vector<16x8xbf16>,
    %c0_749 = arith.constant 0 : index
    %c0_750 = arith.constant 0 : index
    %c271_751 = arith.constant 271 : index
    %c0_752 = arith.constant 0 : index
    %544 = vector.load %arg2[%c0_749, %c0_750, %c271_751, %c0_752] : memref<1x1x336x8xf32, #tpu.memory_space<vmem>>, vector<1x1x16x8xf32>
    %545 = vector.shape_cast %544 : vector<1x1x16x8xf32> to vector<16x8xf32>
    %546 = arith.truncf %545 : vector<16x8xf32> to vector<16x8xbf16>
    %c240_753 = arith.constant 240 : index
    %c8_754 = arith.constant 8 : index
    %547 = vector.load %arg6[%c240_753, %c8_754] : memref<256x72xbf16, #tpu.memory_space<vmem>>, vector<16x8xbf16>
    tpu.vector_store %arg6[%c240_753, %c8_754], %546 {strides = array<i32>} : memref<256x72xbf16, #tpu.memory_space<vmem>>, vector<16x8xbf16>,
    %c0_755 = arith.constant 0 : index
    %c0_756 = arith.constant 0 : index
    %c272_757 = arith.constant 272 : index
    %c0_758 = arith.constant 0 : index
    %548 = vector.load %arg2[%c0_755, %c0_756, %c272_757, %c0_758] : memref<1x1x336x8xf32, #tpu.memory_space<vmem>>, vector<1x1x16x8xf32>
    %549 = vector.shape_cast %548 : vector<1x1x16x8xf32> to vector<16x8xf32>
    %550 = arith.truncf %549 : vector<16x8xf32> to vector<16x8xbf16>
    %c240_759 = arith.constant 240 : index
    %c16_760 = arith.constant 16 : index
    %551 = vector.load %arg6[%c240_759, %c16_760] : memref<256x72xbf16, #tpu.memory_space<vmem>>, vector<16x8xbf16>
    tpu.vector_store %arg6[%c240_759, %c16_760], %550 {strides = array<i32>} : memref<256x72xbf16, #tpu.memory_space<vmem>>, vector<16x8xbf16>,
    %c0_761 = arith.constant 0 : index
    %c0_762 = arith.constant 0 : index
    %c288_763 = arith.constant 288 : index
    %c0_764 = arith.constant 0 : index
    %552 = vector.load %arg2[%c0_761, %c0_762, %c288_763, %c0_764] : memref<1x1x336x8xf32, #tpu.memory_space<vmem>>, vector<1x1x16x8xf32>
    %553 = vector.shape_cast %552 : vector<1x1x16x8xf32> to vector<16x8xf32>
    %554 = arith.truncf %553 : vector<16x8xf32> to vector<16x8xbf16>
    %c240_765 = arith.constant 240 : index
    %c24_766 = arith.constant 24 : index
    %555 = vector.load %arg6[%c240_765, %c24_766] : memref<256x72xbf16, #tpu.memory_space<vmem>>, vector<16x8xbf16>
    tpu.vector_store %arg6[%c240_765, %c24_766], %554 {strides = array<i32>} : memref<256x72xbf16, #tpu.memory_space<vmem>>, vector<16x8xbf16>,
    %c0_767 = arith.constant 0 : index
    %c0_768 = arith.constant 0 : index
    %c289_769 = arith.constant 289 : index
    %c0_770 = arith.constant 0 : index
    %556 = vector.load %arg2[%c0_767, %c0_768, %c289_769, %c0_770] : memref<1x1x336x8xf32, #tpu.memory_space<vmem>>, vector<1x1x16x8xf32>
    %557 = vector.shape_cast %556 : vector<1x1x16x8xf32> to vector<16x8xf32>
    %558 = arith.truncf %557 : vector<16x8xf32> to vector<16x8xbf16>
    %c240_771 = arith.constant 240 : index
    %c32_772 = arith.constant 32 : index
    %559 = vector.load %arg6[%c240_771, %c32_772] : memref<256x72xbf16, #tpu.memory_space<vmem>>, vector<16x8xbf16>
    tpu.vector_store %arg6[%c240_771, %c32_772], %558 {strides = array<i32>} : memref<256x72xbf16, #tpu.memory_space<vmem>>, vector<16x8xbf16>,
    %c0_773 = arith.constant 0 : index
    %c0_774 = arith.constant 0 : index
    %c290_775 = arith.constant 290 : index
    %c0_776 = arith.constant 0 : index
    %560 = vector.load %arg2[%c0_773, %c0_774, %c290_775, %c0_776] : memref<1x1x336x8xf32, #tpu.memory_space<vmem>>, vector<1x1x16x8xf32>
    %561 = vector.shape_cast %560 : vector<1x1x16x8xf32> to vector<16x8xf32>
    %562 = arith.truncf %561 : vector<16x8xf32> to vector<16x8xbf16>
    %c240_777 = arith.constant 240 : index
    %c40_778 = arith.constant 40 : index
    %563 = vector.load %arg6[%c240_777, %c40_778] : memref<256x72xbf16, #tpu.memory_space<vmem>>, vector<16x8xbf16>
    tpu.vector_store %arg6[%c240_777, %c40_778], %562 {strides = array<i32>} : memref<256x72xbf16, #tpu.memory_space<vmem>>, vector<16x8xbf16>,
    %c0_779 = arith.constant 0 : index
    %c0_780 = arith.constant 0 : index
    %c306 = arith.constant 306 : index
    %c0_781 = arith.constant 0 : index
    %564 = vector.load %arg2[%c0_779, %c0_780, %c306, %c0_781] : memref<1x1x336x8xf32, #tpu.memory_space<vmem>>, vector<1x1x16x8xf32>
    %565 = vector.shape_cast %564 : vector<1x1x16x8xf32> to vector<16x8xf32>
    %566 = arith.truncf %565 : vector<16x8xf32> to vector<16x8xbf16>
    %c240_782 = arith.constant 240 : index
    %c48_783 = arith.constant 48 : index
    %567 = vector.load %arg6[%c240_782, %c48_783] : memref<256x72xbf16, #tpu.memory_space<vmem>>, vector<16x8xbf16>
    tpu.vector_store %arg6[%c240_782, %c48_783], %566 {strides = array<i32>} : memref<256x72xbf16, #tpu.memory_space<vmem>>, vector<16x8xbf16>,
    %c0_784 = arith.constant 0 : index
    %c0_785 = arith.constant 0 : index
    %c307 = arith.constant 307 : index
    %c0_786 = arith.constant 0 : index
    %568 = vector.load %arg2[%c0_784, %c0_785, %c307, %c0_786] : memref<1x1x336x8xf32, #tpu.memory_space<vmem>>, vector<1x1x16x8xf32>
    %569 = vector.shape_cast %568 : vector<1x1x16x8xf32> to vector<16x8xf32>
    %570 = arith.truncf %569 : vector<16x8xf32> to vector<16x8xbf16>
    %c240_787 = arith.constant 240 : index
    %c56_788 = arith.constant 56 : index
    %571 = vector.load %arg6[%c240_787, %c56_788] : memref<256x72xbf16, #tpu.memory_space<vmem>>, vector<16x8xbf16>
    tpu.vector_store %arg6[%c240_787, %c56_788], %570 {strides = array<i32>} : memref<256x72xbf16, #tpu.memory_space<vmem>>, vector<16x8xbf16>,
    %c0_789 = arith.constant 0 : index
    %c0_790 = arith.constant 0 : index
    %c308 = arith.constant 308 : index
    %c0_791 = arith.constant 0 : index
    %572 = vector.load %arg2[%c0_789, %c0_790, %c308, %c0_791] : memref<1x1x336x8xf32, #tpu.memory_space<vmem>>, vector<1x1x16x8xf32>
    %573 = vector.shape_cast %572 : vector<1x1x16x8xf32> to vector<16x8xf32>
    %574 = arith.truncf %573 : vector<16x8xf32> to vector<16x8xbf16>
    %c240_792 = arith.constant 240 : index
    %c64_793 = arith.constant 64 : index
    %575 = vector.load %arg6[%c240_792, %c64_793] : memref<256x72xbf16, #tpu.memory_space<vmem>>, vector<16x8xbf16>
    tpu.vector_store %arg6[%c240_792, %c64_793], %574 {strides = array<i32>} : memref<256x72xbf16, #tpu.memory_space<vmem>>, vector<16x8xbf16>,
    %c0_794 = arith.constant 0 : index
    %c0_795 = arith.constant 0 : index
    %576 = vector.load %arg6[%c0_794, %c0_795] : memref<256x72xbf16, #tpu.memory_space<vmem>>, vector<256x72xbf16>
    %c0_796 = arith.constant 0 : index
    %c0_797 = arith.constant 0 : index
    %577 = vector.load %arg3[%c0_796, %c0_797] : memref<72x128xbf16, #tpu.memory_space<vmem>>, vector<72x128xbf16>
    %cst = arith.constant dense<0.000000e+00> : vector<256x128xf32>
    %578 = tpu.matmul %576, %577, %cst {dimension_numbers = #tpu.dot_dimension_numbers<[1], [0], [0], [1], [0, 0, 1, 1], [], []>} : vector<256x72xbf16>, vector<72x128xbf16>, vector<256x128xf32> -> vector<256x128xf32>
    %c0_798 = arith.constant 0 : index
    %c0_799 = arith.constant 0 : index
    %579 = vector.load %arg4[%c0_798, %c0_799] : memref<1x128xf32, #tpu.memory_space<vmem>>, vector<1x128xf32>
    %580 = vector.broadcast %579 : vector<1x128xf32> to vector<256x128xf32>
    %581 = arith.addf %578, %580 : vector<256x128xf32>
    %cst_800 = arith.constant 0.000000e+00 : f32
    %582 = vector.broadcast %cst_800 : f32 to vector<256x128xf32>
    %583 = arith.maximumf %581, %582 : vector<256x128xf32>
    %584 = arith.truncf %583 : vector<256x128xf32> to vector<256x128xbf16>
    %c0_801 = arith.constant 0 : index
    %c0_802 = arith.constant 0 : index
    %c0_803 = arith.constant 0 : index
    %585 = vector.load %arg5[%c0_801, %c0_802, %c0_803] : memref<1x256x128xbf16, #tpu.memory_space<vmem>>, vector<1x256x128xbf16>
    %586 = vector.shape_cast %585 : vector<1x256x128xbf16> to vector<256x128xbf16>
    %587 = vector.shape_cast %584 : vector<256x128xbf16> to vector<1x256x128xbf16>
    tpu.vector_store %arg5[%c0_801, %c0_802, %c0_803], %587 {strides = array<i32>} : memref<1x256x128xbf16, #tpu.memory_space<vmem>>, vector<1x256x128xbf16>,
    return
  }
  func.func @transform_0(%arg0: i32, %arg1: i32) -> (i32, i32, i32, i32) {
    %c0_i32 = arith.constant 0 : i32
    %c0_i32_0 = arith.constant 0 : i32
    %c0_i32_1 = arith.constant 0 : i32
    return %arg0, %arg1, %c0_i32, %c0_i32_0 : i32, i32, i32, i32
  }
  func.func @transform_1(%arg0: i32, %arg1: i32) -> (i32, i32) {
    %c0_i32 = arith.constant 0 : i32
    %c0_i32_0 = arith.constant 0 : i32
    %c0_i32_1 = arith.constant 0 : i32
    return %c0_i32, %c0_i32_0 : i32, i32
  }
  func.func @transform_2(%arg0: i32, %arg1: i32) -> (i32, i32) {
    %c0_i32 = arith.constant 0 : i32
    %c0_i32_0 = arith.constant 0 : i32
    %c0_i32_1 = arith.constant 0 : i32
    return %c0_i32, %c0_i32_0 : i32, i32
  }
  func.func @transform_3(%arg0: i32, %arg1: i32) -> (i32, i32, i32) {
    %c0_i32 = arith.constant 0 : i32
    %c0_i32_0 = arith.constant 0 : i32
    return %arg0, %arg1, %c0_i32 : i32, i32, i32
  }
}

</mosaic_0001>

<bundles_post_ra>
// kernel: simconv_forward.1
= control target key start
LH: loop header
LB: loop body
LE: loop exit
PB: predicated region body
PF: predicated region fallthrough
CT: control target
= control target key end

     0   :  { %s2218_s12 = smov 0   ;;  %s2220_s13 = smov 0   ;;  %s2897_s0 = inlined_call_operand.vmem [shape: f32[2,1,336,8], index: 0, kind: input, shape index: {}]   ;;  %s2898_s1 = inlined_call_operand.vmem [shape: bf16[72,128], index: 1, kind: input, shape index: {}]   ;;  %s2899_s2 = inlined_call_operand.vmem [shape: f32[1,128], index: 2, kind: input, shape index: {}]   ;;  %s2900_s3 = inlined_call_operand.vmem [shape: bf16[2,256,128], index: 3, kind: output, shape index: {}]  }
   0x1   :  { %s2222_s14 = smov 0  }
   0x2 LB: > { %s25_s15 = sadd.s32 1, %s2184_s13  ;;  %p1865_p0 = scmp.ge.s32.totalorder %s2188_s14, 1  ;;  %s2188_s14 = sphi %s2222_s14, %s13_s14   ;;  %s2184_s13 = sphi %s2220_s13, %s2902_s13   ;;  %s2180_s12 = sphi %s2218_s12, %s2901_s12  }
   0x3   : > { %p27_p1 = scmp.ge.s32.totalorder %s25_s15, 2  ;;  %p157_p2 = scmp.lt.s32.totalorder %s2188_s14, 3 }
   0x5   : > { %s2904_s15 = smov (%p27_p1, %s25_s15), 0  ;;  %p158_p3 = pnand %p1865_p0, %p157_p2 }
   0x6   : > { %p189_p4 = scmp.lt.s32.totalorder (!%p158_p3), %s2180_s12, 1  ;;  %s2190_s20 = smov (!%p158_p3), 16   ;;  %vm212_vm0 = vcmask (!%p158_p3), 64512   ;;  %vm1414_vm1 = vcmask (!%p158_p3), 1043456   ;;  %vm221_vm2 = vcmask (!%p158_p3), 130112   ;;  %vm230_vm3 = vcmask (!%p158_p3), 195712  }
   0x7   : > { %161 = sbr.rel (%p158_p3) target bundleno = 619 (0x26b), region = 32  ;;  %s2191_s21 = smov (!%p158_p3), 8   ;;  %vm239_vm4 = vcmask (!%p158_p3), 261312   ;;  %vm248_vm5 = vcmask (!%p158_p3), 326912   ;;  %vm257_vm6 = vcmask (!%p158_p3), 392512   ;;  %vm266_vm7 = vcmask (!%p158_p3), 458112  }
   0x8   : > { %s2192_s22 = smov (!%p158_p3), 24   ;;  %s2193_s23 = smov (!%p158_p3), 32   ;;  %vm275_vm8 = vcmask (!%p158_p3), 523712   ;;  %vm284_vm9 = vcmask (!%p158_p3), 589312   ;;  %vm1365_vm10 = vcmask (!%p158_p3), 588800  }
   0x9   : > { %s2194_s24 = smov (!%p158_p3), 40   ;;  %s2195_s27 = smov (!%p158_p3), 48  }
   0xa   : > { %s2196_s5 = smov (!%p158_p3), 56   ;;  %s2197_s10 = smov (!%p158_p3), 64  }
   0xe   : > { %s2906_s12 = smov (!%p189_p4, %s2180_s12), 1 }
   0xf   : > { %s2128_s16 = smul.u32 336, %s2906_s12  ;;  %s1925_s17 = sshll.u32 %s2906_s12, 7 }
  0x11   : > { %s2242_s19 = scalar_lea.vmem %s2897_s0, %s2128_s16 }
  0x12   : > { %v223_v0 = vld [vmem:[%s2242_s19 + $0x2] sm:$0xff]  ;;  %v224_v1 = vld [vmem:[%s2242_s19 + $0xa] sm:$0xff]  ;;  %v290_v5 = vld [vmem:[%s2242_s19 + $0x13] sm:$0xff] }
  0x13   : > { %v214_v2 = vld [vmem:[%s2242_s19 + $0x1] sm:$0xff]  ;;  %v225_v3 = vpack.c.bf16 %v224_v1, %v223_v0  ;;  %v215_v4 = vld [vmem:[%s2242_s19 + $0x9] sm:$0xff]  ;;  %v766_v8 = vld [vmem:[%s2242_s19 + $0x91] sm:$0xff] }
  0x14   : > { %v291_v6 = vld [vmem:[%s2242_s19 + $0x1b] sm:$0xff]  ;;  %v216_v7 = vpack.c.bf16 %v215_v4, %v214_v2  ;;  %v834_v12 = vld [vmem:[%s2242_s19 + $0xa3] sm:$0xff]  ;;  %v835_v13 = vld [vmem:[%s2242_s19 + $0xab] sm:$0xff] }
  0x15   : > { %v767_v9 = vld [vmem:[%s2242_s19 + $0x99] sm:$0xff]  ;;  %227 = vrot.lane.b32.xlu1 %v225_v3, %s2190_s20  ;;  %v2253_v10 = vpack.c.bf16 %v291_v6, %v290_v5  ;;  %v782_v19 = vld [vmem:[%s2242_s19 + $0xa2] sm:$0xff]  ;;  %v783_v20 = vld [vmem:[%s2242_s19 + $0xaa] sm:$0xff]  ;;  %v836_v22 = vpack.c.bf16 %v835_v13, %v834_v12 }
  0x16   : > { %218 = vrot.lane.b32.xlu0 %v216_v7, %s2191_s21  ;;  %v768_v11 = vpack.c.bf16 %v767_v9, %v766_v8  ;;  %v232_v14 = vld [vmem:[%s2242_s19 + $0x12] sm:$0xff]  ;;  %v775_v16 = vld [vmem:[%s2242_s19 + $0x9a] sm:$0xff]  ;;  %v306_v21 = vld [vmem:[%s2242_s19 + $0x24] sm:$0xff]  ;;  %v784_v23 = vpack.c.bf16 %v783_v20, %v782_v19 }
  0x17   : > { %v774_v15 = vld [vmem:[%s2242_s19 + $0x92] sm:$0xff]  ;;  %v233_v17 = vld [vmem:[%s2242_s19 + $0x1a] sm:$0xff]  ;;  %v874_v35 = vld [vmem:[%s2242_s19 + $0xc6] sm:$0xff] }
  0x18   : > { %v234_v18 = vpack.c.bf16 %v233_v17, %v232_v14  ;;  %v307_v24 = vld [vmem:[%s2242_s19 + $0x2c] sm:$0xff]  ;;  %v850_v25 = vld [vmem:[%s2242_s19 + $0xb4] sm:$0xff]  ;;  %v851_v26 = vld [vmem:[%s2242_s19 + $0xbc] sm:$0xff]  ;;  %v776_v27 = vpack.c.bf16 %v775_v16, %v774_v15  ;;  %833 = vst.msk [vmem:[#allocation2 + $0x48] sm:$0xff] %vm212_vm0, %v784_v23 }
  0x19   : > { %294 = vrot.lane.b32.xlu1 %v2253_v10, %s2191_s21  ;;  %v298_v28 = vld [vmem:[%s2242_s19 + $0x14] sm:$0xff]  ;;  %v299_v29 = vld [vmem:[%s2242_s19 + $0x1c] sm:$0xff]  ;;  %v2273_v30 = vpack.c.bf16 %v307_v24, %v306_v21  ;;  %v2275_v31 = vpack.c.bf16 %v851_v26, %v850_v25  ;;  %v842_v37 = vld [vmem:[%s2242_s19 + $0xa4] sm:$0xff] }
  0x1a   : > { %770 = vrot.lane.b32.xlu0 %v768_v11, %s2191_s21  ;;  %289 = vst.msk [vmem:[#allocation2 + $0x8] sm:$0xff] %vm212_vm0, %v234_v18  ;;  %v330_v32 = vld [vmem:[%s2242_s19 + $0x36] sm:$0xff]  ;;  %v300_v33 = vpack.c.bf16 %v299_v29, %v298_v28  ;;  %v331_v34 = vld [vmem:[%s2242_s19 + $0x3e] sm:$0xff]  ;;  %v875_v36 = vld [vmem:[%s2242_s19 + $0xce] sm:$0xff] }
  0x1b   : > { %357 = vst.msk [vmem:[#allocation2 + $0x10] sm:$0xff] %vm212_vm0, %v2273_v30  ;;  %901 = vst.msk [vmem:[#allocation2 + $0x50] sm:$0xff] %vm212_vm0, %v2275_v31  ;;  %v843_v38 = vld [vmem:[%s2242_s19 + $0xac] sm:$0xff]  ;;  %v2291_v39 = vpack.c.bf16 %v331_v34, %v330_v32  ;;  %v2293_v40 = vpack.c.bf16 %v875_v36, %v874_v35  ;;  %v466_v42 = vld [vmem:[%s2242_s19 + $0x5a] sm:$0xff] }
  0x1c   : > { %v844_v41 = vpack.c.bf16 %v843_v38, %v842_v37  ;;  %v467_v43 = vld [vmem:[%s2242_s19 + $0x62] sm:$0xff]  ;;  %v762_v48 = vld [vmem:[%s2242_s19 + $0x90] sm:$0xff]  ;;  %v763_v49 = vld [vmem:[%s2242_s19 + $0x98] sm:$0xff] }
  0x1d   : > { %838 = vrot.lane.b32.xlu1 %v836_v22, %s2191_s21  ;;  %425 = vst.msk [vmem:[#allocation2 + $0x18] sm:$0xff] %vm212_vm0, %v2291_v39  ;;  %969 = vst.msk [vmem:[#allocation2 + $0x58] sm:$0xff] %vm212_vm0, %v2293_v40  ;;  %v2305_v44 = vpack.c.bf16 %v467_v43, %v466_v42  ;;  %v209_v45 = vld [vmem:[%s2242_s19] sm:$0xff]  ;;  %v210_v46 = vld [vmem:[%s2242_s19 + $0x8] sm:$0xff]  ;;  %v2311_v50 = vpack.c.bf16 %v763_v49, %v762_v48 }
  0x1e   : > { %778 = vrot.lane.b32.xlu0 %v776_v27, %s2190_s20  ;;  %v211_v47 = vpack.c.bf16 %v210_v46, %v209_v45  ;;  %v314_v51 = vld [vmem:[%s2242_s19 + $0x25] sm:$0xff]  ;;  %v315_v52 = vld [vmem:[%s2242_s19 + $0x2d] sm:$0xff]  ;;  %v1122_v56 = vld [vmem:[%s2242_s19 + $0xfc] sm:$0xff] }
  0x1f   : > { %561 = vst.msk [vmem:[#allocation2 + $0x28] sm:$0xff] %vm212_vm0, %v2305_v44  ;;  %765 = vst.msk [vmem:[#allocation2 + $0x40] sm:$0xff] %vm212_vm0, %v2311_v50  ;;  %v578_v53 = vld [vmem:[%s2242_s19 + $0x6c] sm:$0xff]  ;;  %v579_v54 = vld [vmem:[%s2242_s19 + $0x74] sm:$0xff]  ;;  %v2334_v59 = vpack.c.bf16 %v315_v52, %v314_v51 }
  0x20   : > { %213 = vst.msk [vmem:[#allocation2] sm:$0xff] %vm212_vm0, %v211_v47  ;;  %v2326_v55 = vpack.c.bf16 %v579_v54, %v578_v53  ;;  %v1123_v57 = vld [vmem:[%s2242_s19 + $0x104] sm:$0xff]  ;;  %v858_v60 = vld [vmem:[%s2242_s19 + $0xb5] sm:$0xff]  ;;  %v2165_v20 = vld [vmem:[%s2898_s1 + $0x20] ss:$0 sps:$4 sm:$0xff]  }
  0x21   : > { %302 = vrot.lane.b32.xlu1 %v300_v33, %s2190_s20  ;;  %v2330_v58 = vpack.c.bf16 %v1123_v57, %v1122_v56  ;;  %v859_v61 = vld [vmem:[%s2242_s19 + $0xbd] sm:$0xff]  ;;  %v322_v63 = vld [vmem:[%s2242_s19 + $0x26] sm:$0xff]  ;;  %v323_v0 = vld [vmem:[%s2242_s19 + $0x2e] sm:$0xff] }
  0x22   : > { %236 = vrot.lane.b32.xlu0 %v234_v18, %s2192_s22  ;;  %629 = vst.msk [vmem:[#allocation2 + $0x30] sm:$0xff] %vm212_vm0, %v2326_v55  ;;  %v2345_v62 = vpack.c.bf16 %v859_v61, %v858_v60  ;;  %v2352_v1 = vpack.c.bf16 %v323_v0, %v322_v63  ;;  %v866_v2 = vld [vmem:[%s2242_s19 + $0xb6] sm:$0xff]  ;;  %v867_v3 = vld [vmem:[%s2242_s19 + $0xbe] sm:$0xff]  ;;  %v2162_v6 = vld [vmem:[%s2898_s1 + $0x8] sm:$0xff]  }
  0x23   : > { %1173 = vst.msk [vmem:[#allocation2 + $0x70] sm:$0xff] %vm212_vm0, %v2330_v58  ;;  %v2161_v4 = vld [vmem:[%s2898_s1] sm:$0xff]   ;;  %v2362_v5 = vpack.c.bf16 %v867_v3, %v866_v2  ;;  %v2163_v7 = vld [vmem:[%s2898_s1 + $0x10] sm:$0xff]   ;;  %v2164_v13 = vld [vmem:[%s2898_s1 + $0x18] sm:$0xff]  }
  0x24   : > { %2074 = vmatprep.subr.bf16.mxu0 %v2161_v4  ;;  %2116 = vmatprep.subr.bf16.mxu1 %v2161_v4  ;;  %v602_v8 = vld [vmem:[%s2242_s19 + $0x7e] sm:$0xff]  ;;  %v603_v9 = vld [vmem:[%s2242_s19 + $0x86] sm:$0xff]  ;;  %v1146_v14 = vld [vmem:[%s2242_s19 + $0x10e] sm:$0xff] }
  0x25   : > { %846 = vrot.lane.b32.xlu1 %v844_v41, %s2190_s20  ;;  %2075 = vmatpush3.bf16.msra.mxu0 %v2161_v4  ;;  %v338_v11 = vld [vmem:[%s2242_s19 + $0x37] sm:$0xff]  ;;  %v339_v12 = vld [vmem:[%s2242_s19 + $0x3f] sm:$0xff]  ;;  %v882_v18 = vld [vmem:[%s2242_s19 + $0xc7] sm:$0xff] }
  0x26   : > { %786 = vrot.lane.b32.xlu0 %v784_v23, %s2192_s22  ;;  %2121 = vmatpush3.bf16.msra.mxu1 %v2161_v4  ;;  %v1147_v15 = vld [vmem:[%s2242_s19 + $0x116] sm:$0xff]  ;;  %v340_v17 = vpack.c.bf16 %v339_v12, %v338_v11  ;;  %v347_v24 = vld [vmem:[%s2242_s19 + $0x40] sm:$0xff]  ;;  %v890_v26 = vld [vmem:[%s2242_s19 + $0xc8] sm:$0xff] }
  0x27   : > { %2076 = vmatprep.subr.bf16.mxu0 %v2162_v6  ;;  %2117 = vmatprep.subr.bf16.mxu1 %v2162_v6  ;;  %v2393_v16 = vpack.c.bf16 %v1147_v15, %v1146_v14  ;;  %v883_v19 = vld [vmem:[%s2242_s19 + $0xcf] sm:$0xff]  ;;  %v346_v23 = vld [vmem:[%s2242_s19 + $0x38] sm:$0xff]  ;;  %v1003_v46 = vld [vmem:[%s2242_s19 + $0xe2] sm:$0xff] }
  0x28   : > { %v884_v21 = vpack.c.bf16 %v883_v19, %v882_v18  ;;  %v348_v25 = vpack.c.bf16 %v347_v24, %v346_v23  ;;  %v891_v27 = vld [vmem:[%s2242_s19 + $0xd0] sm:$0xff]  ;;  %v442_v29 = vld [vmem:[%s2242_s19 + $0x48] sm:$0xff]  ;;  %v986_v32 = vld [vmem:[%s2242_s19 + $0xd8] sm:$0xff] }
  0x29   : > { %310 = vrot.lane.b32.xlu1 %v2273_v30, %s2192_s22  ;;  %2077 = vmatpush3.bf16.msra.mxu0 %v2162_v6  ;;  %1241 = vst.msk [vmem:[#allocation2 + $0x78] sm:$0xff] %vm212_vm0, %v2393_v16  ;;  %v892_v28 = vpack.c.bf16 %v891_v27, %v890_v26  ;;  %v450_v35 = vld [vmem:[%s2242_s19 + $0x49] sm:$0xff]  ;;  %v451_v36 = vld [vmem:[%s2242_s19 + $0x51] sm:$0xff]  ;;  %v994_v38 = vld [vmem:[%s2242_s19 + $0xd9] sm:$0xff] }
  0x2a   : > { %245 = vrot.lane.b32.xlu0 %v2253_v10, %s2193_s23  ;;  %2122 = vmatpush3.bf16.msra.mxu1 %v2162_v6  ;;  %v2378_v10 = vpack.c.bf16 %v603_v9, %v602_v8  ;;  %v2443_v37 = vpack.c.bf16 %v451_v36, %v450_v35  ;;  %v459_v42 = vld [vmem:[%s2242_s19 + $0x52] sm:$0xff]  ;;  %v1002_v45 = vld [vmem:[%s2242_s19 + $0xda] sm:$0xff]  ;;  %v1010_v48 = vld [vmem:[%s2242_s19 + $0xea] sm:$0xff] }
  0x2b   : > { %2078 = vmatprep.subr.bf16.mxu0 %v2163_v7  ;;  %2118 = vmatprep.subr.bf16.mxu1 %v2163_v7  ;;  %v2464_v47 = vpack.c.bf16 %v1003_v46, %v1002_v45  ;;  %v1011_v49 = vld [vmem:[%s2242_s19 + $0xf2] sm:$0xff]  ;;  %v490_v52 = vld [vmem:[%s2242_s19 + $0x48] sm:$0xff]  ;;  %v474_v54 = vld [vmem:[%s2242_s19 + $0x5b] sm:$0xff] }
  0x2c   : > { %697 = vst.msk [vmem:[#allocation2 + $0x38] sm:$0xff] %vm212_vm0, %v2378_v10  ;;  %v2474_v51 = vpack.c.bf16 %v1011_v49, %v1010_v48  ;;  %v491_v53 = vld [vmem:[%s2242_s19 + $0x50] sm:$0xff]  ;;  %v475_v56 = vld [vmem:[%s2242_s19 + $0x63] sm:$0xff]  ;;  %v1034_v60 = vld [vmem:[%s2242_s19 + $0xd8] sm:$0xff] }
  0x2d   : > { %854 = vrot.lane.b32.xlu1 %v2275_v31, %s2192_s22  ;;  %2079 = vmatpush3.bf16.msra.mxu0 %v2163_v7  ;;  %v492_v57 = vpack.c.bf16 %v491_v53, %v490_v52  ;;  %v1035_v61 = vld [vmem:[%s2242_s19 + $0xe0] sm:$0xff]  ;;  %v1019_v63 = vld [vmem:[%s2242_s19 + $0xf3] sm:$0xff]  ;;  %v1102_v8 = vld [vmem:[%s2242_s19 + $0xea] sm:$0xff] }
  0x2e   : > { %794 = vrot.lane.b32.xlu0 %v836_v22, %s2193_s23  ;;  %2123 = vmatpush3.bf16.msra.mxu1 %v2163_v7  ;;  %v1416_v22 = vsel %vm1414_vm1, %v2165_v20, 0  ;;  %v1036_v0 = vpack.c.bf16 %v1035_v61, %v1034_v60  ;;  %v483_v6 = vld [vmem:[%s2242_s19 + $0x64] sm:$0xff]  ;;  %v1103_v9 = vld [vmem:[%s2242_s19 + $0xf2] sm:$0xff] }
  0x2f   : > { %2080 = vmatprep.subr.bf16.mxu0 %v2164_v13  ;;  %2119 = vmatprep.subr.bf16.mxu1 %v2164_v13  ;;  %493 = vst.msk [vmem:[#allocation2 + $0x20] sm:$0xff] %vm212_vm0, %v492_v57  ;;  %v1104_v12 = vpack.c.bf16 %v1103_v9, %v1102_v8  ;;  %v1026_v14 = vld [vmem:[%s2242_s19 + $0xec] sm:$0xff]  ;;  %v1027_v15 = vld [vmem:[%s2242_s19 + $0xf4] sm:$0xff]  ;;  %v1130_v35 = vld [vmem:[%s2242_s19 + $0xfd] sm:$0xff] }
  0x30   : > { %1037 = vst.msk [vmem:[#allocation2 + $0x60] sm:$0xff] %vm212_vm0, %v1036_v0  ;;  %v2523_v18 = vpack.c.bf16 %v1027_v15, %v1026_v14  ;;  %v1131_v36 = vld [vmem:[%s2242_s19 + $0x105] sm:$0xff] }
  0x31   : > { %318 = vrot.lane.b32.xlu1 %v2334_v59, %s2193_s23  ;;  %2081 = vmatpush3.bf16.msra.mxu0 %v2164_v13  ;;  %1105 = vst.msk [vmem:[#allocation2 + $0x68] sm:$0xff] %vm212_vm0, %v1104_v12  ;;  %v1138_v46 = vld [vmem:[%s2242_s19 + $0xfe] sm:$0xff]  ;;  %v611_v57 = vld [vmem:[%s2242_s19 + $0x87] sm:$0xff]  ;;  %v1162_v12 = vld [vmem:[%s2242_s19 + $0x110] sm:$0xff] }
  0x32   : > { %254 = vrot.lane.b32.xlu0 %v300_v33, %s2194_s24  ;;  %2124 = vmatpush3.bf16.msra.mxu1 %v2164_v13  ;;  %v987_v33 = vld [vmem:[%s2242_s19 + $0xe0] sm:$0xff] }
  0x33   : > { %2126 = vmatprep.subr.msk.bf16.mxu0 %vm1414_vm1, %v2165_v20  ;;  %2127 = vmatprep.subr.msk.bf16.mxu1 %vm1414_vm1, %v2165_v20  ;;  %v988_v34 = vpack.c.bf16 %v987_v33, %v986_v32 }
  0x35   : > { %862 = vrot.lane.b32.xlu1 %v2345_v62, %s2193_s23  ;;  %2083 = vmatpush3.bf16.msra.mxu0 %v1416_v22 }
  0x36   : > { %802 = vrot.lane.b32.xlu0 %v844_v41, %s2194_s24  ;;  %2125 = vmatpush3.bf16.msra.mxu1 %v1416_v22  ;;  %v458_v41 = vld [vmem:[%s2242_s19 + $0x4a] sm:$0xff] }
  0x37   : > { %v2457_v43 = vpack.c.bf16 %v459_v42, %v458_v41  ;;  %v595_v41 = vld [vmem:[%s2242_s19 + $0x76] sm:$0xff] }
  0x39   : > { %326 = vrot.lane.b32.xlu1 %v2352_v1, %s2194_s24 }
  0x3a   : > { %263 = vrot.lane.b32.xlu0 %v2273_v30, %s2195_s27  ;;  %v443_v30 = vld [vmem:[%s2242_s19 + $0x50] sm:$0xff] }
  0x3d   : > { %870 = vrot.lane.b32.xlu1 %v2362_v5, %s2194_s24 }
  0x3e   : > { %810 = vrot.lane.b32.xlu0 %v2275_v31, %s2195_s27  ;;  %v444_v31 = vpack.c.bf16 %v443_v30, %v442_v29  ;;  %v586_v30 = vld [vmem:[%s2242_s19 + $0x6d] sm:$0xff] }
  0x41   : > { %334 = vrot.lane.b32.xlu1 %v2291_v39, %s2195_s27 }
  0x42   : > { %272 = vrot.lane.b32.xlu0 %v2334_v59, %s2196_s5 }
  0x45   : > { %878 = vrot.lane.b32.xlu1 %v2293_v40, %s2195_s27 }
  0x46   : > { %818 = vrot.lane.b32.xlu0 %v2345_v62, %s2196_s5 }
  0x49   : > { %342 = vrot.lane.b32.xlu1 %v340_v17, %s2196_s5 }
  0x4a   : > { %281 = vrot.lane.b32.xlu0 %v2352_v1, %s2197_s10 }
  0x4d   : > { %886 = vrot.lane.b32.xlu1 %v884_v21, %s2196_s5 }
  0x4e   : > { %826 = vrot.lane.b32.xlu0 %v2362_v5, %s2197_s10 }
  0x51   : > { %362 = vrot.lane.b32.xlu1 %v2334_v59, %s2191_s21  ;;  %v2485_v59 = vpack.c.bf16 %v475_v56, %v474_v54 }
  0x52   : > { %350 = vrot.lane.b32.xlu0 %v348_v25, %s2197_s10 }
  0x55   : > { %906 = vrot.lane.b32.xlu1 %v2345_v62, %s2191_s21  ;;  %v1018_v62 = vld [vmem:[%s2242_s19 + $0xeb] sm:$0xff] }
  0x56   : > { %894 = vrot.lane.b32.xlu0 %v892_v28, %s2197_s10  ;;  %v2497_v3 = vpack.c.bf16 %v1019_v63, %v1018_v62  ;;  %v1154_v62 = vld [vmem:[%s2242_s19 + $0x10f] sm:$0xff]  ;;  %v1155_v63 = vld [vmem:[%s2242_s19 + $0x117] sm:$0xff] }
  0x59   : > { %430 = vrot.lane.b32.xlu1 %v340_v17, %s2191_s21 }
  0x5a   : > { %370 = vrot.lane.b32.xlu0 %v2352_v1, %s2190_s20 }
  0x5d   : > { %974 = vrot.lane.b32.xlu1 %v884_v21, %s2191_s21 }
  0x5e   : > { %914 = vrot.lane.b32.xlu0 %v2362_v5, %s2190_s20  ;;  %v482_v5 = vld [vmem:[%s2242_s19 + $0x5c] sm:$0xff] }
  0x5f   : > { %v2512_v11 = vpack.c.bf16 %v483_v6, %v482_v5  ;;  %v618_v5 = vld [vmem:[%s2242_s19 + $0x80] sm:$0xff]  ;;  %v619_v6 = vld [vmem:[%s2242_s19 + $0x88] sm:$0xff] }
  0x60   : > { %v2644_v9 = vpack.c.bf16 %v619_v6, %v618_v5 }
  0x61   : > { %438 = vrot.lane.b32.xlu1 %v348_v25, %s2190_s20 }
  0x62   : > { %378 = vrot.lane.b32.xlu0 %v2291_v39, %s2192_s22  ;;  %v995_v39 = vld [vmem:[%s2242_s19 + $0xe1] sm:$0xff] }
  0x65   : > { %982 = vrot.lane.b32.xlu1 %v892_v28, %s2190_s20 }
  0x66   : > { %922 = vrot.lane.b32.xlu0 %v2293_v40, %s2192_s22  ;;  %v2450_v40 = vpack.c.bf16 %v995_v39, %v994_v38  ;;  %v2577_v39 = vpack.c.bf16 %v1131_v36, %v1130_v35  ;;  %v1266_v35 = vld [vmem:[%s2242_s19 + $0x121] sm:$0xff]  ;;  %v1267_v36 = vld [vmem:[%s2242_s19 + $0x129] sm:$0xff] }
  0x69   : > { %446 = vrot.lane.b32.xlu1 %v444_v31, %s2192_s22 }
  0x6a   : > { %386 = vrot.lane.b32.xlu0 %v340_v17, %s2193_s23 }
  0x6d   : > { %990 = vrot.lane.b32.xlu1 %v988_v34, %s2192_s22 }
  0x6e   : > { %930 = vrot.lane.b32.xlu0 %v884_v21, %s2193_s23 }
  0x71   : > { %454 = vrot.lane.b32.xlu1 %v2443_v37, %s2193_s23 }
  0x72   : > { %394 = vrot.lane.b32.xlu0 %v348_v25, %s2194_s24 }
  0x75   : > { %998 = vrot.lane.b32.xlu1 %v2450_v40, %s2193_s23 }
  0x76   : > { %938 = vrot.lane.b32.xlu0 %v892_v28, %s2194_s24 }
  0x79   : > { %462 = vrot.lane.b32.xlu1 %v2457_v43, %s2194_s24 }
  0x7a   : > { %402 = vrot.lane.b32.xlu0 %v444_v31, %s2195_s27  ;;  %v587_v31 = vld [vmem:[%s2242_s19 + $0x75] sm:$0xff] }
  0x7d   : > { %1006 = vrot.lane.b32.xlu1 %v2464_v47, %s2194_s24 }
  0x7e   : > { %946 = vrot.lane.b32.xlu0 %v988_v34, %s2195_s27  ;;  %v2567_v34 = vpack.c.bf16 %v587_v31, %v586_v30  ;;  %v722_v31 = vld [vmem:[%s2242_s19 + $0x91] sm:$0xff] }
  0x81   : > { %470 = vrot.lane.b32.xlu1 %v2305_v44, %s2195_s27 }
  0x82   : > { %410 = vrot.lane.b32.xlu0 %v2443_v37, %s2196_s5 }
  0x85   : > { %1014 = vrot.lane.b32.xlu1 %v2474_v51, %s2195_s27 }
  0x86   : > { %954 = vrot.lane.b32.xlu0 %v2450_v40, %s2196_s5 }
  0x87   : > { %v228_v1 = vpop.permute.xlu1 %227 }
  0x88   : > { %v219_v2 = vpop.permute.xlu0 %218 }
  0x89   : > { %222 = vst.msk [vmem:[#allocation2] sm:$0xff] %vm221_vm2, %v219_v2  ;;  %478 = vrot.lane.b32.xlu1 %v2485_v59, %s2196_s5 }
  0x8a   : > { %418 = vrot.lane.b32.xlu0 %v2457_v43, %s2197_s10  ;;  %231 = vst.msk [vmem:[#allocation2] sm:$0xff] %vm230_vm3, %v228_v1 }
  0x8b   : > { %v295_v4 = vpop.permute.xlu1 %294 }
  0x8c   : > { %297 = vst.msk [vmem:[#allocation2 + $0x8] sm:$0xff] %vm221_vm2, %v295_v4  ;;  %v771_v7 = vpop.permute.xlu0 %770 }
  0x8d   : > { %773 = vst.msk [vmem:[#allocation2 + $0x40] sm:$0xff] %vm221_vm2, %v771_v7  ;;  %1022 = vrot.lane.b32.xlu1 %v2497_v3, %s2196_s5 }
  0x8e   : > { %962 = vrot.lane.b32.xlu0 %v2464_v47, %s2197_s10 }
  0x8f   : > { %v839_v13 = vpop.permute.xlu1 %838 }
  0x90   : > { %841 = vst.msk [vmem:[#allocation2 + $0x48] sm:$0xff] %vm221_vm2, %v839_v13  ;;  %v779_v17 = vpop.permute.xlu0 %778  ;;  %v1163_v13 = vld [vmem:[%s2242_s19 + $0x118] sm:$0xff] }
  0x91   : > { %781 = vst.msk [vmem:[#allocation2 + $0x40] sm:$0xff] %vm230_vm3, %v779_v17  ;;  %498 = vrot.lane.b32.xlu1 %v2443_v37, %s2191_s21  ;;  %v2655_v17 = vpack.c.bf16 %v1163_v13, %v1162_v12  ;;  %v754_v13 = vld [vmem:[%s2242_s19 + $0xa4] sm:$0xff] }
  0x92   : > { %486 = vrot.lane.b32.xlu0 %v2512_v11, %s2197_s10 }
  0x93   : > { %v303_v19 = vpop.permute.xlu1 %302 }
  0x94   : > { %305 = vst.msk [vmem:[#allocation2 + $0x8] sm:$0xff] %vm230_vm3, %v303_v19  ;;  %v237_v20 = vpop.permute.xlu0 %236 }
  0x95   : > { %240 = vst.msk [vmem:[#allocation2] sm:$0xff] %vm239_vm4, %v237_v20  ;;  %1042 = vrot.lane.b32.xlu1 %v2450_v40, %s2191_s21  ;;  %v594_v40 = vld [vmem:[%s2242_s19 + $0x6e] sm:$0xff] }
  0x96   : > { %1030 = vrot.lane.b32.xlu0 %v2523_v18, %s2197_s10  ;;  %v2587_v45 = vpack.c.bf16 %v595_v41, %v594_v40  ;;  %v730_v40 = vld [vmem:[%s2242_s19 + $0x92] sm:$0xff]  ;;  %v731_v41 = vld [vmem:[%s2242_s19 + $0x9a] sm:$0xff] }
  0x97   : > { %v847_v21 = vpop.permute.xlu1 %846 }
  0x98   : > { %849 = vst.msk [vmem:[#allocation2 + $0x48] sm:$0xff] %vm230_vm3, %v847_v21  ;;  %v787_v22 = vpop.permute.xlu0 %786 }
  0x99   : > { %789 = vst.msk [vmem:[#allocation2 + $0x40] sm:$0xff] %vm239_vm4, %v787_v22  ;;  %566 = vrot.lane.b32.xlu1 %v2485_v59, %s2191_s21 }
  0x9a   : > { %506 = vrot.lane.b32.xlu0 %v2457_v43, %s2190_s20 }
  0x9b   : > { %v311_v23 = vpop.permute.xlu1 %310 }
  0x9c   : > { %313 = vst.msk [vmem:[#allocation2 + $0x8] sm:$0xff] %vm239_vm4, %v311_v23  ;;  %v246_v24 = vpop.permute.xlu0 %245 }
  0x9d   : > { %249 = vst.msk [vmem:[#allocation2] sm:$0xff] %vm248_vm5, %v246_v24  ;;  %1110 = vrot.lane.b32.xlu1 %v2497_v3, %s2191_s21 }
  0x9e   : > { %1050 = vrot.lane.b32.xlu0 %v2464_v47, %s2190_s20  ;;  %v1139_v47 = vld [vmem:[%s2242_s19 + $0x106] sm:$0xff] }
  0x9f   : > { %v855_v25 = vpop.permute.xlu1 %854 }
  0xa0   : > { %857 = vst.msk [vmem:[#allocation2 + $0x48] sm:$0xff] %vm239_vm4, %v855_v25  ;;  %v795_v26 = vpop.permute.xlu0 %794 }
  0xa1   : > { %797 = vst.msk [vmem:[#allocation2 + $0x40] sm:$0xff] %vm248_vm5, %v795_v26  ;;  %574 = vrot.lane.b32.xlu1 %v2512_v11, %s2190_s20 }
  0xa2   : > { %514 = vrot.lane.b32.xlu0 %v2305_v44, %s2192_s22 }
  0xa3   : > { %v319_v27 = vpop.permute.xlu1 %318 }
  0xa4   : > { %321 = vst.msk [vmem:[#allocation2 + $0x8] sm:$0xff] %vm248_vm5, %v319_v27  ;;  %v255_v28 = vpop.permute.xlu0 %254 }
  0xa5   : > { %258 = vst.msk [vmem:[#allocation2] sm:$0xff] %vm257_vm6, %v255_v28  ;;  %1118 = vrot.lane.b32.xlu1 %v2523_v18, %s2190_s20  ;;  %v1258_v28 = vld [vmem:[%s2242_s19 + $0x120] sm:$0xff] }
  0xa6   : > { %1058 = vrot.lane.b32.xlu0 %v2474_v51, %s2192_s22  ;;  %v2597_v51 = vpack.c.bf16 %v1139_v47, %v1138_v46  ;;  %v1274_v46 = vld [vmem:[%s2242_s19 + $0x122] sm:$0xff]  ;;  %v1275_v47 = vld [vmem:[%s2242_s19 + $0x12a] sm:$0xff] }
  0xa7   : > { %v863_v29 = vpop.permute.xlu1 %862 }
  0xa8   : > { %865 = vst.msk [vmem:[#allocation2 + $0x48] sm:$0xff] %vm248_vm5, %v863_v29  ;;  %v803_v44 = vpop.permute.xlu0 %802  ;;  %v1259_v29 = vld [vmem:[%s2242_s19 + $0x128] sm:$0xff] }
  0xa9   : > { %805 = vst.msk [vmem:[#allocation2 + $0x40] sm:$0xff] %vm257_vm6, %v803_v44  ;;  %582 = vrot.lane.b32.xlu1 %v2326_v55, %s2192_s22  ;;  %v1260_v30 = vpack.c.bf16 %v1259_v29, %v1258_v28 }
  0xaa   : > { %522 = vrot.lane.b32.xlu0 %v2485_v59, %s2193_s23 }
  0xab   : > { %v327_v32 = vpop.permute.xlu1 %326 }
  0xac   : > { %329 = vst.msk [vmem:[#allocation2 + $0x8] sm:$0xff] %vm257_vm6, %v327_v32  ;;  %v264_v33 = vpop.permute.xlu0 %263  ;;  %v723_v32 = vld [vmem:[%s2242_s19 + $0x99] sm:$0xff] }
  0xad   : > { %267 = vst.msk [vmem:[#allocation2] sm:$0xff] %vm266_vm7, %v264_v33  ;;  %1126 = vrot.lane.b32.xlu1 %v2330_v58, %s2192_s22 }
  0xae   : > { %1066 = vrot.lane.b32.xlu0 %v2497_v3, %s2193_s23  ;;  %v2631_v3 = vpack.c.bf16 %v1155_v63, %v1154_v62  ;;  %v747_v62 = vld [vmem:[%s2242_s19 + $0xab] sm:$0xff] }
  0xaf   : > { %v871_v37 = vpop.permute.xlu1 %870 }
  0xb0   : > { %873 = vst.msk [vmem:[#allocation2 + $0x48] sm:$0xff] %vm257_vm6, %v871_v37  ;;  %v811_v38 = vpop.permute.xlu0 %810 }
  0xb1   : > { %813 = vst.msk [vmem:[#allocation2 + $0x40] sm:$0xff] %vm266_vm7, %v811_v38  ;;  %590 = vrot.lane.b32.xlu1 %v2567_v34, %s2193_s23 }
  0xb2   : > { %530 = vrot.lane.b32.xlu0 %v2512_v11, %s2194_s24 }
  0xb3   : > { %v335_v42 = vpop.permute.xlu1 %334 }
  0xb4   : > { %337 = vst.msk [vmem:[#allocation2 + $0x8] sm:$0xff] %vm266_vm7, %v335_v42  ;;  %v273_v43 = vpop.permute.xlu0 %272 }
  0xb5   : > { %276 = vst.msk [vmem:[#allocation2] sm:$0xff] %vm275_vm8, %v273_v43  ;;  %1134 = vrot.lane.b32.xlu1 %v2577_v39, %s2193_s23 }
  0xb6   : > { %1074 = vrot.lane.b32.xlu0 %v2523_v18, %s2194_s24 }
  0xb7   : > { %v879_v48 = vpop.permute.xlu1 %878 }
  0xb8   : > { %881 = vst.msk [vmem:[#allocation2 + $0x48] sm:$0xff] %vm266_vm7, %v879_v48  ;;  %v819_v49 = vpop.permute.xlu0 %818 }
  0xb9   : > { %821 = vst.msk [vmem:[#allocation2 + $0x40] sm:$0xff] %vm275_vm8, %v819_v49  ;;  %598 = vrot.lane.b32.xlu1 %v2587_v45, %s2194_s24 }
  0xba   : > { %538 = vrot.lane.b32.xlu0 %v2326_v55, %s2195_s27  ;;  %v610_v55 = vld [vmem:[%s2242_s19 + $0x7f] sm:$0xff] }
  0xbb   : > { %v343_v52 = vpop.permute.xlu1 %342  ;;  %v2620_v61 = vpack.c.bf16 %v611_v57, %v610_v55  ;;  %v1282_v57 = vld [vmem:[%s2242_s19 + $0x132] sm:$0xff] }
  0xbc   : > { %345 = vst.msk [vmem:[#allocation2 + $0x8] sm:$0xff] %vm275_vm8, %v343_v52  ;;  %v282_v53 = vpop.permute.xlu0 %281  ;;  %v738_v52 = vld [vmem:[%s2242_s19 + $0xa2] sm:$0xff] }
  0xbd   : > { %285 = vst.msk [vmem:[#allocation2] sm:$0xff] %vm284_vm9, %v282_v53  ;;  %1142 = vrot.lane.b32.xlu1 %v2597_v51, %s2194_s24  ;;  %v739_v53 = vld [vmem:[%s2242_s19 + $0xaa] sm:$0xff] }
  0xbe   : > { %1082 = vrot.lane.b32.xlu0 %v2330_v58, %s2195_s27  ;;  %v740_v55 = vpack.c.bf16 %v739_v53, %v738_v52 }
  0xbf   : > { %v887_v54 = vpop.permute.xlu1 %886 }
  0xc0   : > { %889 = vst.msk [vmem:[#allocation2 + $0x48] sm:$0xff] %vm275_vm8, %v887_v54  ;;  %v827_v56 = vpop.permute.xlu0 %826 }
  0xc1   : > { %829 = vst.msk [vmem:[#allocation2 + $0x40] sm:$0xff] %vm284_vm9, %v827_v56  ;;  %606 = vrot.lane.b32.xlu1 %v2378_v10, %s2195_s27 }
  0xc2   : > { %546 = vrot.lane.b32.xlu0 %v2567_v34, %s2196_s5 }
  0xc3   : > { %v363_v59 = vpop.permute.xlu1 %362 }
  0xc4   : > { %365 = vst.msk [vmem:[#allocation2 + $0x10] sm:$0xff] %vm221_vm2, %v363_v59  ;;  %v351_v58 = vpop.permute.xlu0 %350  ;;  %v1306_v60 = vld [vmem:[#allocation2] sm:$0xff] }
  0xc5   : > { %353 = vst.msk [vmem:[#allocation2 + $0x8] sm:$0xff] %vm284_vm9, %v351_v58  ;;  %2084 = vmatprep.mubr.msk.bf16.mxu0 %vm1365_vm10, %v1306_v60  ;;  %1150 = vrot.lane.b32.xlu1 %v2393_v16, %s2195_s27  ;;  %v1283_v59 = vld [vmem:[%s2242_s19 + $0x13a] sm:$0xff] }
  0xc6   : > { %1090 = vrot.lane.b32.xlu0 %v2577_v39, %s2196_s5  ;;  %v1284_v60 = vpack.c.bf16 %v1283_v59, %v1282_v57 }
  0xc7   : > { %v907_v0 = vpop.permute.xlu1 %906 }
  0xc8   : > { %909 = vst.msk [vmem:[#allocation2 + $0x50] sm:$0xff] %vm221_vm2, %v907_v0  ;;  %v895_v1 = vpop.permute.xlu0 %894  ;;  %v1314_v2 = vld [vmem:[#allocation2 + $0x40] sm:$0xff] }
  0xc9   : > { %897 = vst.msk [vmem:[#allocation2 + $0x48] sm:$0xff] %vm284_vm9, %v895_v1  ;;  %2100 = vmatprep.mubr.msk.bf16.mxu1 %vm1365_vm10, %v1314_v2  ;;  %614 = vrot.lane.b32.xlu1 %v2620_v61, %s2196_s5 }
  0xca   : > { %554 = vrot.lane.b32.xlu0 %v2587_v45, %s2197_s10 }
  0xcb   : > { %v431_v4 = vpop.permute.xlu1 %430 }
  0xcc   : > { %433 = vst.msk [vmem:[#allocation2 + $0x18] sm:$0xff] %vm221_vm2, %v431_v4  ;;  %v371_v7 = vpop.permute.xlu0 %370  ;;  %v1307_v8 = vld [vmem:[#allocation2 + $0x8] sm:$0xff]  ;;  %v1291_v4 = vld [vmem:[%s2242_s19 + $0x13b] sm:$0xff] }
  0xcd   : > { %373 = vst.msk [vmem:[#allocation2 + $0x10] sm:$0xff] %vm230_vm3, %v371_v7  ;;  %2085 = vmatmul.mubr.msk.bf16.vlgmr.msra.gmra.mrb[0].mxu0 %vm1365_vm10, %v1307_v8  ;;  %1158 = vrot.lane.b32.xlu1 %v2631_v3, %s2196_s5 }
  0xce   : > { %1098 = vrot.lane.b32.xlu0 %v2597_v51, %s2197_s10 }
  0xcf   : > { %v975_v11 = vpop.permute.xlu1 %974 }
  0xd0   : > { %977 = vst.msk [vmem:[#allocation2 + $0x58] sm:$0xff] %vm221_vm2, %v975_v11  ;;  %v915_v14 = vpop.permute.xlu0 %914  ;;  %v1315_v15 = vld [vmem:[#allocation2 + $0x48] sm:$0xff]  ;;  %v1299_v11 = vld [vmem:[%s2242_s19 + $0x13c] sm:$0xff] }
  0xd1   : > { %917 = vst.msk [vmem:[#allocation2 + $0x50] sm:$0xff] %vm230_vm3, %v915_v14  ;;  %2101 = vmatmul.mubr.msk.bf16.vlgmr.msra.gmra.mrb[0].mxu1 %vm1365_vm10, %v1315_v15  ;;  %634 = vrot.lane.b32.xlu1 %v2567_v34, %s2191_s21  ;;  %v724_v34 = vpack.c.bf16 %v723_v32, %v722_v31  ;;  %v755_v14 = vld [vmem:[%s2242_s19 + $0xac] sm:$0xff] }
  0xd2   : > { %622 = vrot.lane.b32.xlu0 %v2644_v9, %s2197_s10 }
  0xd3   : > { %v439_v18 = vpop.permute.xlu1 %438 }
  0xd4   : > { %441 = vst.msk [vmem:[#allocation2 + $0x18] sm:$0xff] %vm230_vm3, %v439_v18  ;;  %v379_v19 = vpop.permute.xlu0 %378 }
  0xd5   : > { %381 = vst.msk [vmem:[#allocation2 + $0x10] sm:$0xff] %vm239_vm4, %v379_v19  ;;  %1178 = vrot.lane.b32.xlu1 %v2577_v39, %s2191_s21  ;;  %v1268_v39 = vpack.c.bf16 %v1267_v36, %v1266_v35  ;;  %v756_v19 = vpack.c.bf16 %v755_v14, %v754_v13 }
  0xd6   : > { %1166 = vrot.lane.b32.xlu0 %v2655_v17, %s2197_s10 }
  0xd7   : > { %v983_v20 = vpop.permute.xlu1 %982 }
  0xd8   : > { %985 = vst.msk [vmem:[#allocation2 + $0x58] sm:$0xff] %vm230_vm3, %v983_v20  ;;  %v923_v21 = vpop.permute.xlu0 %922 }
  0xd9   : > { %925 = vst.msk [vmem:[#allocation2 + $0x50] sm:$0xff] %vm239_vm4, %v923_v21  ;;  %702 = vrot.lane.b32.xlu1 %v2620_v61, %s2191_s21 }
  0xda   : > { %642 = vrot.lane.b32.xlu0 %v2587_v45, %s2190_s20  ;;  %v732_v45 = vpack.c.bf16 %v731_v41, %v730_v40 }
  0xdb   : > { %v447_v22 = vpop.permute.xlu1 %446 }
  0xdc   : > { %449 = vst.msk [vmem:[#allocation2 + $0x18] sm:$0xff] %vm239_vm4, %v447_v22  ;;  %v387_v23 = vpop.permute.xlu0 %386 }
  0xdd   : > { %389 = vst.msk [vmem:[#allocation2 + $0x10] sm:$0xff] %vm248_vm5, %v387_v23  ;;  %1246 = vrot.lane.b32.xlu1 %v2631_v3, %s2191_s21 }
  0xde   : > { %1186 = vrot.lane.b32.xlu0 %v2597_v51, %s2190_s20  ;;  %v1276_v51 = vpack.c.bf16 %v1275_v47, %v1274_v46 }
  0xdf   : > { %v991_v24 = vpop.permute.xlu1 %990 }
  0xe0   : > { %993 = vst.msk [vmem:[#allocation2 + $0x58] sm:$0xff] %vm239_vm4, %v991_v24  ;;  %v931_v25 = vpop.permute.xlu0 %930 }
  0xe1   : > { %933 = vst.msk [vmem:[#allocation2 + $0x50] sm:$0xff] %vm248_vm5, %v931_v25  ;;  %710 = vrot.lane.b32.xlu1 %v2644_v9, %s2190_s20 }
  0xe2   : > { %650 = vrot.lane.b32.xlu0 %v2378_v10, %s2192_s22 }
  0xe3   : > { %v455_v26 = vpop.permute.xlu1 %454 }
  0xe4   : > { %457 = vst.msk [vmem:[#allocation2 + $0x18] sm:$0xff] %vm248_vm5, %v455_v26  ;;  %v395_v27 = vpop.permute.xlu0 %394 }
  0xe5   : > { %397 = vst.msk [vmem:[#allocation2 + $0x10] sm:$0xff] %vm257_vm6, %v395_v27  ;;  %1254 = vrot.lane.b32.xlu1 %v2655_v17, %s2190_s20  ;;  %s2843_s20 = scalar_lea.vmem %s2900_s3, %s1925_s17 }
  0xe6   : > { %1194 = vrot.lane.b32.xlu0 %v2393_v16, %s2192_s22 }
  0xe7   : > { %v999_v44 = vpop.permute.xlu1 %998 }
  0xe8   : > { %1001 = vst.msk [vmem:[#allocation2 + $0x58] sm:$0xff] %vm248_vm5, %v999_v44  ;;  %v939_v10 = vpop.permute.xlu0 %938 }
  0xe9   : > { %941 = vst.msk [vmem:[#allocation2 + $0x50] sm:$0xff] %vm257_vm6, %v939_v10  ;;  %718 = vrot.lane.b32.xlu1 %v2311_v50, %s2192_s22 }
  0xea   : > { %658 = vrot.lane.b32.xlu0 %v2620_v61, %s2193_s23  ;;  %v746_v61 = vld [vmem:[%s2242_s19 + $0xa3] sm:$0xff] }
  0xeb   : > { %v463_v16 = vpop.permute.xlu1 %462  ;;  %v748_v2 = vpack.c.bf16 %v747_v62, %v746_v61 }
  0xec   : > { %465 = vst.msk [vmem:[#allocation2 + $0x18] sm:$0xff] %vm257_vm6, %v463_v16  ;;  %v403_v33 = vpop.permute.xlu0 %402 }
  0xed   : > { %405 = vst.msk [vmem:[#allocation2 + $0x10] sm:$0xff] %vm266_vm7, %v403_v33  ;;  %1262 = vrot.lane.b32.xlu1 %v1260_v30, %s2192_s22 }
  0xee   : > { %1202 = vrot.lane.b32.xlu0 %v2631_v3, %s2193_s23  ;;  %v1290_v3 = vld [vmem:[%s2242_s19 + $0x133] sm:$0xff] }
  0xef   : > { %v1007_v37 = vpop.permute.xlu1 %1006  ;;  %v1292_v8 = vpack.c.bf16 %v1291_v4, %v1290_v3 }
  0xf0   : > { %1009 = vst.msk [vmem:[#allocation2 + $0x58] sm:$0xff] %vm257_vm6, %v1007_v37  ;;  %v947_v38 = vpop.permute.xlu0 %946 }
  0xf1   : > { %949 = vst.msk [vmem:[#allocation2 + $0x50] sm:$0xff] %vm266_vm7, %v947_v38  ;;  %726 = vrot.lane.b32.xlu1 %v724_v34, %s2193_s23 }
  0xf2   : > { %666 = vrot.lane.b32.xlu0 %v2644_v9, %s2194_s24  ;;  %v1298_v9 = vld [vmem:[%s2242_s19 + $0x134] sm:$0xff] }
  0xf3   : > { %v471_v42 = vpop.permute.xlu1 %470  ;;  %v1300_v18 = vpack.c.bf16 %v1299_v11, %v1298_v9 }
  0xf4   : > { %473 = vst.msk [vmem:[#allocation2 + $0x18] sm:$0xff] %vm266_vm7, %v471_v42  ;;  %v411_v43 = vpop.permute.xlu0 %410 }
  0xf5   : > { %413 = vst.msk [vmem:[#allocation2 + $0x10] sm:$0xff] %vm275_vm8, %v411_v43  ;;  %1270 = vrot.lane.b32.xlu1 %v1268_v39, %s2193_s23 }
  0xf6   : > { %1210 = vrot.lane.b32.xlu0 %v2655_v17, %s2194_s24 }
  0xf7   : > { %v1015_v48 = vpop.permute.xlu1 %1014 }
  0xf8   : > { %1017 = vst.msk [vmem:[#allocation2 + $0x58] sm:$0xff] %vm266_vm7, %v1015_v48  ;;  %v955_v49 = vpop.permute.xlu0 %954 }
  0xf9   : > { %957 = vst.msk [vmem:[#allocation2 + $0x50] sm:$0xff] %vm275_vm8, %v955_v49  ;;  %734 = vrot.lane.b32.xlu1 %v732_v45, %s2194_s24 }
  0xfa   : > { %674 = vrot.lane.b32.xlu0 %v2311_v50, %s2195_s27 }
  0xfb   : > { %v479_v54 = vpop.permute.xlu1 %478 }
  0xfc   : > { %481 = vst.msk [vmem:[#allocation2 + $0x18] sm:$0xff] %vm275_vm8, %v479_v54  ;;  %v419_v56 = vpop.permute.xlu0 %418 }
  0xfd   : > { %421 = vst.msk [vmem:[#allocation2 + $0x10] sm:$0xff] %vm284_vm9, %v419_v56  ;;  %1278 = vrot.lane.b32.xlu1 %v1276_v51, %s2194_s24 }
  0xfe   : > { %1218 = vrot.lane.b32.xlu0 %v1260_v30, %s2195_s27 }
  0xff   : > { %v1023_v58 = vpop.permute.xlu1 %1022 }
 0x100   : > { %1025 = vst.msk [vmem:[#allocation2 + $0x58] sm:$0xff] %vm275_vm8, %v1023_v58  ;;  %v963_v50 = vpop.permute.xlu0 %962 }
 0x101   : > { %965 = vst.msk [vmem:[#allocation2 + $0x50] sm:$0xff] %vm284_vm9, %v963_v50  ;;  %742 = vrot.lane.b32.xlu1 %v740_v55, %s2195_s27 }
 0x102   : > { %682 = vrot.lane.b32.xlu0 %v724_v34, %s2196_s5 }
 0x103   : > { %v499_v63 = vpop.permute.xlu1 %498 }
 0x104   : > { %501 = vst.msk [vmem:[#allocation2 + $0x20] sm:$0xff] %vm221_vm2, %v499_v63  ;;  %v487_v0 = vpop.permute.xlu0 %486  ;;  %v1308_v1 = vld [vmem:[#allocation2 + $0x10] sm:$0xff] }
 0x105   : > { %489 = vst.msk [vmem:[#allocation2 + $0x18] sm:$0xff] %vm284_vm9, %v487_v0  ;;  %2088 = vmatprep.mubr.msk.bf16.mxu0 %vm1365_vm10, %v1308_v1  ;;  %1286 = vrot.lane.b32.xlu1 %v1284_v60, %s2195_s27 }
 0x106   : > { %1226 = vrot.lane.b32.xlu0 %v1268_v39, %s2196_s5 }
 0x107   : > { %v1043_v5 = vpop.permute.xlu1 %1042 }
 0x108   : > { %1045 = vst.msk [vmem:[#allocation2 + $0x60] sm:$0xff] %vm221_vm2, %v1043_v5  ;;  %v1031_v6 = vpop.permute.xlu0 %1030  ;;  %v1316_v7 = vld [vmem:[#allocation2 + $0x50] sm:$0xff] }
 0x109   : > { %1033 = vst.msk [vmem:[#allocation2 + $0x58] sm:$0xff] %vm284_vm9, %v1031_v6  ;;  %2104 = vmatprep.mubr.msk.bf16.mxu1 %vm1365_vm10, %v1316_v7  ;;  %750 = vrot.lane.b32.xlu1 %v748_v2, %s2196_s5 }
 0x10a   : > { %690 = vrot.lane.b32.xlu0 %v732_v45, %s2197_s10 }
 0x10b   : > { %v567_v12 = vpop.permute.xlu1 %566 }
 0x10c   : > { %569 = vst.msk [vmem:[#allocation2 + $0x28] sm:$0xff] %vm221_vm2, %v567_v12  ;;  %v507_v15 = vpop.permute.xlu0 %506  ;;  %v1309_v17 = vld [vmem:[#allocation2 + $0x18] sm:$0xff] }
 0x10d   : > { %509 = vst.msk [vmem:[#allocation2 + $0x20] sm:$0xff] %vm230_vm3, %v507_v15  ;;  %2089 = vmatmul.mubr.msk.bf16.gmra.mrb[4].mxu0 %vm1365_vm10, %v1309_v17  ;;  %1294 = vrot.lane.b32.xlu1 %v1292_v8, %s2196_s5 }
 0x10e   : > { %1234 = vrot.lane.b32.xlu0 %v1276_v51, %s2197_s10 }
 0x10f   : > { %v1111_v20 = vpop.permute.xlu1 %1110 }
 0x110   : > { %1113 = vst.msk [vmem:[#allocation2 + $0x68] sm:$0xff] %vm221_vm2, %v1111_v20  ;;  %v1051_v21 = vpop.permute.xlu0 %1050  ;;  %v1317_v22 = vld [vmem:[#allocation2 + $0x58] sm:$0xff] }
 0x111   : > { %1053 = vst.msk [vmem:[#allocation2 + $0x60] sm:$0xff] %vm230_vm3, %v1051_v21  ;;  %2105 = vmatmul.mubr.msk.bf16.gmra.mrb[4].mxu1 %vm1365_vm10, %v1317_v22  ;;  %1302 = vrot.lane.b32.xlu1 %v1300_v18, %s2197_s10 }
 0x112   : > { %758 = vrot.lane.b32.xlu0 %v756_v19, %s2197_s10 }
 0x113   : > { %v575_v23 = vpop.permute.xlu1 %574 }
 0x114   : > { %577 = vst.msk [vmem:[#allocation2 + $0x28] sm:$0xff] %vm230_vm3, %v575_v23  ;;  %v515_v24 = vpop.permute.xlu0 %514 }
 0x115   : > { %517 = vst.msk [vmem:[#allocation2 + $0x20] sm:$0xff] %vm239_vm4, %v515_v24 }
 0x117   : > { %v1119_v25 = vpop.permute.xlu1 %1118 }
 0x118   : > { %1121 = vst.msk [vmem:[#allocation2 + $0x68] sm:$0xff] %vm230_vm3, %v1119_v25  ;;  %v1059_v26 = vpop.permute.xlu0 %1058  ;;  %v2832_v25 = vld [vmem:[%s2899_s2] ss:$0 sm:$0xff] }
 0x119   : > { %1061 = vst.msk [vmem:[#allocation2 + $0x60] sm:$0xff] %vm239_vm4, %v1059_v26 }
 0x11b   : > { %v583_v27 = vpop.permute.xlu1 %582 }
 0x11c   : > { %585 = vst.msk [vmem:[#allocation2 + $0x28] sm:$0xff] %vm239_vm4, %v583_v27  ;;  %v523_v28 = vpop.permute.xlu0 %522 }
 0x11d   : > { %525 = vst.msk [vmem:[#allocation2 + $0x20] sm:$0xff] %vm248_vm5, %v523_v28 }
 0x11f   : > { %v1127_v29 = vpop.permute.xlu1 %1126 }
 0x120   : > { %1129 = vst.msk [vmem:[#allocation2 + $0x68] sm:$0xff] %vm239_vm4, %v1127_v29  ;;  %v1067_v44 = vpop.permute.xlu0 %1066 }
 0x121   : > { %1069 = vst.msk [vmem:[#allocation2 + $0x60] sm:$0xff] %vm248_vm5, %v1067_v44 }
 0x123   : > { %v591_v10 = vpop.permute.xlu1 %590 }
 0x124   : > { %593 = vst.msk [vmem:[#allocation2 + $0x28] sm:$0xff] %vm248_vm5, %v591_v10  ;;  %v531_v30 = vpop.permute.xlu0 %530 }
 0x125   : > { %533 = vst.msk [vmem:[#allocation2 + $0x20] sm:$0xff] %vm257_vm6, %v531_v30 }
 0x127   : > { %v1135_v31 = vpop.permute.xlu1 %1134 }
 0x128   : > { %1137 = vst.msk [vmem:[#allocation2 + $0x68] sm:$0xff] %vm248_vm5, %v1135_v31  ;;  %v1075_v32 = vpop.permute.xlu0 %1074 }
 0x129   : > { %1077 = vst.msk [vmem:[#allocation2 + $0x60] sm:$0xff] %vm257_vm6, %v1075_v32 }
 0x12b   : > { %v599_v16 = vpop.permute.xlu1 %598 }
 0x12c   : > { %601 = vst.msk [vmem:[#allocation2 + $0x28] sm:$0xff] %vm257_vm6, %v599_v16  ;;  %v539_v33 = vpop.permute.xlu0 %538 }
 0x12d   : > { %541 = vst.msk [vmem:[#allocation2 + $0x20] sm:$0xff] %vm266_vm7, %v539_v33 }
 0x12f   : > { %v1143_v34 = vpop.permute.xlu1 %1142 }
 0x130   : > { %1145 = vst.msk [vmem:[#allocation2 + $0x68] sm:$0xff] %vm257_vm6, %v1143_v34  ;;  %v1083_v35 = vpop.permute.xlu0 %1082 }
 0x131   : > { %1085 = vst.msk [vmem:[#allocation2 + $0x60] sm:$0xff] %vm266_vm7, %v1083_v35 }
 0x133   : > { %v607_v36 = vpop.permute.xlu1 %606 }
 0x134   : > { %609 = vst.msk [vmem:[#allocation2 + $0x28] sm:$0xff] %vm266_vm7, %v607_v36  ;;  %v547_v37 = vpop.permute.xlu0 %546 }
 0x135   : > { %549 = vst.msk [vmem:[#allocation2 + $0x20] sm:$0xff] %vm275_vm8, %v547_v37 }
 0x137   : > { %v1151_v38 = vpop.permute.xlu1 %1150 }
 0x138   : > { %1153 = vst.msk [vmem:[#allocation2 + $0x68] sm:$0xff] %vm266_vm7, %v1151_v38  ;;  %v1091_v39 = vpop.permute.xlu0 %1090 }
 0x139   : > { %1093 = vst.msk [vmem:[#allocation2 + $0x60] sm:$0xff] %vm275_vm8, %v1091_v39 }
 0x13b   : > { %v615_v40 = vpop.permute.xlu1 %614 }
 0x13c   : > { %617 = vst.msk [vmem:[#allocation2 + $0x28] sm:$0xff] %vm275_vm8, %v615_v40  ;;  %v555_v41 = vpop.permute.xlu0 %554 }
 0x13d   : > { %557 = vst.msk [vmem:[#allocation2 + $0x20] sm:$0xff] %vm284_vm9, %v555_v41 }
 0x13f   : > { %v1159_v42 = vpop.permute.xlu1 %1158 }
 0x140   : > { %1161 = vst.msk [vmem:[#allocation2 + $0x68] sm:$0xff] %vm275_vm8, %v1159_v42  ;;  %v1099_v43 = vpop.permute.xlu0 %1098 }
 0x141   : > { %1101 = vst.msk [vmem:[#allocation2 + $0x60] sm:$0xff] %vm284_vm9, %v1099_v43 }
 0x143   : > { %v635_v45 = vpop.permute.xlu1 %634 }
 0x144   : > { %637 = vst.msk [vmem:[#allocation2 + $0x30] sm:$0xff] %vm221_vm2, %v635_v45  ;;  %v623_v46 = vpop.permute.xlu0 %622  ;;  %v1310_v47 = vld [vmem:[#allocation2 + $0x20] sm:$0xff] }
 0x145   : > { %625 = vst.msk [vmem:[#allocation2 + $0x28] sm:$0xff] %vm284_vm9, %v623_v46  ;;  %2092 = vmatprep.mubr.msk.bf16.mxu0 %vm1365_vm10, %v1310_v47 }
 0x147   : > { %v1179_v48 = vpop.permute.xlu1 %1178 }
 0x148   : > { %1181 = vst.msk [vmem:[#allocation2 + $0x70] sm:$0xff] %vm221_vm2, %v1179_v48  ;;  %v1167_v49 = vpop.permute.xlu0 %1166  ;;  %v1318_v51 = vld [vmem:[#allocation2 + $0x60] sm:$0xff] }
 0x149   : > { %1169 = vst.msk [vmem:[#allocation2 + $0x68] sm:$0xff] %vm284_vm9, %v1167_v49  ;;  %2108 = vmatprep.mubr.msk.bf16.mxu1 %vm1365_vm10, %v1318_v51 }
 0x14b   : > { %v703_v52 = vpop.permute.xlu1 %702 }
 0x14c   : > { %705 = vst.msk [vmem:[#allocation2 + $0x38] sm:$0xff] %vm221_vm2, %v703_v52  ;;  %v643_v53 = vpop.permute.xlu0 %642  ;;  %v1311_v54 = vld [vmem:[#allocation2 + $0x28] sm:$0xff] }
 0x14d   : > { %645 = vst.msk [vmem:[#allocation2 + $0x30] sm:$0xff] %vm230_vm3, %v643_v53  ;;  %2093 = vmatmul.mubr.msk.bf16.gmra.mrb[8].mxu0 %vm1365_vm10, %v1311_v54 }
 0x14f   : > { %v1247_v56 = vpop.permute.xlu1 %1246 }
 0x150   : > { %1249 = vst.msk [vmem:[#allocation2 + $0x78] sm:$0xff] %vm221_vm2, %v1247_v56  ;;  %v1187_v55 = vpop.permute.xlu0 %1186  ;;  %v1319_v57 = vld [vmem:[#allocation2 + $0x68] sm:$0xff] }
 0x151   : > { %1189 = vst.msk [vmem:[#allocation2 + $0x70] sm:$0xff] %vm230_vm3, %v1187_v55  ;;  %2109 = vmatmul.mubr.msk.bf16.gmra.mrb[8].mxu1 %vm1365_vm10, %v1319_v57 }
 0x153   : > { %v711_v59 = vpop.permute.xlu1 %710 }
 0x154   : > { %713 = vst.msk [vmem:[#allocation2 + $0x38] sm:$0xff] %vm230_vm3, %v711_v59  ;;  %v651_v58 = vpop.permute.xlu0 %650 }
 0x155   : > { %653 = vst.msk [vmem:[#allocation2 + $0x30] sm:$0xff] %vm239_vm4, %v651_v58 }
 0x157   : > { %v1255_v50 = vpop.permute.xlu1 %1254 }
 0x158   : > { %1257 = vst.msk [vmem:[#allocation2 + $0x78] sm:$0xff] %vm230_vm3, %v1255_v50  ;;  %v1195_v60 = vpop.permute.xlu0 %1194 }
 0x159   : > { %1197 = vst.msk [vmem:[#allocation2 + $0x70] sm:$0xff] %vm239_vm4, %v1195_v60 }
 0x15b   : > { %v719_v61 = vpop.permute.xlu1 %718 }
 0x15c   : > { %721 = vst.msk [vmem:[#allocation2 + $0x38] sm:$0xff] %vm239_vm4, %v719_v61  ;;  %v659_v62 = vpop.permute.xlu0 %658 }
 0x15d   : > { %661 = vst.msk [vmem:[#allocation2 + $0x30] sm:$0xff] %vm248_vm5, %v659_v62 }
 0x15f   : > { %v1263_v63 = vpop.permute.xlu1 %1262 }
 0x160   : > { %1265 = vst.msk [vmem:[#allocation2 + $0x78] sm:$0xff] %vm239_vm4, %v1263_v63  ;;  %v1203_v0 = vpop.permute.xlu0 %1202 }
 0x161   : > { %1205 = vst.msk [vmem:[#allocation2 + $0x70] sm:$0xff] %vm248_vm5, %v1203_v0 }
 0x163   : > { %v727_v1 = vpop.permute.xlu1 %726 }
 0x164   : > { %729 = vst.msk [vmem:[#allocation2 + $0x38] sm:$0xff] %vm248_vm5, %v727_v1  ;;  %v667_v2 = vpop.permute.xlu0 %666 }
 0x165   : > { %669 = vst.msk [vmem:[#allocation2 + $0x30] sm:$0xff] %vm257_vm6, %v667_v2 }
 0x167   : > { %v1271_v3 = vpop.permute.xlu1 %1270 }
 0x168   : > { %1273 = vst.msk [vmem:[#allocation2 + $0x78] sm:$0xff] %vm248_vm5, %v1271_v3  ;;  %v1211_v4 = vpop.permute.xlu0 %1210 }
 0x169   : > { %1213 = vst.msk [vmem:[#allocation2 + $0x70] sm:$0xff] %vm257_vm6, %v1211_v4 }
 0x16b   : > { %v735_v5 = vpop.permute.xlu1 %734 }
 0x16c   : > { %737 = vst.msk [vmem:[#allocation2 + $0x38] sm:$0xff] %vm257_vm6, %v735_v5  ;;  %v675_v6 = vpop.permute.xlu0 %674 }
 0x16d   : > { %677 = vst.msk [vmem:[#allocation2 + $0x30] sm:$0xff] %vm266_vm7, %v675_v6 }
 0x16f   : > { %v1279_v7 = vpop.permute.xlu1 %1278 }
 0x170   : > { %1281 = vst.msk [vmem:[#allocation2 + $0x78] sm:$0xff] %vm257_vm6, %v1279_v7  ;;  %v1219_v8 = vpop.permute.xlu0 %1218 }
 0x171   : > { %1221 = vst.msk [vmem:[#allocation2 + $0x70] sm:$0xff] %vm266_vm7, %v1219_v8 }
 0x173   : > { %v743_v9 = vpop.permute.xlu1 %742 }
 0x174   : > { %745 = vst.msk [vmem:[#allocation2 + $0x38] sm:$0xff] %vm266_vm7, %v743_v9  ;;  %v683_v11 = vpop.permute.xlu0 %682 }
 0x175   : > { %685 = vst.msk [vmem:[#allocation2 + $0x30] sm:$0xff] %vm275_vm8, %v683_v11 }
 0x177   : > { %v1287_v12 = vpop.permute.xlu1 %1286 }
 0x178   : > { %1289 = vst.msk [vmem:[#allocation2 + $0x78] sm:$0xff] %vm266_vm7, %v1287_v12  ;;  %v1227_v13 = vpop.permute.xlu0 %1226 }
 0x179   : > { %1229 = vst.msk [vmem:[#allocation2 + $0x70] sm:$0xff] %vm275_vm8, %v1227_v13 }
 0x17b   : > { %v751_v14 = vpop.permute.xlu1 %750 }
 0x17c   : > { %753 = vst.msk [vmem:[#allocation2 + $0x38] sm:$0xff] %vm275_vm8, %v751_v14  ;;  %v691_v15 = vpop.permute.xlu0 %690 }
 0x17d   : > { %693 = vst.msk [vmem:[#allocation2 + $0x30] sm:$0xff] %vm284_vm9, %v691_v15 }
 0x17f   : > { %v1295_v17 = vpop.permute.xlu1 %1294 }
 0x180   : > { %1297 = vst.msk [vmem:[#allocation2 + $0x78] sm:$0xff] %vm275_vm8, %v1295_v17  ;;  %v1235_v18 = vpop.permute.xlu0 %1234 }
 0x181   : > { %1237 = vst.msk [vmem:[#allocation2 + $0x70] sm:$0xff] %vm284_vm9, %v1235_v18 }
 0x183   : > { %v1303_v19 = vpop.permute.xlu1 %1302 }
 0x184   : > { %1305 = vst.msk [vmem:[#allocation2 + $0x78] sm:$0xff] %vm284_vm9, %v1303_v19  ;;  %v759_v20 = vpop.permute.xlu0 %758  ;;  %v1312_v21 = vld [vmem:[#allocation2 + $0x30] sm:$0xff] }
 0x185   : > { %761 = vst.msk [vmem:[#allocation2 + $0x38] sm:$0xff] %vm284_vm9, %v759_v20  ;;  %2096 = vmatprep.mubr.msk.bf16.mxu0 %vm1365_vm10, %v1312_v21 }
 0x188   : > { %v1320_v22 = vld [vmem:[#allocation2 + $0x70] sm:$0xff] }
 0x189   : > { %2112 = vmatprep.mubr.msk.bf16.mxu1 %vm1365_vm10, %v1320_v22 }
 0x18b   : > { %v1321_v23 = vld [vmem:[#allocation2 + $0x78] sm:$0xff] }
 0x18c   : > { %v1313_v24 = vld [vmem:[#allocation2 + $0x38] sm:$0xff]  ;;  %2113 = vmatmul.mubr.msk.bf16.gmra.mrb[12].mxu1 %vm1365_vm10, %v1321_v23 }
 0x18d   : > { %2097 = vmatmul.mubr.msk.bf16.gmra.mrb[12].mxu0 %vm1365_vm10, %v1313_v24 }
 0x1a0   : > { %v2086_v26 = vpop.f32.mrb[0].mxu0 }
 0x1a1   : > { %v1461_v27 = vadd.f32 %v2086_v26, %v2832_v25  ;;  %v1452_v28 = vpop.f32.mrb[1].mxu0 }
 0x1a2   : > { %v1453_v29 = vadd.f32 %v2832_v25, %v1452_v28  ;;  %v2087_v44 = vpop.f32.mrb[2].mxu0 }
 0x1a3   : > { %v1464_v10 = vadd.f32 %v2087_v44, %v2832_v25  ;;  %v1455_v30 = vpop.f32.mrb[3].mxu0  ;;  %v1581_v16 = vmax.f32 %v1461_v27, 0.0 }
 0x1a4   : > { %v1456_v31 = vadd.f32 %v2832_v25, %v1455_v30  ;;  %v2102_v32 = vpop.f32.mrb[0].mxu1  ;;  %v1579_v36 = vmax.f32 %v1453_v29, 0.0 }
 0x1a5   : > { %v1582_v33 = vmax.f32 %v1464_v10, 0.0  ;;  %v1525_v34 = vadd.f32 %v2102_v32, %v2832_v25  ;;  %v1516_v35 = vpop.f32.mrb[1].mxu1 }
 0x1a6   : > { %v1580_v37 = vmax.f32 %v1456_v31, 0.0  ;;  %v1517_v38 = vadd.f32 %v2832_v25, %v1516_v35  ;;  %v2103_v39 = vpop.f32.mrb[2].mxu1 }
 0x1a7   : > { %v1966_v40 = vpack.c.bf16 %v1582_v33, %v1581_v16  ;;  %v1528_v41 = vadd.f32 %v2103_v39, %v2832_v25  ;;  %v1519_v42 = vpop.f32.mrb[3].mxu1  ;;  %v1597_v46 = vmax.f32 %v1525_v34, 0.0 }
 0x1a8   : > { %v1961_v43 = vpack.c.bf16 %v1580_v37, %v1579_v36  ;;  %v1520_v45 = vadd.f32 %v2832_v25, %v1519_v42  ;;  %v1595_v48 = vmax.f32 %v1517_v38, 0.0 }
 0x1a9   : > { %2038 = vst [vmem:[%s2843_s20 + $0x8] sm:$0xff] %v1966_v40   ;;  %v1598_v47 = vmax.f32 %v1528_v41, 0.0 }
 0x1aa   : > { %1962 = vst [vmem:[%s2843_s20] sm:$0xff] %v1961_v43   ;;  %v1596_v49 = vmax.f32 %v1520_v45, 0.0 }
 0x1ab   : > { %v2006_v51 = vpack.c.bf16 %v1598_v47, %v1597_v46 }
 0x1ac   : > { %v2001_v52 = vpack.c.bf16 %v1596_v49, %v1595_v48 }
 0x1ad   : > { %2046 = vst [vmem:[%s2843_s20 + $0x48] sm:$0xff] %v2006_v51  }
 0x1ae   : > { %2045 = vst [vmem:[%s2843_s20 + $0x40] sm:$0xff] %v2001_v52  }
 0x1e0   : > { %v2090_v53 = vpop.f32.mrb[4].mxu0 }
 0x1e1   : > { %v1477_v54 = vadd.f32 %v2090_v53, %v2832_v25  ;;  %v1468_v56 = vpop.f32.mrb[5].mxu0 }
 0x1e2   : > { %v1469_v55 = vadd.f32 %v2832_v25, %v1468_v56  ;;  %v2091_v57 = vpop.f32.mrb[6].mxu0 }
 0x1e3   : > { %v1480_v59 = vadd.f32 %v2091_v57, %v2832_v25  ;;  %v1471_v58 = vpop.f32.mrb[7].mxu0  ;;  %v1585_v61 = vmax.f32 %v1477_v54, 0.0 }
 0x1e4   : > { %v1472_v50 = vadd.f32 %v2832_v25, %v1471_v58  ;;  %v2106_v60 = vpop.f32.mrb[4].mxu1  ;;  %v1583_v1 = vmax.f32 %v1469_v55, 0.0 }
 0x1e5   : > { %v1586_v62 = vmax.f32 %v1480_v59, 0.0  ;;  %v1541_v63 = vadd.f32 %v2106_v60, %v2832_v25  ;;  %v1532_v0 = vpop.f32.mrb[5].mxu1 }
 0x1e6   : > { %v1584_v2 = vmax.f32 %v1472_v50, 0.0  ;;  %v1533_v3 = vadd.f32 %v2832_v25, %v1532_v0  ;;  %v2107_v4 = vpop.f32.mrb[6].mxu1 }
 0x1e7   : > { %v1976_v5 = vpack.c.bf16 %v1586_v62, %v1585_v61  ;;  %v1544_v6 = vadd.f32 %v2107_v4, %v2832_v25  ;;  %v1535_v7 = vpop.f32.mrb[7].mxu1  ;;  %v1601_v11 = vmax.f32 %v1541_v63, 0.0 }
 0x1e8   : > { %v1971_v8 = vpack.c.bf16 %v1584_v2, %v1583_v1  ;;  %v1536_v9 = vadd.f32 %v2832_v25, %v1535_v7  ;;  %v1599_v13 = vmax.f32 %v1533_v3, 0.0 }
 0x1e9   : > { %2040 = vst [vmem:[%s2843_s20 + $0x18] sm:$0xff] %v1976_v5   ;;  %v1602_v12 = vmax.f32 %v1544_v6, 0.0 }
 0x1ea   : > { %2039 = vst [vmem:[%s2843_s20 + $0x10] sm:$0xff] %v1971_v8   ;;  %v1600_v14 = vmax.f32 %v1536_v9, 0.0 }
 0x1eb   : > { %v2016_v15 = vpack.c.bf16 %v1602_v12, %v1601_v11 }
 0x1ec   : > { %v2011_v17 = vpack.c.bf16 %v1600_v14, %v1599_v13 }
 0x1ed   : > { %2048 = vst [vmem:[%s2843_s20 + $0x58] sm:$0xff] %v2016_v15  }
 0x1ee   : > { %2047 = vst [vmem:[%s2843_s20 + $0x50] sm:$0xff] %v2011_v17  }
 0x220   : > { %v2094_v18 = vpop.f32.mrb[8].mxu0 }
 0x221   : > { %v1493_v19 = vadd.f32 %v2094_v18, %v2832_v25  ;;  %v1484_v20 = vpop.f32.mrb[9].mxu0 }
 0x222   : > { %v1485_v21 = vadd.f32 %v2832_v25, %v1484_v20  ;;  %v2095_v22 = vpop.f32.mrb[10].mxu0 }
 0x223   : > { %v1496_v23 = vadd.f32 %v2095_v22, %v2832_v25  ;;  %v1487_v24 = vpop.f32.mrb[11].mxu0  ;;  %v1589_v28 = vmax.f32 %v1493_v19, 0.0 }
 0x224   : > { %v1488_v26 = vadd.f32 %v2832_v25, %v1487_v24  ;;  %v2110_v27 = vpop.f32.mrb[8].mxu1  ;;  %v1587_v30 = vmax.f32 %v1485_v21, 0.0 }
 0x225   : > { %v1590_v29 = vmax.f32 %v1496_v23, 0.0  ;;  %v1557_v44 = vadd.f32 %v2110_v27, %v2832_v25  ;;  %v1548_v10 = vpop.f32.mrb[9].mxu1 }
 0x226   : > { %v1588_v31 = vmax.f32 %v1488_v26, 0.0  ;;  %v1549_v32 = vadd.f32 %v2832_v25, %v1548_v10  ;;  %v2111_v16 = vpop.f32.mrb[10].mxu1 }
 0x227   : > { %v1986_v33 = vpack.c.bf16 %v1590_v29, %v1589_v28  ;;  %v1560_v34 = vadd.f32 %v2111_v16, %v2832_v25  ;;  %v1551_v35 = vpop.f32.mrb[11].mxu1  ;;  %v1605_v38 = vmax.f32 %v1557_v44, 0.0 }
 0x228   : > { %v1981_v36 = vpack.c.bf16 %v1588_v31, %v1587_v30  ;;  %v1552_v37 = vadd.f32 %v2832_v25, %v1551_v35  ;;  %v1603_v40 = vmax.f32 %v1549_v32, 0.0 }
 0x229   : > { %2042 = vst [vmem:[%s2843_s20 + $0x28] sm:$0xff] %v1986_v33   ;;  %v1606_v39 = vmax.f32 %v1560_v34, 0.0 }
 0x22a   : > { %2041 = vst [vmem:[%s2843_s20 + $0x20] sm:$0xff] %v1981_v36   ;;  %v1604_v41 = vmax.f32 %v1552_v37, 0.0 }
 0x22b   : > { %v2026_v42 = vpack.c.bf16 %v1606_v39, %v1605_v38 }
 0x22c   : > { %v2021_v43 = vpack.c.bf16 %v1604_v41, %v1603_v40 }
 0x22d   : > { %2050 = vst [vmem:[%s2843_s20 + $0x68] sm:$0xff] %v2026_v42  }
 0x22e   : > { %2049 = vst [vmem:[%s2843_s20 + $0x60] sm:$0xff] %v2021_v43  }
 0x25f   : > { %v2114_v45 = vpop.f32.mrb[12].mxu1 }
 0x260   : > { %v2098_v46 = vpop.f32.mrb[12].mxu0  ;;  %v1573_v47 = vadd.f32 %v2114_v45, %v2832_v25  ;;  %v1564_v48 = vpop.f32.mrb[13].mxu1 }
 0x261   : > { %v1509_v49 = vadd.f32 %v2098_v46, %v2832_v25  ;;  %v1500_v51 = vpop.f32.mrb[13].mxu0  ;;  %v1565_v52 = vadd.f32 %v2832_v25, %v1564_v48  ;;  %v2115_v53 = vpop.f32.mrb[14].mxu1 }
 0x262   : > { %v1501_v54 = vadd.f32 %v2832_v25, %v1500_v51  ;;  %v2099_v56 = vpop.f32.mrb[14].mxu0  ;;  %v1576_v55 = vadd.f32 %v2115_v53, %v2832_v25  ;;  %v1567_v57 = vpop.f32.mrb[15].mxu1  ;;  %v1609_v60 = vmax.f32 %v1573_v47, 0.0 }
 0x263   : > { %v1512_v59 = vadd.f32 %v2099_v56, %v2832_v25  ;;  %v1503_v58 = vpop.f32.mrb[15].mxu0  ;;  %v1568_v50 = vadd.f32 %v2832_v25, %v1567_v57  ;;  %v1593_v63 = vmax.f32 %v1509_v49, 0.0  ;;  %v1607_v0 = vmax.f32 %v1565_v52, 0.0 }
 0x264   : > { %v1610_v61 = vmax.f32 %v1576_v55, 0.0  ;;  %v1504_v62 = vadd.f32 %v2832_v25, %v1503_v58  ;;  %v1591_v3 = vmax.f32 %v1501_v54, 0.0 }
 0x265   : > { %v1594_v1 = vmax.f32 %v1512_v59, 0.0  ;;  %v1608_v2 = vmax.f32 %v1568_v50, 0.0 }
 0x266   : > { %v2036_v4 = vpack.c.bf16 %v1610_v61, %v1609_v60  ;;  %v1592_v5 = vmax.f32 %v1504_v62, 0.0 }
 0x267   : > { %v1996_v6 = vpack.c.bf16 %v1594_v1, %v1593_v63  ;;  %v2031_v7 = vpack.c.bf16 %v1608_v2, %v1607_v0 }
 0x268   : > { %2052 = vst [vmem:[%s2843_s20 + $0x78] sm:$0xff] %v2036_v4   ;;  %v1991_v8 = vpack.c.bf16 %v1592_v5, %v1591_v3 }
 0x269   : > { %2044 = vst [vmem:[%s2843_s20 + $0x38] sm:$0xff] %v1996_v6   ;;  %2051 = vst [vmem:[%s2843_s20 + $0x70] sm:$0xff] %v2031_v7  }
 0x26a   : > { %2043 = vst [vmem:[%s2843_s20 + $0x30] sm:$0xff] %v1991_v8  }
 0x26b PF: > { %s13_s14 = sadd.s32 1, %s2188_s14   ;;  %s2901_s12 = smov %s2184_s13 }
 0x26c   : > { %p10_p5 = scmp.ge.s32.totalorder %s13_s14, 4   ;;  %s2902_s13 = smov %s2904_s15 }
 0x26e   :  { %12 = sbr.rel (!%p10_p5) target bundleno = 2 (0x2), region = 62 }

</bundles_post_ra>
